<compile_context>
chip_gen: v5e
topology: v5e:2x2
jax: 0.10.0
libtpu: 0.0.40
codegen_flags: <defaults>
</compile_context>

<pallas_src>
import numpy as np

import jax
import jax.numpy as jnp
from jax.experimental import pallas as pl
from jax.experimental.pallas import tpu as pltpu

EPS = 1e-5                      # PyTorch BatchNorm default eps
_VMEM_LIMIT = 32 * 1024 * 1024  # safe on v5e/v6e/v7x; far above our tile needs


def _cdiv(a, b):
    return -(-a // b)


def _round_up(a, b):
    return _cdiv(a, b) * b


# ---------------------------------------------------------------------------
# Phase 1 (the only Pallas pass per layer):
#   z_tile    = x_tile @ w_tile         (bf16 operands, f32 accumulation, MXU)
#   stat_tile = [sum(z, valid rows); sum((z - tile_mean)^2, valid rows)]
# Stats are computed from the f32 accumulator; z is stored in z_ref's dtype
# (bf16 for conv layers).  Zero pad rows give z == 0 exactly, so they are
# excluded from the centered M2 via the closed-form (tile_m - cnt) * mu^2
# correction (no per-element masking needed).
# ---------------------------------------------------------------------------
def _make_gemm_stats_kernel(tile_m, m_true):
    def kernel(x_ref, w_ref, z_ref, stat_ref):
        z = jnp.dot(x_ref[...], w_ref[...], preferred_element_type=jnp.float32)
        z_ref[...] = z.astype(z_ref.dtype)

        i = pl.program_id(0)
        cnt = jnp.minimum(tile_m, m_true - i * tile_m).astype(jnp.float32)
        ssum = jnp.sum(z, axis=0, keepdims=True)                  # [1, tn]
        mu = ssum / cnt
        m2 = (jnp.sum(jnp.square(z - mu), axis=0, keepdims=True)
              - (float(tile_m) - cnt) * jnp.square(mu))           # pad rows removed
        tn = ssum.shape[1]
        stat_ref[...] = jnp.concatenate([ssum, m2], axis=0).reshape(1, 2, tn)
    return kernel


def _weight_spec(k_pad, tn, nt):
    if nt == 1:
        idx = lambda i, j: (0, 0)
        try:
            # Loop-invariant block: single-buffer it (VMEM headroom on v7x).
            return pl.BlockSpec((k_pad, tn), idx, pipeline_mode=pl.Buffered(1))
        except (TypeError, AttributeError):
            return pl.BlockSpec((k_pad, tn), idx)
    return pl.BlockSpec((k_pad, tn), lambda i, j: (0, j))


def matmul_bn_relu(x, w, gamma, beta, *, out_dtype, z_dtype=jnp.bfloat16, tm=2048):
    """relu(batchnorm(x @ w)) with training-mode (batch) statistics.

    x: [M, K], w: [K_pad, N] (K_pad >= K, usually padded to a 128-multiple at
    weight-pack time), gamma/beta: [N]  ->  [M, N] in `out_dtype`.
    The GEMM + per-tile stats run in Pallas; the tiny finalize and the
    scale/shift/ReLU are plain jnp so XLA fuses them into whatever consumes
    the result (e.g. the next layer's im2col gather).
    Bias-free: any per-column bias is cancelled by the BN centering.
    """
    m, k = x.shape
    k_pad, n = w.shape

    # --- K padding (zero columns match the zero weight rows added at pack) ---
    if k_pad != k:
        x = jnp.pad(x, ((0, 0), (0, k_pad - k)))
    x = x.astype(jnp.bfloat16)
    w = w.astype(jnp.bfloat16)

    # --- M tiling: size tiles to the true M (minimal zero-row padding) -------
    ntiles = _cdiv(m, tm)
    tile_m = _round_up(_cdiv(m, ntiles), 16)       # mult. of 16: bf16 sublanes
    mt = _cdiv(m, tile_m)
    m_pad = mt * tile_m
    if m_pad != m:
        x = jnp.pad(x, ((0, m_pad - m), (0, 0)))   # zero rows -> z rows == 0

    # --- N tiling: give the v7x second TensorCore work when mt is small ------
    if n > 256 and n % 128 == 0:
        tn = 256 if n % 256 == 0 else 128
    else:
        tn = n                                     # full (legal even if <128)
    nt = n // tn

    z, partial = pl.pallas_call(
        _make_gemm_stats_kernel(tile_m, m),
        out_shape=(
            jax.ShapeDtypeStruct((m_pad, n), z_dtype),
            jax.ShapeDtypeStruct((mt, 2, n), jnp.float32),
        ),
        grid_spec=pltpu.PrefetchScalarGridSpec(
            num_scalar_prefetch=0,
            grid=(mt, nt),
            in_specs=[
                pl.BlockSpec((tile_m, k_pad), lambda i, j: (i, 0)),
                _weight_spec(k_pad, tn, nt),
            ],
            out_specs=(
                pl.BlockSpec((tile_m, tn), lambda i, j: (i, j)),
                pl.BlockSpec((1, 2, tn), lambda i, j: (i, 0, j)),
            ),
        ),
        compiler_params=pltpu.CompilerParams(
            dimension_semantics=("parallel", "parallel"),
            vmem_limit_bytes=_VMEM_LIMIT),
    )(x, w)

    # --- finalize statistics: Welford-style combine of per-tile (cnt,sum,M2) --
    cnts = np.minimum(tile_m, m - np.arange(mt) * tile_m).astype(np.float32)  # [mt]
    s_i = partial[:, 0, :]                                   # [mt, n]
    m2_i = partial[:, 1, :]                                  # [mt, n]
    mean = jnp.sum(s_i, axis=0) / float(m)                   # [n]
    mean_i = s_i / cnts[:, None]
    m2 = jnp.sum(m2_i, axis=0) + jnp.sum(cnts[:, None] * jnp.square(mean_i - mean), axis=0)
    var = jnp.maximum(m2 / float(m), 0.0)                    # biased, as in BN training
    scale = gamma.astype(jnp.float32) * jax.lax.rsqrt(var + EPS)
    shift = beta.astype(jnp.float32) - mean * scale

    # --- scale/shift/ReLU in jnp: fuses into the downstream im2col gather -----
    y = z[:m].astype(jnp.float32) * scale + shift
    return jnp.maximum(y, 0.0).astype(out_dtype)


# ---------------------------------------------------------------------------
# Plain-JAX glue: NHWC im2col (patch K-order = (kh, kw, c)).  XLA fuses the
# previous layer's scale/shift/ReLU producer into this gather.
# TODO(synk): replace with an in-kernel shifted-slice conv to kill the patch
#             materialization entirely.
# ---------------------------------------------------------------------------
def im2col_nhwc(x, k, s):
    """x: [N, H, W, C] -> ([N*OH*OW, k*k*C], OH, OW)."""
    n, h, w, c = x.shape
    oh = (h - k) // s + 1
    ow = (w - k) // s + 1
    cols = []
    for kh in range(k):
        for kw in range(k):
            cols.append(x[:, kh:kh + s * oh:s, kw:kw + s * ow:s, :])
    cols = jnp.stack(cols, axis=3)                  # [N, OH, OW, k*k, C]
    return cols.reshape(n * oh * ow, k * k * c), oh, ow


def conv_bn_relu_nhwc(x_nhwc, w_mat, gamma, beta, *, ksize, stride):
    """Conv2d(ksize, stride, no pad, bias cancelled) + BatchNorm2d + ReLU.

    NHWC in/out.  w_mat is the pre-packed GEMM weight [(k*k*Cin)_pad128, Cout].
    """
    n = x_nhwc.shape[0]
    c_out = w_mat.shape[1]
    patches, oh, ow = im2col_nhwc(x_nhwc, ksize, stride)     # [N*OH*OW, k*k*Cin]
    y = matmul_bn_relu(patches, w_mat, gamma, beta,
                       out_dtype=jnp.bfloat16, z_dtype=jnp.bfloat16, tm=2048)
    return y.reshape(n, oh, ow, c_out)                        # stay NHWC


# ---------------------------------------------------------------------------
# AtariFeatures parameters (PyTorch layout) + one-time packing + forward.
# ---------------------------------------------------------------------------
def init_params(key, input_depth, hidden_size):
    """PyTorch-layout parameters.  Conv2d/Linear biases are omitted — with
    training-mode BatchNorm a per-channel bias is cancelled exactly by the
    mean subtraction, so the forward output is identical without them."""
    ks = jax.random.split(key, 4)
    p = {}
    p["conv1_w"] = jax.random.normal(ks[0], (32, input_depth, 8, 8), jnp.float32) * 0.05
    p["bn1_g"], p["bn1_b"] = jnp.ones((32,), jnp.float32), jnp.zeros((32,), jnp.float32)
    p["conv2_w"] = jax.random.normal(ks[1], (64, 32, 4, 4), jnp.float32) * 0.05
    p["bn2_g"], p["bn2_b"] = jnp.ones((64,), jnp.float32), jnp.zeros((64,), jnp.float32)
    p["conv3_w"] = jax.random.normal(ks[2], (64, 64, 3, 3), jnp.float32) * 0.05
    p["bn3_g"], p["bn3_b"] = jnp.ones((64,), jnp.float32), jnp.zeros((64,), jnp.float32)
    p["fc_w"] = jax.random.normal(ks[3], (hidden_size, 64 * 7 * 7), jnp.float32) * 0.02
    p["bnf_g"], p["bnf_b"] = (jnp.ones((hidden_size,), jnp.float32),
                              jnp.zeros((hidden_size,), jnp.float32))
    return p


def _pad_k_rows(w_mat):
    k = w_mat.shape[0]
    k_pad = _round_up(k, 128)
    if k_pad != k:
        w_mat = jnp.pad(w_mat, ((0, k_pad - k), (0, 0)))   # zero rows: no effect
    return w_mat


def _pack_conv_w(w_conv):
    """PyTorch [Cout, Cin, KH, KW] -> bf16 GEMM matrix [(KH*KW*Cin)_pad128, Cout]
    with K-order (kh, kw, c) to match the NHWC im2col patches."""
    c_out, c_in, kh, kw = w_conv.shape
    w_mat = jnp.transpose(w_conv, (2, 3, 1, 0)).reshape(kh * kw * c_in, c_out)
    return _pad_k_rows(w_mat).astype(jnp.bfloat16)


def pack_params(p, hidden_size):
    """One-time conversion to kernel layout (done once, outside the forward)."""
    q = {}
    q["w1"], q["g1"], q["be1"] = _pack_conv_w(p["conv1_w"]), p["bn1_g"], p["bn1_b"]
    q["w2"], q["g2"], q["be2"] = _pack_conv_w(p["conv2_w"]), p["bn2_g"], p["bn2_b"]
    q["w3"], q["g3"], q["be3"] = _pack_conv_w(p["conv3_w"]), p["bn3_g"], p["bn3_b"]
    # fc: PyTorch weight [hidden, 64*7*7] with columns in (C, H, W) flatten
    # order; permute ONCE to (H, W, C) to match the NHWC-internal flatten, then
    # pad K 3136 -> 3200.
    wf = (p["fc_w"].reshape(hidden_size, 64, 7, 7)
                    .transpose(0, 2, 3, 1)
                    .reshape(hidden_size, 7 * 7 * 64)).T       # [3136, hidden]
    q["wf"] = _pad_k_rows(wf).astype(jnp.bfloat16)             # [3200, hidden]
    q["gf"], q["bef"] = p["bnf_g"], p["bnf_b"]
    return q


def atari_features_forward(params, x_nchw):
    """x_nchw: [N, input_depth, 84, 84] -> [N, hidden_size] float32.

    Matches AtariFeatures.forward with training-mode (batch-statistic)
    BatchNorm; conv/fc biases omitted (exactly cancelled by BN centering)."""
    # Single NCHW->NHWC permute at the boundary; everything internal is NHWC.
    x = jnp.transpose(x_nchw, (0, 2, 3, 1)).astype(jnp.bfloat16)
    h = conv_bn_relu_nhwc(x, params["w1"], params["g1"], params["be1"], ksize=8, stride=4)
    h = conv_bn_relu_nhwc(h, params["w2"], params["g2"], params["be2"], ksize=4, stride=2)
    h = conv_bn_relu_nhwc(h, params["w3"], params["g3"], params["be3"], ksize=3, stride=1)
    flat = h.reshape(h.shape[0], -1)                           # (H, W, C) order
    # fc weight already permuted to (H, W, C) row order and K-padded at pack time.
    return matmul_bn_relu(flat, params["wf"], params["gf"], params["bef"],
                          out_dtype=jnp.float32, z_dtype=jnp.float32, tm=512)


if __name__ == "__main__":
    # Spatial size must be 84x84 so the conv stack yields 7x7 (fc expects 64*7*7).
    batch, input_depth, hidden_size = 2, 4, 32
    key = jax.random.PRNGKey(0)
    k_x, k_p = jax.random.split(key)
    x = jax.random.normal(k_x, (batch, input_depth, 84, 84), jnp.float32)
    raw = init_params(k_p, input_depth, hidden_size)
    params = pack_params(raw, hidden_size)

    fwd = jax.jit(atari_features_forward)
    out = fwd(params, x)
    jax.block_until_ready(out)
    assert out.shape == (batch, hidden_size)
    assert bool(jnp.all(jnp.isfinite(out)))
    assert bool(jnp.all(out >= 0.0))     # ReLU output must be non-negative
    print("KERNEL_OK")
</pallas_src>

<mosaic_0001>
module attributes {stable_mosaic.version = 11 : i64} {
  func.func @kernel(%arg0: i32, %arg1: i32, %arg2: memref<800x256xbf16, #tpu.memory_space<vmem>>, %arg3: memref<256x32xbf16, #tpu.memory_space<vmem>>, %arg4: memref<800x32xbf16, #tpu.memory_space<vmem>>, %arg5: memref<1x2x32xf32, #tpu.memory_space<vmem>>) attributes {dimension_semantics = [#tpu.dimension_semantics<parallel>, #tpu.dimension_semantics<parallel>], iteration_bounds = array<i64: 1, 1>, scalar_prefetch = 0 : i64, scratch_operands = 0 : i64, tpu.core_type = #tpu.core_type<tc>, window_params = [{transform_indices = @transform_0, window_bounds = array<i64: 800, 256>}, {pipeline_mode = #tpu.pipeline_mode<synchronous>, transform_indices = @transform_1, window_bounds = array<i64: 256, 32>}, {transform_indices = @transform_2, window_bounds = array<i64: 800, 32>}, {transform_indices = @transform_3, window_bounds = array<i64: 1, 2, 32>}]} {
    %c0 = arith.constant 0 : index
    %c0_0 = arith.constant 0 : index
    %0 = vector.load %arg2[%c0, %c0_0] : memref<800x256xbf16, #tpu.memory_space<vmem>>, vector<800x256xbf16>
    %c0_1 = arith.constant 0 : index
    %c0_2 = arith.constant 0 : index
    %1 = vector.load %arg3[%c0_1, %c0_2] : memref<256x32xbf16, #tpu.memory_space<vmem>>, vector<256x32xbf16>
    %cst = arith.constant dense<0.000000e+00> : vector<800x32xf32>
    %2 = tpu.matmul %0, %1, %cst {dimension_numbers = #tpu.dot_dimension_numbers<[1], [0], [0], [1], [0, 0, 1, 1], [], []>} : vector<800x256xbf16>, vector<256x32xbf16>, vector<800x32xf32> -> vector<800x32xf32>
    %3 = arith.truncf %2 : vector<800x32xf32> to vector<800x32xbf16>
    %c0_3 = arith.constant 0 : index
    %c0_4 = arith.constant 0 : index
    %4 = vector.load %arg4[%c0_3, %c0_4] : memref<800x32xbf16, #tpu.memory_space<vmem>>, vector<800x32xbf16>
    tpu.vector_store %arg4[%c0_3, %c0_4], %3 {strides = array<i32>} : memref<800x32xbf16, #tpu.memory_space<vmem>>, vector<800x32xbf16>,
    %c800_i32 = arith.constant 800 : i32
    %5 = arith.muli %arg0, %c800_i32 : i32
    %c800_i32_5 = arith.constant 800 : i32
    %6 = arith.subi %c800_i32_5, %5 : i32
    %c800_i32_6 = arith.constant 800 : i32
    %7 = arith.minsi %c800_i32_6, %6 : i32
    %8 = arith.sitofp %7 : i32 to f32
    %cst_7 = arith.constant dense<0.000000e+00> : vector<32xf32>
    %9 = vector.multi_reduction <add>, %2, %cst_7 [0] : vector<800x32xf32> to vector<32xf32>
    %10 = vector.shape_cast %9 : vector<32xf32> to vector<1x32xf32>
    %11 = vector.broadcast %8 : f32 to vector<1x32xf32>
    %12 = arith.divf %10, %11 : vector<1x32xf32>
    %13 = vector.broadcast %12 : vector<1x32xf32> to vector<800x32xf32>
    %14 = arith.subf %2, %13 : vector<800x32xf32>
    %15 = arith.mulf %14, %14 : vector<800x32xf32>
    %cst_8 = arith.constant dense<0.000000e+00> : vector<32xf32>
    %16 = vector.multi_reduction <add>, %15, %cst_8 [0] : vector<800x32xf32> to vector<32xf32>
    %17 = vector.shape_cast %16 : vector<32xf32> to vector<1x32xf32>
    %cst_9 = arith.constant 8.000000e+02 : f32
    %18 = arith.subf %cst_9, %8 : f32
    %19 = arith.mulf %12, %12 : vector<1x32xf32>
    %20 = vector.broadcast %18 : f32 to vector<1x32xf32>
    %21 = arith.mulf %20, %19 : vector<1x32xf32>
    %22 = arith.subf %17, %21 : vector<1x32xf32>
    %23 = tpu.concatenate %10, %22 in 0 : vector<1x32xf32>, vector<1x32xf32> -> vector<2x32xf32>
    %24 = vector.shape_cast %23 : vector<2x32xf32> to vector<1x2x32xf32>
    %c0_10 = arith.constant 0 : index
    %c0_11 = arith.constant 0 : index
    %c0_12 = arith.constant 0 : index
    %25 = vector.load %arg5[%c0_10, %c0_11, %c0_12] : memref<1x2x32xf32, #tpu.memory_space<vmem>>, vector<1x2x32xf32>
    tpu.vector_store %arg5[%c0_10, %c0_11, %c0_12], %24 {strides = array<i32>} : memref<1x2x32xf32, #tpu.memory_space<vmem>>, vector<1x2x32xf32>,
    return
  }
  func.func @transform_0(%arg0: i32, %arg1: i32) -> (i32, i32) {
    %c0_i32 = arith.constant 0 : i32
    %c0_i32_0 = arith.constant 0 : i32
    return %arg0, %c0_i32 : i32, i32
  }
  func.func @transform_1(%arg0: i32, %arg1: i32) -> (i32, i32) {
    %c0_i32 = arith.constant 0 : i32
    %c0_i32_0 = arith.constant 0 : i32
    %c0_i32_1 = arith.constant 0 : i32
    return %c0_i32, %c0_i32_0 : i32, i32
  }
  func.func @transform_2(%arg0: i32, %arg1: i32) -> (i32, i32) {
    %c0_i32 = arith.constant 0 : i32
    return %arg0, %arg1 : i32, i32
  }
  func.func @transform_3(%arg0: i32, %arg1: i32) -> (i32, i32, i32) {
    %c0_i32 = arith.constant 0 : i32
    %c0_i32_0 = arith.constant 0 : i32
    return %arg0, %c0_i32, %arg1 : i32, i32, i32
  }
}

module attributes {stable_mosaic.version = 11 : i64} {
  func.func @kernel(%arg0: i32, %arg1: i32, %arg2: memref<176x512xbf16, #tpu.memory_space<vmem>>, %arg3: memref<512x64xbf16, #tpu.memory_space<vmem>>, %arg4: memref<176x64xbf16, #tpu.memory_space<vmem>>, %arg5: memref<1x2x64xf32, #tpu.memory_space<vmem>>) attributes {dimension_semantics = [#tpu.dimension_semantics<parallel>, #tpu.dimension_semantics<parallel>], iteration_bounds = array<i64: 1, 1>, scalar_prefetch = 0 : i64, scratch_operands = 0 : i64, tpu.core_type = #tpu.core_type<tc>, window_params = [{transform_indices = @transform_0, window_bounds = array<i64: 176, 512>}, {pipeline_mode = #tpu.pipeline_mode<synchronous>, transform_indices = @transform_1, window_bounds = array<i64: 512, 64>}, {transform_indices = @transform_2, window_bounds = array<i64: 176, 64>}, {transform_indices = @transform_3, window_bounds = array<i64: 1, 2, 64>}]} {
    %c0 = arith.constant 0 : index
    %c0_0 = arith.constant 0 : index
    %0 = vector.load %arg2[%c0, %c0_0] : memref<176x512xbf16, #tpu.memory_space<vmem>>, vector<176x512xbf16>
    %c0_1 = arith.constant 0 : index
    %c0_2 = arith.constant 0 : index
    %1 = vector.load %arg3[%c0_1, %c0_2] : memref<512x64xbf16, #tpu.memory_space<vmem>>, vector<512x64xbf16>
    %cst = arith.constant dense<0.000000e+00> : vector<176x64xf32>
    %2 = tpu.matmul %0, %1, %cst {dimension_numbers = #tpu.dot_dimension_numbers<[1], [0], [0], [1], [0, 0, 1, 1], [], []>} : vector<176x512xbf16>, vector<512x64xbf16>, vector<176x64xf32> -> vector<176x64xf32>
    %3 = arith.truncf %2 : vector<176x64xf32> to vector<176x64xbf16>
    %c0_3 = arith.constant 0 : index
    %c0_4 = arith.constant 0 : index
    %4 = vector.load %arg4[%c0_3, %c0_4] : memref<176x64xbf16, #tpu.memory_space<vmem>>, vector<176x64xbf16>
    tpu.vector_store %arg4[%c0_3, %c0_4], %3 {strides = array<i32>} : memref<176x64xbf16, #tpu.memory_space<vmem>>, vector<176x64xbf16>,
    %c176_i32 = arith.constant 176 : i32
    %5 = arith.muli %arg0, %c176_i32 : i32
    %c162_i32 = arith.constant 162 : i32
    %6 = arith.subi %c162_i32, %5 : i32
    %c176_i32_5 = arith.constant 176 : i32
    %7 = arith.minsi %c176_i32_5, %6 : i32
    %8 = arith.sitofp %7 : i32 to f32
    %cst_6 = arith.constant dense<0.000000e+00> : vector<64xf32>
    %9 = vector.multi_reduction <add>, %2, %cst_6 [0] : vector<176x64xf32> to vector<64xf32>
    %10 = vector.shape_cast %9 : vector<64xf32> to vector<1x64xf32>
    %11 = vector.broadcast %8 : f32 to vector<1x64xf32>
    %12 = arith.divf %10, %11 : vector<1x64xf32>
    %13 = vector.broadcast %12 : vector<1x64xf32> to vector<176x64xf32>
    %14 = arith.subf %2, %13 : vector<176x64xf32>
    %15 = arith.mulf %14, %14 : vector<176x64xf32>
    %cst_7 = arith.constant dense<0.000000e+00> : vector<64xf32>
    %16 = vector.multi_reduction <add>, %15, %cst_7 [0] : vector<176x64xf32> to vector<64xf32>
    %17 = vector.shape_cast %16 : vector<64xf32> to vector<1x64xf32>
    %cst_8 = arith.constant 1.760000e+02 : f32
    %18 = arith.subf %cst_8, %8 : f32
    %19 = arith.mulf %12, %12 : vector<1x64xf32>
    %20 = vector.broadcast %18 : f32 to vector<1x64xf32>
    %21 = arith.mulf %20, %19 : vector<1x64xf32>
    %22 = arith.subf %17, %21 : vector<1x64xf32>
    %23 = tpu.concatenate %10, %22 in 0 : vector<1x64xf32>, vector<1x64xf32> -> vector<2x64xf32>
    %24 = vector.shape_cast %23 : vector<2x64xf32> to vector<1x2x64xf32>
    %c0_9 = arith.constant 0 : index
    %c0_10 = arith.constant 0 : index
    %c0_11 = arith.constant 0 : index
    %25 = vector.load %arg5[%c0_9, %c0_10, %c0_11] : memref<1x2x64xf32, #tpu.memory_space<vmem>>, vector<1x2x64xf32>
    tpu.vector_store %arg5[%c0_9, %c0_10, %c0_11], %24 {strides = array<i32>} : memref<1x2x64xf32, #tpu.memory_space<vmem>>, vector<1x2x64xf32>,
    return
  }
  func.func @transform_0(%arg0: i32, %arg1: i32) -> (i32, i32) {
    %c0_i32 = arith.constant 0 : i32
    %c0_i32_0 = arith.constant 0 : i32
    return %arg0, %c0_i32 : i32, i32
  }
  func.func @transform_1(%arg0: i32, %arg1: i32) -> (i32, i32) {
    %c0_i32 = arith.constant 0 : i32
    %c0_i32_0 = arith.constant 0 : i32
    %c0_i32_1 = arith.constant 0 : i32
    return %c0_i32, %c0_i32_0 : i32, i32
  }
  func.func @transform_2(%arg0: i32, %arg1: i32) -> (i32, i32) {
    %c0_i32 = arith.constant 0 : i32
    return %arg0, %arg1 : i32, i32
  }
  func.func @transform_3(%arg0: i32, %arg1: i32) -> (i32, i32, i32) {
    %c0_i32 = arith.constant 0 : i32
    %c0_i32_0 = arith.constant 0 : i32
    return %arg0, %c0_i32, %arg1 : i32, i32, i32
  }
}

module attributes {stable_mosaic.version = 11 : i64} {
  func.func @kernel(%arg0: i32, %arg1: i32, %arg2: memref<112x640xbf16, #tpu.memory_space<vmem>>, %arg3: memref<640x64xbf16, #tpu.memory_space<vmem>>, %arg4: memref<112x64xbf16, #tpu.memory_space<vmem>>, %arg5: memref<1x2x64xf32, #tpu.memory_space<vmem>>) attributes {dimension_semantics = [#tpu.dimension_semantics<parallel>, #tpu.dimension_semantics<parallel>], iteration_bounds = array<i64: 1, 1>, scalar_prefetch = 0 : i64, scratch_operands = 0 : i64, tpu.core_type = #tpu.core_type<tc>, window_params = [{transform_indices = @transform_0, window_bounds = array<i64: 112, 640>}, {pipeline_mode = #tpu.pipeline_mode<synchronous>, transform_indices = @transform_1, window_bounds = array<i64: 640, 64>}, {transform_indices = @transform_2, window_bounds = array<i64: 112, 64>}, {transform_indices = @transform_3, window_bounds = array<i64: 1, 2, 64>}]} {
    %c0 = arith.constant 0 : index
    %c0_0 = arith.constant 0 : index
    %0 = vector.load %arg2[%c0, %c0_0] : memref<112x640xbf16, #tpu.memory_space<vmem>>, vector<112x640xbf16>
    %c0_1 = arith.constant 0 : index
    %c0_2 = arith.constant 0 : index
    %1 = vector.load %arg3[%c0_1, %c0_2] : memref<640x64xbf16, #tpu.memory_space<vmem>>, vector<640x64xbf16>
    %cst = arith.constant dense<0.000000e+00> : vector<112x64xf32>
    %2 = tpu.matmul %0, %1, %cst {dimension_numbers = #tpu.dot_dimension_numbers<[1], [0], [0], [1], [0, 0, 1, 1], [], []>} : vector<112x640xbf16>, vector<640x64xbf16>, vector<112x64xf32> -> vector<112x64xf32>
    %3 = arith.truncf %2 : vector<112x64xf32> to vector<112x64xbf16>
    %c0_3 = arith.constant 0 : index
    %c0_4 = arith.constant 0 : index
    %4 = vector.load %arg4[%c0_3, %c0_4] : memref<112x64xbf16, #tpu.memory_space<vmem>>, vector<112x64xbf16>
    tpu.vector_store %arg4[%c0_3, %c0_4], %3 {strides = array<i32>} : memref<112x64xbf16, #tpu.memory_space<vmem>>, vector<112x64xbf16>,
    %c112_i32 = arith.constant 112 : i32
    %5 = arith.muli %arg0, %c112_i32 : i32
    %c98_i32 = arith.constant 98 : i32
    %6 = arith.subi %c98_i32, %5 : i32
    %c112_i32_5 = arith.constant 112 : i32
    %7 = arith.minsi %c112_i32_5, %6 : i32
    %8 = arith.sitofp %7 : i32 to f32
    %cst_6 = arith.constant dense<0.000000e+00> : vector<64xf32>
    %9 = vector.multi_reduction <add>, %2, %cst_6 [0] : vector<112x64xf32> to vector<64xf32>
    %10 = vector.shape_cast %9 : vector<64xf32> to vector<1x64xf32>
    %11 = vector.broadcast %8 : f32 to vector<1x64xf32>
    %12 = arith.divf %10, %11 : vector<1x64xf32>
    %13 = vector.broadcast %12 : vector<1x64xf32> to vector<112x64xf32>
    %14 = arith.subf %2, %13 : vector<112x64xf32>
    %15 = arith.mulf %14, %14 : vector<112x64xf32>
    %cst_7 = arith.constant dense<0.000000e+00> : vector<64xf32>
    %16 = vector.multi_reduction <add>, %15, %cst_7 [0] : vector<112x64xf32> to vector<64xf32>
    %17 = vector.shape_cast %16 : vector<64xf32> to vector<1x64xf32>
    %cst_8 = arith.constant 1.120000e+02 : f32
    %18 = arith.subf %cst_8, %8 : f32
    %19 = arith.mulf %12, %12 : vector<1x64xf32>
    %20 = vector.broadcast %18 : f32 to vector<1x64xf32>
    %21 = arith.mulf %20, %19 : vector<1x64xf32>
    %22 = arith.subf %17, %21 : vector<1x64xf32>
    %23 = tpu.concatenate %10, %22 in 0 : vector<1x64xf32>, vector<1x64xf32> -> vector<2x64xf32>
    %24 = vector.shape_cast %23 : vector<2x64xf32> to vector<1x2x64xf32>
    %c0_9 = arith.constant 0 : index
    %c0_10 = arith.constant 0 : index
    %c0_11 = arith.constant 0 : index
    %25 = vector.load %arg5[%c0_9, %c0_10, %c0_11] : memref<1x2x64xf32, #tpu.memory_space<vmem>>, vector<1x2x64xf32>
    tpu.vector_store %arg5[%c0_9, %c0_10, %c0_11], %24 {strides = array<i32>} : memref<1x2x64xf32, #tpu.memory_space<vmem>>, vector<1x2x64xf32>,
    return
  }
  func.func @transform_0(%arg0: i32, %arg1: i32) -> (i32, i32) {
    %c0_i32 = arith.constant 0 : i32
    %c0_i32_0 = arith.constant 0 : i32
    return %arg0, %c0_i32 : i32, i32
  }
  func.func @transform_1(%arg0: i32, %arg1: i32) -> (i32, i32) {
    %c0_i32 = arith.constant 0 : i32
    %c0_i32_0 = arith.constant 0 : i32
    %c0_i32_1 = arith.constant 0 : i32
    return %c0_i32, %c0_i32_0 : i32, i32
  }
  func.func @transform_2(%arg0: i32, %arg1: i32) -> (i32, i32) {
    %c0_i32 = arith.constant 0 : i32
    return %arg0, %arg1 : i32, i32
  }
  func.func @transform_3(%arg0: i32, %arg1: i32) -> (i32, i32, i32) {
    %c0_i32 = arith.constant 0 : i32
    %c0_i32_0 = arith.constant 0 : i32
    return %arg0, %c0_i32, %arg1 : i32, i32, i32
  }
}

module attributes {stable_mosaic.version = 11 : i64} {
  func.func @kernel(%arg0: i32, %arg1: i32, %arg2: memref<16x3200xbf16, #tpu.memory_space<vmem>>, %arg3: memref<3200x32xbf16, #tpu.memory_space<vmem>>, %arg4: memref<16x32xf32, #tpu.memory_space<vmem>>, %arg5: memref<1x2x32xf32, #tpu.memory_space<vmem>>) attributes {dimension_semantics = [#tpu.dimension_semantics<parallel>, #tpu.dimension_semantics<parallel>], iteration_bounds = array<i64: 1, 1>, scalar_prefetch = 0 : i64, scratch_operands = 0 : i64, tpu.core_type = #tpu.core_type<tc>, window_params = [{transform_indices = @transform_0, window_bounds = array<i64: 16, 3200>}, {pipeline_mode = #tpu.pipeline_mode<synchronous>, transform_indices = @transform_1, window_bounds = array<i64: 3200, 32>}, {transform_indices = @transform_2, window_bounds = array<i64: 16, 32>}, {transform_indices = @transform_3, window_bounds = array<i64: 1, 2, 32>}]} {
    %c0 = arith.constant 0 : index
    %c0_0 = arith.constant 0 : index
    %0 = vector.load %arg2[%c0, %c0_0] : memref<16x3200xbf16, #tpu.memory_space<vmem>>, vector<16x3200xbf16>
    %c0_1 = arith.constant 0 : index
    %c0_2 = arith.constant 0 : index
    %1 = vector.load %arg3[%c0_1, %c0_2] : memref<3200x32xbf16, #tpu.memory_space<vmem>>, vector<3200x32xbf16>
    %cst = arith.constant dense<0.000000e+00> : vector<16x32xf32>
    %2 = tpu.matmul %0, %1, %cst {dimension_numbers = #tpu.dot_dimension_numbers<[1], [0], [0], [1], [0, 0, 1, 1], [], []>} : vector<16x3200xbf16>, vector<3200x32xbf16>, vector<16x32xf32> -> vector<16x32xf32>
    %c0_3 = arith.constant 0 : index
    %c0_4 = arith.constant 0 : index
    %3 = vector.load %arg4[%c0_3, %c0_4] : memref<16x32xf32, #tpu.memory_space<vmem>>, vector<16x32xf32>
    tpu.vector_store %arg4[%c0_3, %c0_4], %2 {strides = array<i32>} : memref<16x32xf32, #tpu.memory_space<vmem>>, vector<16x32xf32>,
    %c16_i32 = arith.constant 16 : i32
    %4 = arith.muli %arg0, %c16_i32 : i32
    %c2_i32 = arith.constant 2 : i32
    %5 = arith.subi %c2_i32, %4 : i32
    %c16_i32_5 = arith.constant 16 : i32
    %6 = arith.minsi %c16_i32_5, %5 : i32
    %7 = arith.sitofp %6 : i32 to f32
    %cst_6 = arith.constant dense<0.000000e+00> : vector<32xf32>
    %8 = vector.multi_reduction <add>, %2, %cst_6 [0] : vector<16x32xf32> to vector<32xf32>
    %9 = vector.shape_cast %8 : vector<32xf32> to vector<1x32xf32>
    %10 = vector.broadcast %7 : f32 to vector<1x32xf32>
    %11 = arith.divf %9, %10 : vector<1x32xf32>
    %12 = vector.broadcast %11 : vector<1x32xf32> to vector<16x32xf32>
    %13 = arith.subf %2, %12 : vector<16x32xf32>
    %14 = arith.mulf %13, %13 : vector<16x32xf32>
    %cst_7 = arith.constant dense<0.000000e+00> : vector<32xf32>
    %15 = vector.multi_reduction <add>, %14, %cst_7 [0] : vector<16x32xf32> to vector<32xf32>
    %16 = vector.shape_cast %15 : vector<32xf32> to vector<1x32xf32>
    %cst_8 = arith.constant 1.600000e+01 : f32
    %17 = arith.subf %cst_8, %7 : f32
    %18 = arith.mulf %11, %11 : vector<1x32xf32>
    %19 = vector.broadcast %17 : f32 to vector<1x32xf32>
    %20 = arith.mulf %19, %18 : vector<1x32xf32>
    %21 = arith.subf %16, %20 : vector<1x32xf32>
    %22 = tpu.concatenate %9, %21 in 0 : vector<1x32xf32>, vector<1x32xf32> -> vector<2x32xf32>
    %23 = vector.shape_cast %22 : vector<2x32xf32> to vector<1x2x32xf32>
    %c0_9 = arith.constant 0 : index
    %c0_10 = arith.constant 0 : index
    %c0_11 = arith.constant 0 : index
    %24 = vector.load %arg5[%c0_9, %c0_10, %c0_11] : memref<1x2x32xf32, #tpu.memory_space<vmem>>, vector<1x2x32xf32>
    tpu.vector_store %arg5[%c0_9, %c0_10, %c0_11], %23 {strides = array<i32>} : memref<1x2x32xf32, #tpu.memory_space<vmem>>, vector<1x2x32xf32>,
    return
  }
  func.func @transform_0(%arg0: i32, %arg1: i32) -> (i32, i32) {
    %c0_i32 = arith.constant 0 : i32
    %c0_i32_0 = arith.constant 0 : i32
    return %arg0, %c0_i32 : i32, i32
  }
  func.func @transform_1(%arg0: i32, %arg1: i32) -> (i32, i32) {
    %c0_i32 = arith.constant 0 : i32
    %c0_i32_0 = arith.constant 0 : i32
    %c0_i32_1 = arith.constant 0 : i32
    return %c0_i32, %c0_i32_0 : i32, i32
  }
  func.func @transform_2(%arg0: i32, %arg1: i32) -> (i32, i32) {
    %c0_i32 = arith.constant 0 : i32
    return %arg0, %arg1 : i32, i32
  }
  func.func @transform_3(%arg0: i32, %arg1: i32) -> (i32, i32, i32) {
    %c0_i32 = arith.constant 0 : i32
    %c0_i32_0 = arith.constant 0 : i32
    return %arg0, %c0_i32, %arg1 : i32, i32, i32
  }
}

</mosaic_0001>

<bundles_post_ra>
// kernel: atari_features_forward.4
= control target key start
LH: loop header
LB: loop body
LE: loop exit
PB: predicated region body
PF: predicated region fallthrough
CT: control target
= control target key end

     0   :  { %vm1359_vm0 = vcmask 257024   ;;  %vm1465_vm1 = vcmask 261120   ;;  %vm2097_vm3 = vcmask 1040384   ;;  %vm2099_vm4 = vcmask 254976   ;;  %s4688_s1 = inlined_call_operand.vmem [shape: bf16[256,32], index: 1, kind: input, shape index: {}]   ;;  %s4689_s0 = inlined_call_operand.vmem [shape: bf16[800,256], index: 0, kind: input, shape index: {}]   ;;  %s4690_s2 = inlined_call_operand.vmem [shape: bf16[800,32], index: 2, kind: output, shape index: {0}]   ;;  %s4691_s3 = inlined_call_operand.vmem [shape: f32[1,2,32], index: 3, kind: output, shape index: {1}]  }
   0x1   :  { %v2680_v0 = vld [vmem:[%s4688_s1 + $0x38] sm:$0xff]  ;;  %v2679_v2 = vld [vmem:[%s4688_s1 + $0x30] sm:$0xff]  ;;  %v2678_v4 = vld [vmem:[%s4688_s1 + $0x28] sm:$0xff] }
   0x2   :  { %v2688_v1 = vld [vmem:[%s4688_s1 + $0x78] sm:$0xff]  ;;  %741 = vmatpush.bf16.msra.mxu0 %v2680_v0  ;;  %v2687_v3 = vld [vmem:[%s4688_s1 + $0x70] sm:$0xff]  ;;  %2689 = vmatpush.bf16.msra.mxu2 %v2680_v0  ;;  %v2686_v5 = vld [vmem:[%s4688_s1 + $0x68] sm:$0xff] }
   0x3   :  { %1000 = vmatpush.bf16.msra.mxu1 %v2688_v1  ;;  %2697 = vmatpush.bf16.msra.mxu3 %v2688_v1  ;;  %v2677_v6 = vld [vmem:[%s4688_s1 + $0x20] sm:$0xff]  ;;  %v2676_v8 = vld [vmem:[%s4688_s1 + $0x18] sm:$0xff]  ;;  %v2675_v10 = vld [vmem:[%s4688_s1 + $0x10] sm:$0xff] }
   0x4   :  { %v2685_v7 = vld [vmem:[%s4688_s1 + $0x60] sm:$0xff]  ;;  %v2684_v9 = vld [vmem:[%s4688_s1 + $0x58] sm:$0xff]  ;;  %v2683_v11 = vld [vmem:[%s4688_s1 + $0x50] sm:$0xff] }
   0x5   :  { %v2674_v12 = vld [vmem:[%s4688_s1 + $0x8] sm:$0xff]  ;;  %v2673_v14 = vld [vmem:[%s4688_s1] sm:$0xff]  ;;  %v2119_v22 = vld [vmem:[%s4689_s0 + $0x10] sm:$0xf] }
   0x6   :  { %742 = vmatpush.bf16.msra.mxu0 %v2679_v2  ;;  %2690 = vmatpush.bf16.msra.mxu2 %v2679_v2  ;;  %v2682_v13 = vld [vmem:[%s4688_s1 + $0x48] sm:$0xff]  ;;  %v2681_v15 = vld [vmem:[%s4688_s1 + $0x40] sm:$0xff]  ;;  %v2576_v23 = vld [vmem:[%s4689_s0 + $0x14] sm:$0xf0] }
   0x7   :  { %1001 = vmatpush.bf16.msra.mxu1 %v2687_v3  ;;  %2698 = vmatpush.bf16.msra.mxu3 %v2687_v3  ;;  %v2111_v16 = vld [vmem:[%s4689_s0] sm:$0xf]  ;;  %v2574_v17 = vld [vmem:[%s4689_s0 + $0x4] sm:$0xf0]  ;;  %v2573_v18 = vld [vmem:[%s4689_s0 + $0x4] sm:$0xf]  ;;  %v2120_v26 = vor.u32 %v2576_v23, %v2119_v22 }
   0x8   :  { %v2113_v19 = vld [vmem:[%s4689_s0 + $0x8] sm:$0xf0]  ;;  %v2112_v20 = vor.u32 %v2574_v17, %v2111_v16  ;;  %v2575_v24 = vld [vmem:[%s4689_s0 + $0x14] sm:$0xf]  ;;  %v2121_v25 = vld [vmem:[%s4689_s0 + $0x18] sm:$0xf0] }
   0x9   :  { %v2116_v21 = vor.u32 %v2573_v18, %v2113_v19  ;;  %v2124_v27 = vor.u32 %v2575_v24, %v2121_v25  ;;  %v2127_v28 = vld [vmem:[%s4689_s0 + $0x20] sm:$0xf]  ;;  %v2578_v29 = vld [vmem:[%s4689_s0 + $0x24] sm:$0xf0]  ;;  %v2577_v30 = vld [vmem:[%s4689_s0 + $0x24] sm:$0xf] }
   0xa   :  { %743 = vmatpush.bf16.msra.mxu0 %v2678_v4  ;;  %2691 = vmatpush.bf16.msra.mxu2 %v2678_v4  ;;  %v2129_v31 = vld [vmem:[%s4689_s0 + $0x28] sm:$0xf0]  ;;  %v2128_v32 = vor.u32 %v2578_v29, %v2127_v28  ;;  %v2135_v34 = vld [vmem:[%s4689_s0 + $0x30] sm:$0xf]  ;;  %v2580_v35 = vld [vmem:[%s4689_s0 + $0x34] sm:$0xf0] }
   0xb   :  { %1002 = vmatpush.bf16.msra.mxu1 %v2686_v5  ;;  %2699 = vmatpush.bf16.msra.mxu3 %v2686_v5  ;;  %v2132_v33 = vor.u32 %v2577_v30, %v2129_v31  ;;  %v2579_v36 = vld [vmem:[%s4689_s0 + $0x34] sm:$0xf]  ;;  %v2137_v37 = vld [vmem:[%s4689_s0 + $0x38] sm:$0xf0]  ;;  %v2136_v38 = vor.u32 %v2580_v35, %v2135_v34  ;;  %v2311_v40 = vld [vmem:[%s4689_s0 + $0x190] sm:$0xf] }
   0xc   :  { %v2140_v39 = vor.u32 %v2579_v36, %v2137_v37  ;;  %v2624_v41 = vld [vmem:[%s4689_s0 + $0x194] sm:$0xf0]  ;;  %v2623_v42 = vld [vmem:[%s4689_s0 + $0x194] sm:$0xf]  ;;  %v2313_v44 = vld [vmem:[%s4689_s0 + $0x198] sm:$0xf0] }
   0xd   :  { %v2312_v43 = vor.u32 %v2624_v41, %v2311_v40  ;;  %v2316_v45 = vor.u32 %v2623_v42, %v2313_v44  ;;  %v2143_v46 = vld [vmem:[%s4689_s0 + $0x40] sm:$0xf]  ;;  %v2582_v47 = vld [vmem:[%s4689_s0 + $0x44] sm:$0xf0]  ;;  %v2581_v48 = vld [vmem:[%s4689_s0 + $0x44] sm:$0xf] }
   0xe   :  { %744 = vmatpush.bf16.msra.mxu0 %v2677_v6  ;;  %2692 = vmatpush.bf16.msra.mxu2 %v2677_v6  ;;  %v2145_v49 = vld [vmem:[%s4689_s0 + $0x48] sm:$0xf0]  ;;  %v2144_v50 = vor.u32 %v2582_v47, %v2143_v46  ;;  %v2319_v52 = vld [vmem:[%s4689_s0 + $0x1a0] sm:$0xf]  ;;  %v2626_v53 = vld [vmem:[%s4689_s0 + $0x1a4] sm:$0xf0] }
   0xf   :  { %1003 = vmatpush.bf16.msra.mxu1 %v2685_v7  ;;  %2700 = vmatpush.bf16.msra.mxu3 %v2685_v7  ;;  %v2148_v51 = vor.u32 %v2581_v48, %v2145_v49  ;;  %v2625_v54 = vld [vmem:[%s4689_s0 + $0x1a4] sm:$0xf]  ;;  %v2320_v55 = vor.u32 %v2626_v53, %v2319_v52  ;;  %v2321_v56 = vld [vmem:[%s4689_s0 + $0x1a8] sm:$0xf0]  ;;  %v2151_v58 = vld [vmem:[%s4689_s0 + $0x50] sm:$0xf] }
  0x10   :  { %v2324_v57 = vor.u32 %v2625_v54, %v2321_v56  ;;  %v2584_v59 = vld [vmem:[%s4689_s0 + $0x54] sm:$0xf0]  ;;  %v2583_v60 = vld [vmem:[%s4689_s0 + $0x54] sm:$0xf]  ;;  %v2153_v61 = vld [vmem:[%s4689_s0 + $0x58] sm:$0xf0] }
  0x11   :  { %v2152_v62 = vor.u32 %v2584_v59, %v2151_v58  ;;  %v2156_v63 = vor.u32 %v2583_v60, %v2153_v61  ;;  %v2327_v0 = vld [vmem:[%s4689_s0 + $0x1b0] sm:$0xf]  ;;  %v2628_v1 = vld [vmem:[%s4689_s0 + $0x1b4] sm:$0xf0]  ;;  %v2627_v2 = vld [vmem:[%s4689_s0 + $0x1b4] sm:$0xf] }
  0x12   :  { %745 = vmatpush.bf16.msra.mxu0 %v2676_v8  ;;  %2693 = vmatpush.bf16.msra.mxu2 %v2676_v8  ;;  %v2328_v3 = vor.u32 %v2628_v1, %v2327_v0  ;;  %v2329_v4 = vld [vmem:[%s4689_s0 + $0x1b8] sm:$0xf0]  ;;  %v2159_v6 = vld [vmem:[%s4689_s0 + $0x60] sm:$0xf]  ;;  %v2586_v7 = vld [vmem:[%s4689_s0 + $0x64] sm:$0xf0] }
  0x13   :  { %1004 = vmatpush.bf16.msra.mxu1 %v2684_v9  ;;  %2701 = vmatpush.bf16.msra.mxu3 %v2684_v9  ;;  %v2332_v5 = vor.u32 %v2627_v2, %v2329_v4  ;;  %v2585_v8 = vld [vmem:[%s4689_s0 + $0x64] sm:$0xf]  ;;  %v2161_v9 = vld [vmem:[%s4689_s0 + $0x68] sm:$0xf0]  ;;  %v2167_v18 = vld [vmem:[%s4689_s0 + $0x70] sm:$0xf] }
  0x14   :  { %v2337_v16 = vld [vmem:[%s4689_s0 + $0x1c8] sm:$0xf0]  ;;  %v2588_v19 = vld [vmem:[%s4689_s0 + $0x74] sm:$0xf0]  ;;  %v2343_v24 = vld [vmem:[%s4689_s0 + $0x1d0] sm:$0xf] }
  0x15   :  { %v2168_v22 = vor.u32 %v2588_v19, %v2167_v18  ;;  %v2632_v25 = vld [vmem:[%s4689_s0 + $0x1d4] sm:$0xf0]  ;;  %v2345_v28 = vld [vmem:[%s4689_s0 + $0x1d8] sm:$0xf0]  ;;  %v2175_v30 = vld [vmem:[%s4689_s0 + $0x80] sm:$0xf] }
  0x16   :  { %746 = vmatpush.bf16.msra.mxu0 %v2675_v10  ;;  %2694 = vmatpush.bf16.msra.mxu2 %v2675_v10  ;;  %v2160_v10 = vor.u32 %v2586_v7, %v2159_v6  ;;  %v2590_v31 = vld [vmem:[%s4689_s0 + $0x84] sm:$0xf0]  ;;  %v2351_v40 = vld [vmem:[%s4689_s0 + $0x1e0] sm:$0xf]  ;;  %v2633_v42 = vld [vmem:[%s4689_s0 + $0x1e4] sm:$0xf] }
  0x17   :  { %1005 = vmatpush.bf16.msra.mxu1 %v2683_v11  ;;  %2702 = vmatpush.bf16.msra.mxu3 %v2683_v11  ;;  %v2164_v11 = vor.u32 %v2585_v8, %v2161_v9  ;;  %v2176_v34 = vor.u32 %v2590_v31, %v2175_v30  ;;  %v2634_v41 = vld [vmem:[%s4689_s0 + $0x1e4] sm:$0xf0]  ;;  %v2353_v44 = vld [vmem:[%s4689_s0 + $0x1e8] sm:$0xf0]  ;;  %v2591_v52 = vld [vmem:[%s4689_s0 + $0x94] sm:$0xf] }
  0x18   :  { %v2356_v47 = vor.u32 %v2633_v42, %v2353_v44  ;;  %v2185_v53 = vld [vmem:[%s4689_s0 + $0x98] sm:$0xf0]  ;;  %v2359_v60 = vld [vmem:[%s4689_s0 + $0x1f0] sm:$0xf]  ;;  %v2636_v61 = vld [vmem:[%s4689_s0 + $0x1f4] sm:$0xf0] }
  0x19   :  { %v2361_v0 = vld [vmem:[%s4689_s0 + $0x1f8] sm:$0xf0]  ;;  %v2191_v6 = vld [vmem:[%s4689_s0 + $0xa0] sm:$0xf]  ;;  %v2594_v7 = vld [vmem:[%s4689_s0 + $0xa4] sm:$0xf0] }
  0x1a   :  { %747 = vmatpush.bf16.msra.mxu0 %v2674_v12  ;;  %2695 = vmatpush.bf16.msra.mxu2 %v2674_v12  ;;  %v2335_v12 = vld [vmem:[%s4689_s0 + $0x1c0] sm:$0xf]  ;;  %v2593_v8 = vld [vmem:[%s4689_s0 + $0xa4] sm:$0xf]  ;;  %v2193_v9 = vld [vmem:[%s4689_s0 + $0xa8] sm:$0xf0] }
  0x1b   :  { %1006 = vmatpush.bf16.msra.mxu1 %v2682_v13  ;;  %2703 = vmatpush.bf16.msra.mxu3 %v2682_v13  ;;  %v2630_v13 = vld [vmem:[%s4689_s0 + $0x1c4] sm:$0xf0]  ;;  %v2637_v18 = vld [vmem:[%s4689_s0 + $0x204] sm:$0xf] }
  0x1e   :  { %748 = vmatpush.bf16.msra.mxu0 %v2673_v14  ;;  %2696 = vmatpush.bf16.msra.mxu2 %v2673_v14  ;;  %v2629_v14 = vld [vmem:[%s4689_s0 + $0x1c4] sm:$0xf] }
  0x1f   :  { %1007 = vmatpush.bf16.msra.mxu1 %v2681_v15  ;;  %2704 = vmatpush.bf16.msra.mxu3 %v2681_v15  ;;  %v2336_v15 = vor.u32 %v2630_v13, %v2335_v12  ;;  %v2340_v17 = vor.u32 %v2629_v14, %v2337_v16  ;;  %v2367_v16 = vld [vmem:[%s4689_s0 + $0x200] sm:$0xf] }
  0x21   :  { %749 = vmatmul.bf16.vlgmr.msra.gmra.mxu0 %v2112_v20  ;;  %874 = vmatmul.bf16.vlgmr.msra.gmra.mxu2 %v2312_v43  ;;  %v2587_v20 = vld [vmem:[%s4689_s0 + $0x74] sm:$0xf]  ;;  %v2352_v43 = vor.u32 %v2634_v41, %v2351_v40  ;;  %v2377_v41 = vld [vmem:[%s4689_s0 + $0x218] sm:$0xf0] }
  0x22   :  { %1008 = vmatmul.bf16.vlgmr.msra.gmra.mxu1 %v2116_v21  ;;  %1133 = vmatmul.bf16.vlgmr.msra.gmra.mxu3 %v2316_v45  ;;  %v2169_v21 = vld [vmem:[%s4689_s0 + $0x78] sm:$0xf0] }
  0x23   :  { %v2172_v23 = vor.u32 %v2587_v20, %v2169_v21  ;;  %v2369_v20 = vld [vmem:[%s4689_s0 + $0x208] sm:$0xf0] }
  0x31   :  { %754 = vmatmul.bf16.gmra.mxu0 %v2120_v26  ;;  %879 = vmatmul.bf16.gmra.mxu2 %v2320_v55  ;;  %v2631_v26 = vld [vmem:[%s4689_s0 + $0x1d4] sm:$0xf]  ;;  %v2188_v55 = vor.u32 %v2591_v52, %v2185_v53 }
  0x32   :  { %1013 = vmatmul.bf16.gmra.mxu1 %v2124_v27  ;;  %1138 = vmatmul.bf16.gmra.mxu3 %v2324_v57  ;;  %v2344_v27 = vor.u32 %v2632_v25, %v2343_v24  ;;  %v2348_v29 = vor.u32 %v2631_v26, %v2345_v28  ;;  %v2199_v26 = vld [vmem:[%s4689_s0 + $0xb0] sm:$0xf]  ;;  %v2595_v28 = vld [vmem:[%s4689_s0 + $0xb4] sm:$0xf] }
  0x41   :  { %759 = vmatmul.bf16.gmra.mxu0 %v2128_v32  ;;  %884 = vmatmul.bf16.gmra.mxu2 %v2328_v3  ;;  %v2589_v32 = vld [vmem:[%s4689_s0 + $0x84] sm:$0xf] }
  0x42   :  { %1018 = vmatmul.bf16.gmra.mxu1 %v2132_v33  ;;  %1143 = vmatmul.bf16.gmra.mxu3 %v2332_v5  ;;  %v2177_v33 = vld [vmem:[%s4689_s0 + $0x88] sm:$0xf0] }
  0x43   :  { %v2180_v35 = vor.u32 %v2589_v32, %v2177_v33 }
  0x51   :  { %764 = vmatmul.bf16.gmra.mxu0 %v2136_v38  ;;  %889 = vmatmul.bf16.gmra.mxu2 %v2336_v15 }
  0x52   :  { %1023 = vmatmul.bf16.gmra.mxu1 %v2140_v39  ;;  %1148 = vmatmul.bf16.gmra.mxu3 %v2340_v17  ;;  %v2638_v17 = vld [vmem:[%s4689_s0 + $0x204] sm:$0xf0] }
  0x53   :  { %v2368_v19 = vor.u32 %v2638_v17, %v2367_v16  ;;  %v2600_v16 = vld [vmem:[%s4689_s0 + $0xd4] sm:$0xf0]  ;;  %v2599_v17 = vld [vmem:[%s4689_s0 + $0xd4] sm:$0xf] }
  0x61   :  { %769 = vmatmul.bf16.gmra.mxu0 %v2144_v50  ;;  %894 = vmatmul.bf16.gmra.mxu2 %v2344_v27  ;;  %v2183_v50 = vld [vmem:[%s4689_s0 + $0x90] sm:$0xf]  ;;  %v2596_v27 = vld [vmem:[%s4689_s0 + $0xb4] sm:$0xf0] }
  0x62   :  { %1028 = vmatmul.bf16.gmra.mxu1 %v2148_v51  ;;  %1153 = vmatmul.bf16.gmra.mxu3 %v2348_v29  ;;  %v2592_v51 = vld [vmem:[%s4689_s0 + $0x94] sm:$0xf0]  ;;  %v2201_v29 = vld [vmem:[%s4689_s0 + $0xb8] sm:$0xf0]  ;;  %v2200_v30 = vor.u32 %v2596_v27, %v2199_v26 }
  0x63   :  { %v2184_v54 = vor.u32 %v2592_v51, %v2183_v50  ;;  %v2204_v31 = vor.u32 %v2595_v28, %v2201_v29  ;;  %v2597_v50 = vld [vmem:[%s4689_s0 + $0xc4] sm:$0xf]  ;;  %v2209_v51 = vld [vmem:[%s4689_s0 + $0xc8] sm:$0xf0] }
  0x71   :  { %774 = vmatmul.bf16.gmra.mxu0 %v2152_v62  ;;  %899 = vmatmul.bf16.gmra.mxu2 %v2352_v43  ;;  %v2635_v62 = vld [vmem:[%s4689_s0 + $0x1f4] sm:$0xf] }
  0x72   :  { %1033 = vmatmul.bf16.gmra.mxu1 %v2156_v63  ;;  %1158 = vmatmul.bf16.gmra.mxu3 %v2356_v47  ;;  %v2360_v63 = vor.u32 %v2636_v61, %v2359_v60  ;;  %v2364_v3 = vor.u32 %v2635_v62, %v2361_v0  ;;  %v2207_v47 = vld [vmem:[%s4689_s0 + $0xc0] sm:$0xf] }
  0x81   :  { %779 = vmatmul.bf16.gmra.mxu0 %v2160_v10  ;;  %904 = vmatmul.bf16.gmra.mxu2 %v2360_v63  ;;  %v2192_v10 = vor.u32 %v2594_v7, %v2191_v6 }
  0x82   :  { %1038 = vmatmul.bf16.gmra.mxu1 %v2164_v11  ;;  %1163 = vmatmul.bf16.gmra.mxu3 %v2364_v3  ;;  %v2196_v11 = vor.u32 %v2593_v8, %v2193_v9  ;;  %v2642_v3 = vld [vmem:[%s4689_s0 + $0x224] sm:$0xf0]  ;;  %v2385_v8 = vld [vmem:[%s4689_s0 + $0x228] sm:$0xf0] }
  0x91   :  { %784 = vmatmul.bf16.gmra.mxu0 %v2168_v22  ;;  %909 = vmatmul.bf16.gmra.mxu2 %v2368_v19 }
  0x92   :  { %1043 = vmatmul.bf16.gmra.mxu1 %v2172_v23  ;;  %v2372_v23 = vor.u32 %v2637_v18, %v2369_v20  ;;  %v2217_v18 = vld [vmem:[%s4689_s0 + $0xd8] sm:$0xf0] }
  0x94   :  { %1168 = vmatmul.bf16.gmra.mxu3 %v2372_v23  ;;  %v2220_v23 = vor.u32 %v2599_v17, %v2217_v18 }
  0x9e   :  { %v750_v36 = vpop.f32.mrf.mxu0 }
  0x9f   :  { %v1009_v37 = vpop.f32.mrf.mxu1 }
  0xa0   :  { %v2945_v38 = vadd.f32 %v1009_v37, %v750_v36  ;;  %v2375_v36 = vld [vmem:[%s4689_s0 + $0x210] sm:$0xf]  ;;  %v2640_v37 = vld [vmem:[%s4689_s0 + $0x214] sm:$0xf0] }
  0xa1   :  { %789 = vmatmul.bf16.gmra.mxu0 %v2176_v34  ;;  %v2376_v40 = vor.u32 %v2640_v37, %v2375_v36  ;;  %v2643_v36 = vld [vmem:[%s4689_s0 + $0x234] sm:$0xf] }
  0xa2   :  { %4769 = vst [vmem:[#allocation2_spill] sm:$0xff] %v2945_v38  ;;  %v1259_v39 = vpack.c.bf16 %v2945_v38, %v2945_v38  ;;  %1048 = vmatmul.bf16.gmra.mxu1 %v2180_v35 }
  0xa3   :  { %914 = vmatmul.bf16.gmra.mxu2 %v2376_v40  ;;  %v2393_v40 = vld [vmem:[%s4689_s0 + $0x238] sm:$0xf0] }
  0xa4   :  { %1360 = vst.msk [vmem:[%s4690_s2] sm:$0xf] %vm1359_vm0, %v1259_v39  ;;  %v2639_v39 = vld [vmem:[%s4689_s0 + $0x214] sm:$0xf]  ;;  %v875_v52 = vpop.f32.mrf.mxu2 }
  0xa5   :  { %v2380_v44 = vor.u32 %v2639_v39, %v2377_v41  ;;  %v1134_v53 = vpop.f32.mrf.mxu3 }
  0xa6   :  { %v752_v45 = vpop.f32.mrf.mxu0 }
  0xa7   :  { %v1011_v46 = vpop.f32.mrf.mxu1  ;;  %1173 = vmatmul.bf16.gmra.mxu3 %v2380_v44 }
  0xa8   :  { %v2965_v48 = vadd.f32 %v1011_v46, %v752_v45 }
  0xaa   :  { %4770 = vst [vmem:[#allocation3_spill] sm:$0xff] %v2965_v48  ;;  %v1260_v49 = vpack.c.bf16 %v2965_v48, %v2965_v48 }
  0xac   :  { %1361 = vst.msk [vmem:[%s4690_s2 + $0x4] sm:$0xf] %vm1359_vm0, %v1260_v49  ;;  %v2598_v49 = vld [vmem:[%s4689_s0 + $0xc4] sm:$0xf0]  ;;  %v877_v63 = vpop.f32.mrf.mxu2 }
  0xad   :  { %v1136_v0 = vpop.f32.mrf.mxu3 }
  0xae   :  { %v755_v56 = vpop.f32.mrf.mxu0 }
  0xaf   :  { %v1014_v57 = vpop.f32.mrf.mxu1 }
  0xb0   :  { %v2985_v58 = vadd.f32 %v1014_v57, %v755_v56  ;;  %v2212_v56 = vor.u32 %v2597_v50, %v2209_v51  ;;  %v2601_v50 = vld [vmem:[%s4689_s0 + $0xe4] sm:$0xf]  ;;  %v2225_v51 = vld [vmem:[%s4689_s0 + $0xe8] sm:$0xf0] }
  0xb1   :  { %794 = vmatmul.bf16.gmra.mxu0 %v2184_v54  ;;  %v3105_v54 = vadd.f32 %v1134_v53, %v875_v52 }
  0xb2   :  { %4771 = vst [vmem:[#allocation4_spill] sm:$0xff] %v2985_v58  ;;  %v1261_v59 = vpack.c.bf16 %v2985_v58, %v2985_v58  ;;  %1053 = vmatmul.bf16.gmra.mxu1 %v2188_v55  ;;  %v2208_v55 = vor.u32 %v2598_v49, %v2207_v47  ;;  %v2223_v47 = vld [vmem:[%s4689_s0 + $0xe0] sm:$0xf]  ;;  %v2602_v49 = vld [vmem:[%s4689_s0 + $0xe4] sm:$0xf0] }
  0xb3   :  { %v1309_v57 = vpack.c.bf16 %v3105_v54, %v3105_v54 }
  0xb4   :  { %1362 = vst.msk [vmem:[%s4690_s2 + $0x8] sm:$0xf] %vm1359_vm0, %v1261_v59  ;;  %v880_v19 = vpop.f32.mrf.mxu2 }
  0xb5   :  { %1410 = vst.msk [vmem:[%s4690_s2 + $0xc8] sm:$0xf] %vm1359_vm0, %v1309_v57  ;;  %v1139_v20 = vpop.f32.mrf.mxu3  ;;  %v2228_v57 = vor.u32 %v2601_v50, %v2225_v51 }
  0xb6   :  { %v757_v1 = vpop.f32.mrf.mxu0 }
  0xb7   :  { %v1016_v2 = vpop.f32.mrf.mxu1 }
  0xb8   :  { %v3005_v4 = vadd.f32 %v1016_v2, %v757_v1  ;;  %v3121_v1 = vadd.f32 %v1136_v0, %v877_v63  ;;  %v2383_v2 = vld [vmem:[%s4689_s0 + $0x220] sm:$0xf] }
  0xb9   :  { %v2384_v7 = vor.u32 %v2642_v3, %v2383_v2 }
  0xba   :  { %4772 = vst [vmem:[#allocation5_spill] sm:$0xff] %v3005_v4  ;;  %v1262_v5 = vpack.c.bf16 %v3005_v4, %v3005_v4  ;;  %v1310_v6 = vpack.c.bf16 %v3121_v1, %v3121_v1 }
  0xbb   :  { %919 = vmatmul.bf16.gmra.mxu2 %v2384_v7  ;;  %v2646_v7 = vld [vmem:[%s4689_s0 + $0x244] sm:$0xf0] }
  0xbc   :  { %1363 = vst.msk [vmem:[%s4690_s2 + $0xc] sm:$0xf] %vm1359_vm0, %v1262_v5  ;;  %v2641_v5 = vld [vmem:[%s4689_s0 + $0x224] sm:$0xf] }
  0xbd   :  { %1411 = vst.msk [vmem:[%s4690_s2 + $0xcc] sm:$0xf] %vm1359_vm0, %v1310_v6  ;;  %v2399_v6 = vld [vmem:[%s4689_s0 + $0x240] sm:$0xf] }
  0xbe   :  { %v760_v12 = vpop.f32.mrf.mxu0 }
  0xbf   :  { %v1019_v13 = vpop.f32.mrf.mxu1 }
  0xc0   :  { %v3025_v14 = vadd.f32 %v1019_v13, %v760_v12 }
  0xc1   :  { %799 = vmatmul.bf16.gmra.mxu0 %v2192_v10 }
  0xc2   :  { %v1263_v15 = vpack.c.bf16 %v3025_v14, %v3025_v14  ;;  %1058 = vmatmul.bf16.gmra.mxu1 %v2196_v11  ;;  %v2388_v11 = vor.u32 %v2641_v5, %v2385_v8  ;;  %v2645_v8 = vld [vmem:[%s4689_s0 + $0x244] sm:$0xf] }
  0xc4   :  { %1364 = vst.msk [vmem:[%s4690_s2 + $0x10] sm:$0xf] %vm1359_vm0, %v1263_v15  ;;  %1178 = vmatmul.bf16.gmra.mxu3 %v2388_v11  ;;  %v2215_v15 = vld [vmem:[%s4689_s0 + $0xd0] sm:$0xf]  ;;  %v2401_v11 = vld [vmem:[%s4689_s0 + $0x248] sm:$0xf0] }
  0xc6   :  { %v762_v21 = vpop.f32.mrf.mxu0 }
  0xc7   :  { %v1021_v22 = vpop.f32.mrf.mxu1 }
  0xc8   :  { %v3045_v24 = vadd.f32 %v1021_v22, %v762_v21  ;;  %v3161_v21 = vadd.f32 %v1139_v20, %v880_v19  ;;  %v2216_v22 = vor.u32 %v2600_v16, %v2215_v15  ;;  %v2404_v16 = vor.u32 %v2645_v8, %v2401_v11  ;;  %v2231_v19 = vld [vmem:[%s4689_s0 + $0xf0] sm:$0xf]  ;;  %v2604_v20 = vld [vmem:[%s4689_s0 + $0xf4] sm:$0xf0] }
  0xca   :  { %4773 = vst [vmem:[#allocation6_spill] sm:$0xff] %v3045_v24  ;;  %v1264_v25 = vpack.c.bf16 %v3045_v24, %v3045_v24 }
  0xcc   :  { %1365 = vst.msk [vmem:[%s4690_s2 + $0x14] sm:$0xf] %vm1359_vm0, %v1264_v25  ;;  %v1311_v25 = vpack.c.bf16 %v3161_v21, %v3161_v21 }
  0xce   :  { %v765_v32 = vpop.f32.mrf.mxu0  ;;  %1412 = vst.msk [vmem:[%s4690_s2 + $0xd0] sm:$0xf] %vm1359_vm0, %v1311_v25 }
  0xcf   :  { %v1024_v33 = vpop.f32.mrf.mxu1 }
  0xd0   :  { %v3065_v34 = vadd.f32 %v1024_v33, %v765_v32  ;;  %v2391_v33 = vld [vmem:[%s4689_s0 + $0x230] sm:$0xf] }
  0xd1   :  { %804 = vmatmul.bf16.gmra.mxu0 %v2200_v30  ;;  %v882_v30 = vpop.f32.mrf.mxu2 }
  0xd2   :  { %4774 = vst [vmem:[#allocation7_spill] sm:$0xff] %v3065_v34  ;;  %v1265_v35 = vpack.c.bf16 %v3065_v34, %v3065_v34  ;;  %1063 = vmatmul.bf16.gmra.mxu1 %v2204_v31  ;;  %v1141_v31 = vpop.f32.mrf.mxu3 }
  0xd3   :  { %v3177_v32 = vadd.f32 %v1141_v31, %v882_v30 }
  0xd4   :  { %1366 = vst.msk [vmem:[%s4690_s2 + $0x18] sm:$0xf] %vm1359_vm0, %v1265_v35  ;;  %v2644_v35 = vld [vmem:[%s4689_s0 + $0x234] sm:$0xf0] }
  0xd5   :  { %v1312_v37 = vpack.c.bf16 %v3177_v32, %v3177_v32  ;;  %v2392_v39 = vor.u32 %v2644_v35, %v2391_v33 }
  0xd6   :  { %v767_v42 = vpop.f32.mrf.mxu0 }
  0xd7   :  { %v1026_v43 = vpop.f32.mrf.mxu1  ;;  %1413 = vst.msk [vmem:[%s4690_s2 + $0xd4] sm:$0xf] %vm1359_vm0, %v1312_v37  ;;  %924 = vmatmul.bf16.gmra.mxu2 %v2392_v39 }
  0xd8   :  { %v3085_v45 = vadd.f32 %v1026_v43, %v767_v42  ;;  %v2396_v43 = vor.u32 %v2643_v36, %v2393_v40 }
  0xd9   :  { %v885_v52 = vpop.f32.mrf.mxu2 }
  0xda   :  { %4775 = vst [vmem:[#allocation8_spill] sm:$0xff] %v3085_v45  ;;  %v1266_v46 = vpack.c.bf16 %v3085_v45, %v3085_v45  ;;  %1183 = vmatmul.bf16.gmra.mxu3 %v2396_v43  ;;  %v1144_v53 = vpop.f32.mrf.mxu3  ;;  %v2648_v43 = vld [vmem:[%s4689_s0 + $0x254] sm:$0xf0] }
  0xdc   :  { %1367 = vst.msk [vmem:[%s4690_s2 + $0x1c] sm:$0xf] %vm1359_vm0, %v1266_v46 }
  0xde   :  { %v770_v59 = vpop.f32.mrf.mxu0 }
  0xdf   :  { %v1029_v60 = vpop.f32.mrf.mxu1 }
  0xe0   :  { %v3109_v61 = vadd.f32 %v1029_v60, %v770_v59 }
  0xe1   :  { %809 = vmatmul.bf16.gmra.mxu0 %v2208_v55  ;;  %v3217_v55 = vadd.f32 %v1144_v53, %v885_v52  ;;  %v887_v2 = vpop.f32.mrf.mxu2 }
  0xe2   :  { %v1267_v62 = vpack.c.bf16 %v3109_v61, %v3109_v61  ;;  %1068 = vmatmul.bf16.gmra.mxu1 %v2212_v56  ;;  %v2224_v56 = vor.u32 %v2602_v49, %v2223_v47  ;;  %v1146_v3 = vpop.f32.mrf.mxu3  ;;  %v2409_v49 = vld [vmem:[%s4689_s0 + $0x258] sm:$0xf0] }
  0xe3   :  { %4777 = vst [vmem:[#allocation10_spill] sm:$0xff] %v3217_v55  ;;  %v1313_v59 = vpack.c.bf16 %v3217_v55, %v3217_v55  ;;  %v3233_v5 = vadd.f32 %v1146_v3, %v887_v2 }
  0xe4   :  { %1368 = vst.msk [vmem:[%s4690_s2 + $0x20] sm:$0xf] %vm1359_vm0, %v1267_v62 }
  0xe5   :  { %1414 = vst.msk [vmem:[%s4690_s2 + $0xd8] sm:$0xf] %vm1359_vm0, %v1313_v59  ;;  %v2239_v59 = vld [vmem:[%s4689_s0 + $0x100] sm:$0xf] }
  0xe6   :  { %v772_v9 = vpop.f32.mrf.mxu0  ;;  %4778 = vst [vmem:[#allocation11_spill] sm:$0xff] %v3233_v5 }
  0xe7   :  { %v1031_v10 = vpop.f32.mrf.mxu1 }
  0xe8   :  { %v3137_v12 = vadd.f32 %v1031_v10, %v772_v9  ;;  %v1314_v9 = vpack.c.bf16 %v3233_v5, %v3233_v5  ;;  %v2400_v10 = vor.u32 %v2646_v7, %v2399_v6 }
  0xe9   :  { %v890_v25 = vpop.f32.mrf.mxu2 }
  0xea   :  { %v1268_v13 = vpack.c.bf16 %v3137_v12, %v3137_v12  ;;  %1415 = vst.msk [vmem:[%s4690_s2 + $0xdc] sm:$0xf] %vm1359_vm0, %v1314_v9  ;;  %929 = vmatmul.bf16.gmra.mxu2 %v2400_v10  ;;  %1188 = vmatmul.bf16.gmra.mxu3 %v2404_v16 }
  0xec   :  { %1369 = vst.msk [vmem:[%s4690_s2 + $0x24] sm:$0xf] %vm1359_vm0, %v1268_v13 }
  0xee   :  { %v775_v26 = vpop.f32.mrf.mxu0 }
  0xef   :  { %v1034_v27 = vpop.f32.mrf.mxu1 }
  0xf0   :  { %v3165_v28 = vadd.f32 %v1034_v27, %v775_v26  ;;  %v1149_v26 = vpop.f32.mrf.mxu3 }
  0xf1   :  { %814 = vmatmul.bf16.gmra.mxu0 %v2216_v22  ;;  %v2603_v22 = vld [vmem:[%s4689_s0 + $0xf4] sm:$0xf]  ;;  %v3273_v27 = vadd.f32 %v1149_v26, %v890_v25  ;;  %v892_v39 = vpop.f32.mrf.mxu2  ;;  %v2417_v26 = vld [vmem:[%s4689_s0 + $0x268] sm:$0xf0] }
  0xf2   :  { %v1269_v29 = vpack.c.bf16 %v3165_v28, %v3165_v28  ;;  %1073 = vmatmul.bf16.gmra.mxu1 %v2220_v23  ;;  %v2233_v23 = vld [vmem:[%s4689_s0 + $0xf8] sm:$0xf0] }
  0xf3   :  { %4779 = vst [vmem:[#allocation12_spill] sm:$0xff] %v3273_v27  ;;  %v2236_v30 = vor.u32 %v2603_v22, %v2233_v23  ;;  %v1315_v35 = vpack.c.bf16 %v3273_v27, %v3273_v27  ;;  %v2650_v22 = vld [vmem:[%s4689_s0 + $0x264] sm:$0xf0]  ;;  %v2649_v23 = vld [vmem:[%s4689_s0 + $0x264] sm:$0xf] }
  0xf4   :  { %1370 = vst.msk [vmem:[%s4690_s2 + $0x28] sm:$0xf] %vm1359_vm0, %v1269_v29  ;;  %v2232_v29 = vor.u32 %v2604_v20, %v2231_v19  ;;  %v2415_v20 = vld [vmem:[%s4689_s0 + $0x260] sm:$0xf] }
  0xf5   :  { %1416 = vst.msk [vmem:[%s4690_s2 + $0xe0] sm:$0xf] %vm1359_vm0, %v1315_v35  ;;  %v2416_v25 = vor.u32 %v2650_v22, %v2415_v20 }
  0xf6   :  { %v777_v41 = vpop.f32.mrf.mxu0 }
  0xf7   :  { %v1036_v42 = vpop.f32.mrf.mxu1 }
  0xf8   :  { %v3193_v44 = vadd.f32 %v1036_v42, %v777_v41  ;;  %v1151_v40 = vpop.f32.mrf.mxu3  ;;  %v2407_v42 = vld [vmem:[%s4689_s0 + $0x250] sm:$0xf] }
  0xf9   :  { %v3289_v41 = vadd.f32 %v1151_v40, %v892_v39  ;;  %v2408_v47 = vor.u32 %v2648_v43, %v2407_v42  ;;  %v895_v2 = vpop.f32.mrf.mxu2  ;;  %v2247_v39 = vld [vmem:[%s4689_s0 + $0x110] sm:$0xf]  ;;  %v2608_v40 = vld [vmem:[%s4689_s0 + $0x114] sm:$0xf0]  ;;  %v2607_v42 = vld [vmem:[%s4689_s0 + $0x114] sm:$0xf] }
  0xfa   :  { %4776 = vst [vmem:[#allocation9_spill] sm:$0xff] %v3193_v44  ;;  %v1270_v46 = vpack.c.bf16 %v3193_v44, %v3193_v44  ;;  %v2249_v43 = vld [vmem:[%s4689_s0 + $0x118] sm:$0xf0] }
  0xfb   :  { %4781 = vst [vmem:[#allocation14_spill] sm:$0xff] %v3289_v41  ;;  %v1316_v52 = vpack.c.bf16 %v3289_v41, %v3289_v41  ;;  %934 = vmatmul.bf16.gmra.mxu2 %v2408_v47 }
  0xfc   :  { %1371 = vst.msk [vmem:[%s4690_s2 + $0x2c] sm:$0xf] %vm1359_vm0, %v1270_v46  ;;  %v2647_v46 = vld [vmem:[%s4689_s0 + $0x254] sm:$0xf] }
  0xfd   :  { %v2412_v53 = vor.u32 %v2647_v46, %v2409_v49  ;;  %1417 = vst.msk [vmem:[%s4690_s2 + $0xe4] sm:$0xf] %vm1359_vm0, %v1316_v52 }
  0xfe   :  { %v780_v60 = vpop.f32.mrf.mxu0 }
  0xff   :  { %v1039_v62 = vpop.f32.mrf.mxu1  ;;  %1193 = vmatmul.bf16.gmra.mxu3 %v2412_v53 }
 0x100   :  { %v3221_v63 = vadd.f32 %v1039_v62, %v780_v60  ;;  %v2606_v60 = vld [vmem:[%s4689_s0 + $0x104] sm:$0xf0]  ;;  %v2605_v62 = vld [vmem:[%s4689_s0 + $0x104] sm:$0xf]  ;;  %v1154_v3 = vpop.f32.mrf.mxu3 }
 0x101   :  { %819 = vmatmul.bf16.gmra.mxu0 %v2224_v56  ;;  %v3329_v6 = vadd.f32 %v1154_v3, %v895_v2  ;;  %v2240_v7 = vor.u32 %v2606_v60, %v2239_v59  ;;  %v897_v16 = vpop.f32.mrf.mxu2  ;;  %v2423_v3 = vld [vmem:[%s4689_s0 + $0x270] sm:$0xf] }
 0x102   :  { %v1271_v0 = vpack.c.bf16 %v3221_v63, %v3221_v63  ;;  %1078 = vmatmul.bf16.gmra.mxu1 %v2228_v57 }
 0x103   :  { %4783 = vst [vmem:[#allocation16_spill] sm:$0xff] %v3329_v6  ;;  %v1317_v11 = vpack.c.bf16 %v3329_v6, %v3329_v6 }
 0x104   :  { %1372 = vst.msk [vmem:[%s4690_s2 + $0x30] sm:$0xf] %vm1359_vm0, %v1271_v0  ;;  %v2241_v0 = vld [vmem:[%s4689_s0 + $0x108] sm:$0xf0] }
 0x105   :  { %v2244_v8 = vor.u32 %v2605_v62, %v2241_v0  ;;  %1418 = vst.msk [vmem:[%s4690_s2 + $0xe8] sm:$0xf] %vm1359_vm0, %v1317_v11 }
 0x106   :  { %v782_v13 = vpop.f32.mrf.mxu0 }
 0x107   :  { %v1041_v15 = vpop.f32.mrf.mxu1 }
 0x108   :  { %v3249_v17 = vadd.f32 %v1041_v15, %v782_v13 }
 0x109   :  { %v900_v46 = vpop.f32.mrf.mxu2 }
 0x10a   :  { %v1272_v18 = vpack.c.bf16 %v3249_v17, %v3249_v17 }
 0x10b   :  { %939 = vmatmul.bf16.gmra.mxu2 %v2416_v25  ;;  %v2610_v25 = vld [vmem:[%s4689_s0 + $0x124] sm:$0xf0] }
 0x10c   :  { %1373 = vst.msk [vmem:[%s4690_s2 + $0x34] sm:$0xf] %vm1359_vm0, %v1272_v18  ;;  %v1156_v18 = vpop.f32.mrf.mxu3 }
 0x10d   :  { %v3345_v19 = vadd.f32 %v1156_v18, %v897_v16 }
 0x10e   :  { %v785_v31 = vpop.f32.mrf.mxu0 }
 0x10f   :  { %v1044_v33 = vpop.f32.mrf.mxu1  ;;  %4784 = vst [vmem:[#allocation17_spill] sm:$0xff] %v3345_v19 }
 0x110   :  { %v3277_v36 = vadd.f32 %v1044_v33, %v785_v31  ;;  %v1318_v31 = vpack.c.bf16 %v3345_v19, %v3345_v19  ;;  %v2420_v33 = vor.u32 %v2649_v23, %v2417_v26  ;;  %v2255_v23 = vld [vmem:[%s4689_s0 + $0x120] sm:$0xf]  ;;  %v2609_v26 = vld [vmem:[%s4689_s0 + $0x124] sm:$0xf] }
 0x111   :  { %824 = vmatmul.bf16.gmra.mxu0 %v2232_v29  ;;  %v902_v62 = vpop.f32.mrf.mxu2 }
 0x112   :  { %4780 = vst [vmem:[#allocation13_spill] sm:$0xff] %v3277_v36  ;;  %v1273_v37 = vpack.c.bf16 %v3277_v36, %v3277_v36  ;;  %1083 = vmatmul.bf16.gmra.mxu1 %v2236_v30  ;;  %1198 = vmatmul.bf16.gmra.mxu3 %v2420_v33 }
 0x113   :  { %1419 = vst.msk [vmem:[%s4690_s2 + $0xec] sm:$0xf] %vm1359_vm0, %v1318_v31 }
 0x114   :  { %1374 = vst.msk [vmem:[%s4690_s2 + $0x38] sm:$0xf] %vm1359_vm0, %v1273_v37  ;;  %v1159_v47 = vpop.f32.mrf.mxu3 }
 0x115   :  { %v3385_v49 = vadd.f32 %v1159_v47, %v900_v46 }
 0x116   :  { %v787_v50 = vpop.f32.mrf.mxu0 }
 0x117   :  { %v1046_v51 = vpop.f32.mrf.mxu1  ;;  %4785 = vst [vmem:[#allocation18_spill] sm:$0xff] %v3385_v49 }
 0x118   :  { %v3305_v56 = vadd.f32 %v1046_v51, %v787_v50  ;;  %v2248_v50 = vor.u32 %v2608_v40, %v2247_v39  ;;  %v2252_v51 = vor.u32 %v2607_v42, %v2249_v43 }
 0x11a   :  { %4782 = vst [vmem:[#allocation15_spill] sm:$0xff] %v3305_v56  ;;  %v1274_v57 = vpack.c.bf16 %v3305_v56, %v3305_v56 }
 0x11c   :  { %1375 = vst.msk [vmem:[%s4690_s2 + $0x3c] sm:$0xf] %vm1359_vm0, %v1274_v57  ;;  %v1319_v57 = vpack.c.bf16 %v3385_v49, %v3385_v49  ;;  %v1161_v0 = vpop.f32.mrf.mxu3 }
 0x11d   :  { %v3401_v2 = vadd.f32 %v1161_v0, %v902_v62  ;;  %v2433_v0 = vld [vmem:[%s4689_s0 + $0x288] sm:$0xf0] }
 0x11e   :  { %v790_v9 = vpop.f32.mrf.mxu0  ;;  %1420 = vst.msk [vmem:[%s4690_s2 + $0xf0] sm:$0xf] %vm1359_vm0, %v1319_v57  ;;  %v2654_v57 = vld [vmem:[%s4689_s0 + $0x284] sm:$0xf0] }
 0x11f   :  { %v1049_v10 = vpop.f32.mrf.mxu1  ;;  %4787 = vst [vmem:[#allocation20_spill] sm:$0xff] %v3401_v2  ;;  %v1320_v16 = vpack.c.bf16 %v3401_v2, %v3401_v2 }
 0x120   :  { %v3333_v13 = vadd.f32 %v1049_v10, %v790_v9  ;;  %v2425_v10 = vld [vmem:[%s4689_s0 + $0x278] sm:$0xf0] }
 0x121   :  { %829 = vmatmul.bf16.gmra.mxu0 %v2240_v7  ;;  %v2652_v7 = vld [vmem:[%s4689_s0 + $0x274] sm:$0xf0]  ;;  %1421 = vst.msk [vmem:[%s4690_s2 + $0xf4] sm:$0xf] %vm1359_vm0, %v1320_v16 }
 0x122   :  { %v1275_v15 = vpack.c.bf16 %v3333_v13, %v3333_v13  ;;  %1088 = vmatmul.bf16.gmra.mxu1 %v2244_v8  ;;  %v2651_v8 = vld [vmem:[%s4689_s0 + $0x274] sm:$0xf]  ;;  %v2424_v9 = vor.u32 %v2652_v7, %v2423_v3  ;;  %v2612_v16 = vld [vmem:[%s4689_s0 + $0x134] sm:$0xf0] }
 0x123   :  { %v2428_v18 = vor.u32 %v2651_v8, %v2425_v10 }
 0x124   :  { %1376 = vst.msk [vmem:[%s4690_s2 + $0x40] sm:$0xf] %vm1359_vm0, %v1275_v15  ;;  %944 = vmatmul.bf16.gmra.mxu2 %v2424_v9  ;;  %v1164_v31 = vpop.f32.mrf.mxu3 }
 0x125   :  { %1203 = vmatmul.bf16.gmra.mxu3 %v2428_v18  ;;  %v2611_v18 = vld [vmem:[%s4689_s0 + $0x134] sm:$0xf] }
 0x126   :  { %v792_v29 = vpop.f32.mrf.mxu0 }
 0x127   :  { %v1051_v30 = vpop.f32.mrf.mxu1 }
 0x128   :  { %v3361_v35 = vadd.f32 %v1051_v30, %v792_v29  ;;  %v2257_v29 = vld [vmem:[%s4689_s0 + $0x128] sm:$0xf0]  ;;  %v905_v30 = vpop.f32.mrf.mxu2 }
 0x129   :  { %v3441_v33 = vadd.f32 %v1164_v31, %v905_v30  ;;  %v2260_v39 = vor.u32 %v2609_v26, %v2257_v29 }
 0x12a   :  { %v1276_v37 = vpack.c.bf16 %v3361_v35, %v3361_v35 }
 0x12b   :  { %4789 = vst [vmem:[#allocation22_spill] sm:$0xff] %v3441_v33  ;;  %v1321_v43 = vpack.c.bf16 %v3441_v33, %v3441_v33 }
 0x12c   :  { %1377 = vst.msk [vmem:[%s4690_s2 + $0x44] sm:$0xf] %vm1359_vm0, %v1276_v37  ;;  %v2256_v37 = vor.u32 %v2610_v25, %v2255_v23 }
 0x12d   :  { %1422 = vst.msk [vmem:[%s4690_s2 + $0xf8] sm:$0xf] %vm1359_vm0, %v1321_v43 }
 0x12e   :  { %v795_v52 = vpop.f32.mrf.mxu0 }
 0x12f   :  { %v1054_v53 = vpop.f32.mrf.mxu1 }
 0x130   :  { %v3389_v59 = vadd.f32 %v1054_v53, %v795_v52  ;;  %v2431_v53 = vld [vmem:[%s4689_s0 + $0x280] sm:$0xf] }
 0x131   :  { %834 = vmatmul.bf16.gmra.mxu0 %v2248_v50  ;;  %v907_v50 = vpop.f32.mrf.mxu2  ;;  %v2432_v62 = vor.u32 %v2654_v57, %v2431_v53  ;;  %v2656_v53 = vld [vmem:[%s4689_s0 + $0x294] sm:$0xf0]  ;;  %v2655_v57 = vld [vmem:[%s4689_s0 + $0x294] sm:$0xf] }
 0x132   :  { %4786 = vst [vmem:[#allocation19_spill] sm:$0xff] %v3389_v59  ;;  %v1277_v60 = vpack.c.bf16 %v3389_v59, %v3389_v59  ;;  %1093 = vmatmul.bf16.gmra.mxu1 %v2252_v51  ;;  %v1166_v51 = vpop.f32.mrf.mxu3 }
 0x133   :  { %v3457_v52 = vadd.f32 %v1166_v51, %v907_v50  ;;  %v2439_v51 = vld [vmem:[%s4689_s0 + $0x290] sm:$0xf] }
 0x134   :  { %1378 = vst.msk [vmem:[%s4690_s2 + $0x48] sm:$0xf] %vm1359_vm0, %v1277_v60  ;;  %v2653_v60 = vld [vmem:[%s4689_s0 + $0x284] sm:$0xf]  ;;  %949 = vmatmul.bf16.gmra.mxu2 %v2432_v62  ;;  %v2441_v62 = vld [vmem:[%s4689_s0 + $0x298] sm:$0xf0] }
 0x135   :  { %4790 = vst [vmem:[#allocation23_spill] sm:$0xff] %v3457_v52  ;;  %v1322_v8 = vpack.c.bf16 %v3457_v52, %v3457_v52  ;;  %v2436_v9 = vor.u32 %v2653_v60, %v2433_v0  ;;  %v2440_v60 = vor.u32 %v2656_v53, %v2439_v51 }
 0x136   :  { %v797_v11 = vpop.f32.mrf.mxu0 }
 0x137   :  { %v1056_v15 = vpop.f32.mrf.mxu1  ;;  %1423 = vst.msk [vmem:[%s4690_s2 + $0xfc] sm:$0xf] %vm1359_vm0, %v1322_v8  ;;  %1208 = vmatmul.bf16.gmra.mxu3 %v2436_v9  ;;  %v2444_v8 = vor.u32 %v2655_v57, %v2441_v62  ;;  %v2658_v62 = vld [vmem:[%s4689_s0 + $0x2a4] sm:$0xf0] }
 0x138   :  { %v3417_v20 = vadd.f32 %v1056_v15, %v797_v11  ;;  %v2263_v15 = vld [vmem:[%s4689_s0 + $0x130] sm:$0xf] }
 0x139   :  { %v910_v23 = vpop.f32.mrf.mxu2  ;;  %v2264_v29 = vor.u32 %v2612_v16, %v2263_v15  ;;  %v2271_v15 = vld [vmem:[%s4689_s0 + $0x140] sm:$0xf]  ;;  %v2614_v16 = vld [vmem:[%s4689_s0 + $0x144] sm:$0xf0] }
 0x13a   :  { %4788 = vst [vmem:[#allocation21_spill] sm:$0xff] %v3417_v20  ;;  %v1278_v22 = vpack.c.bf16 %v3417_v20, %v3417_v20  ;;  %v1169_v25 = vpop.f32.mrf.mxu3 }
 0x13b   :  { %v3497_v26 = vadd.f32 %v1169_v25, %v910_v23 }
 0x13c   :  { %1379 = vst.msk [vmem:[%s4690_s2 + $0x4c] sm:$0xf] %vm1359_vm0, %v1278_v22  ;;  %v2265_v22 = vld [vmem:[%s4689_s0 + $0x138] sm:$0xf0] }
 0x13d   :  { %4791 = vst [vmem:[#allocation24_spill] sm:$0xff] %v3497_v26  ;;  %v2268_v30 = vor.u32 %v2611_v18, %v2265_v22  ;;  %v2613_v18 = vld [vmem:[%s4689_s0 + $0x144] sm:$0xf]  ;;  %v2273_v22 = vld [vmem:[%s4689_s0 + $0x148] sm:$0xf0] }
 0x13e   :  { %v800_v40 = vpop.f32.mrf.mxu0 }
 0x13f   :  { %v1059_v42 = vpop.f32.mrf.mxu1 }
 0x140   :  { %v3445_v46 = vadd.f32 %v1059_v42, %v800_v40 }
 0x141   :  { %839 = vmatmul.bf16.gmra.mxu0 %v2256_v37  ;;  %v912_v43 = vpop.f32.mrf.mxu2 }
 0x142   :  { %v1279_v47 = vpack.c.bf16 %v3445_v46, %v3445_v46  ;;  %1098 = vmatmul.bf16.gmra.mxu1 %v2260_v39  ;;  %v1323_v39 = vpack.c.bf16 %v3497_v26, %v3497_v26 }
 0x144   :  { %1380 = vst.msk [vmem:[%s4690_s2 + $0x50] sm:$0xf] %vm1359_vm0, %v1279_v47  ;;  %v1171_v47 = vpop.f32.mrf.mxu3  ;;  %954 = vmatmul.bf16.gmra.mxu2 %v2440_v60  ;;  %v2447_v60 = vld [vmem:[%s4689_s0 + $0x2a0] sm:$0xf] }
 0x145   :  { %1424 = vst.msk [vmem:[%s4690_s2 + $0x100] sm:$0xf] %vm1359_vm0, %v1323_v39  ;;  %v3513_v50 = vadd.f32 %v1171_v47, %v912_v43 }
 0x146   :  { %v802_v3 = vpop.f32.mrf.mxu0 }
 0x147   :  { %v1061_v7 = vpop.f32.mrf.mxu1  ;;  %4793 = vst [vmem:[#allocation26_spill] sm:$0xff] %v3513_v50  ;;  %1213 = vmatmul.bf16.gmra.mxu3 %v2444_v8 }
 0x148   :  { %v3473_v10 = vadd.f32 %v1061_v7, %v802_v3  ;;  %v1324_v7 = vpack.c.bf16 %v3513_v50, %v3513_v50 }
 0x149   :  { %v915_v23 = vpop.f32.mrf.mxu2 }
 0x14a   :  { %v1280_v11 = vpack.c.bf16 %v3473_v10, %v3473_v10  ;;  %1425 = vst.msk [vmem:[%s4690_s2 + $0x104] sm:$0xf] %vm1359_vm0, %v1324_v7  ;;  %v2449_v7 = vld [vmem:[%s4689_s0 + $0x2a8] sm:$0xf0] }
 0x14c   :  { %1381 = vst.msk [vmem:[%s4690_s2 + $0x54] sm:$0xf] %vm1359_vm0, %v1280_v11  ;;  %v1174_v25 = vpop.f32.mrf.mxu3 }
 0x14e   :  { %v805_v31 = vpop.f32.mrf.mxu0 }
 0x14f   :  { %v1064_v37 = vpop.f32.mrf.mxu1 }
 0x150   :  { %v3501_v40 = vadd.f32 %v1064_v37, %v805_v31  ;;  %v2276_v31 = vor.u32 %v2613_v18, %v2273_v22 }
 0x151   :  { %844 = vmatmul.bf16.gmra.mxu0 %v2264_v29  ;;  %v3553_v29 = vadd.f32 %v1174_v25, %v915_v23  ;;  %v917_v51 = vpop.f32.mrf.mxu2  ;;  %v2279_v23 = vld [vmem:[%s4689_s0 + $0x150] sm:$0xf]  ;;  %v2616_v25 = vld [vmem:[%s4689_s0 + $0x154] sm:$0xf0] }
 0x152   :  { %4792 = vst [vmem:[#allocation25_spill] sm:$0xff] %v3501_v40  ;;  %v1281_v42 = vpack.c.bf16 %v3501_v40, %v3501_v40  ;;  %1103 = vmatmul.bf16.gmra.mxu1 %v2268_v30  ;;  %v2272_v30 = vor.u32 %v2614_v16, %v2271_v15 }
 0x153   :  { %4795 = vst [vmem:[#allocation28_spill] sm:$0xff] %v3553_v29 }
 0x154   :  { %1382 = vst.msk [vmem:[%s4690_s2 + $0x58] sm:$0xf] %vm1359_vm0, %v1281_v42  ;;  %v1325_v42 = vpack.c.bf16 %v3553_v29, %v3553_v29  ;;  %v1176_v53 = vpop.f32.mrf.mxu3  ;;  %v1467_v29 = vsel %vm1465_vm1, %v2965_v48, 0.0 }
 0x155   :  { %v3569_v57 = vadd.f32 %v1176_v53, %v917_v51 }
 0x156   :  { %v807_v0 = vpop.f32.mrf.mxu0  ;;  %1426 = vst.msk [vmem:[%s4690_s2 + $0x108] sm:$0xf] %vm1359_vm0, %v1325_v42 }
 0x157   :  { %v1066_v3 = vpop.f32.mrf.mxu1  ;;  %4796 = vst [vmem:[#allocation29_spill] sm:$0xff] %v3569_v57  ;;  %v1326_v15 = vpack.c.bf16 %v3569_v57, %v3569_v57 }
 0x158   :  { %v3529_v9 = vadd.f32 %v1066_v3, %v807_v0  ;;  %v2657_v0 = vld [vmem:[%s4689_s0 + $0x2a4] sm:$0xf]  ;;  %v2448_v3 = vor.u32 %v2658_v62, %v2447_v60 }
 0x159   :  { %v2452_v16 = vor.u32 %v2657_v0, %v2449_v7  ;;  %1427 = vst.msk [vmem:[%s4690_s2 + $0x10c] sm:$0xf] %vm1359_vm0, %v1326_v15  ;;  %v2455_v15 = vld [vmem:[%s4689_s0 + $0x2b0] sm:$0xf] }
 0x15a   :  { %4794 = vst [vmem:[#allocation27_spill] sm:$0xff] %v3529_v9  ;;  %v1282_v11 = vpack.c.bf16 %v3529_v9, %v3529_v9  ;;  %959 = vmatmul.bf16.gmra.mxu2 %v2448_v3 }
 0x15b   :  { %1218 = vmatmul.bf16.gmra.mxu3 %v2452_v16  ;;  %v2660_v16 = vld [vmem:[%s4689_s0 + $0x2b4] sm:$0xf0] }
 0x15c   :  { %1383 = vst.msk [vmem:[%s4690_s2 + $0x5c] sm:$0xf] %vm1359_vm0, %v1282_v11 }
 0x15e   :  { %v810_v37 = vpop.f32.mrf.mxu0 }
 0x15f   :  { %v1069_v39 = vpop.f32.mrf.mxu1 }
 0x160   :  { %v3557_v43 = vadd.f32 %v1069_v39, %v810_v37  ;;  %v920_v37 = vpop.f32.mrf.mxu2  ;;  %v1179_v39 = vpop.f32.mrf.mxu3 }
 0x161   :  { %849 = vmatmul.bf16.gmra.mxu0 %v2272_v30  ;;  %v2615_v30 = vld [vmem:[%s4689_s0 + $0x154] sm:$0xf]  ;;  %v3609_v42 = vadd.f32 %v1179_v39, %v920_v37 }
 0x162   :  { %v1283_v47 = vpack.c.bf16 %v3557_v43, %v3557_v43  ;;  %1108 = vmatmul.bf16.gmra.mxu1 %v2276_v31  ;;  %v2281_v31 = vld [vmem:[%s4689_s0 + $0x158] sm:$0xf0] }
 0x163   :  { %4797 = vst [vmem:[#allocation30_spill] sm:$0xff] %v3609_v42  ;;  %v2284_v51 = vor.u32 %v2615_v30, %v2281_v31  ;;  %v1327_v62 = vpack.c.bf16 %v3609_v42, %v3609_v42 }
 0x164   :  { %1384 = vst.msk [vmem:[%s4690_s2 + $0x60] sm:$0xf] %vm1359_vm0, %v1283_v47  ;;  %v2280_v47 = vor.u32 %v2616_v25, %v2279_v23  ;;  %v2456_v23 = vor.u32 %v2660_v16, %v2455_v15  ;;  %v2457_v25 = vld [vmem:[%s4689_s0 + $0x2b8] sm:$0xf0] }
 0x165   :  { %1428 = vst.msk [vmem:[%s4690_s2 + $0x110] sm:$0xf] %vm1359_vm0, %v1327_v62  ;;  %v2617_v62 = vld [vmem:[%s4689_s0 + $0x164] sm:$0xf] }
 0x166   :  { %v812_v8 = vpop.f32.mrf.mxu0 }
 0x167   :  { %v1071_v11 = vpop.f32.mrf.mxu1 }
 0x168   :  { %v3585_v18 = vadd.f32 %v1071_v11, %v812_v8  ;;  %v922_v7 = vpop.f32.mrf.mxu2  ;;  %v1181_v8 = vpop.f32.mrf.mxu3 }
 0x169   :  { %v3625_v11 = vadd.f32 %v1181_v8, %v922_v7 }
 0x16a   :  { %v1284_v22 = vpack.c.bf16 %v3585_v18, %v3585_v18  ;;  %964 = vmatmul.bf16.gmra.mxu2 %v2456_v23 }
 0x16b   :  { %4799 = vst [vmem:[#allocation32_spill] sm:$0xff] %v3625_v11  ;;  %v1328_v37 = vpack.c.bf16 %v3625_v11, %v3625_v11 }
 0x16c   :  { %1385 = vst.msk [vmem:[%s4690_s2 + $0x64] sm:$0xf] %vm1359_vm0, %v1284_v22  ;;  %v2659_v22 = vld [vmem:[%s4689_s0 + $0x2b4] sm:$0xf] }
 0x16d   :  { %v2460_v39 = vor.u32 %v2659_v22, %v2457_v25  ;;  %1429 = vst.msk [vmem:[%s4690_s2 + $0x114] sm:$0xf] %vm1359_vm0, %v1328_v37 }
 0x16e   :  { %v815_v53 = vpop.f32.mrf.mxu0 }
 0x16f   :  { %v1074_v60 = vpop.f32.mrf.mxu1  ;;  %1223 = vmatmul.bf16.gmra.mxu3 %v2460_v39 }
 0x170   :  { %v3613_v0 = vadd.f32 %v1074_v60, %v815_v53  ;;  %v2287_v53 = vld [vmem:[%s4689_s0 + $0x160] sm:$0xf]  ;;  %v2618_v60 = vld [vmem:[%s4689_s0 + $0x164] sm:$0xf0]  ;;  %v925_v7 = vpop.f32.mrf.mxu2  ;;  %v1184_v8 = vpop.f32.mrf.mxu3 }
 0x171   :  { %854 = vmatmul.bf16.gmra.mxu0 %v2280_v47  ;;  %v3665_v15 = vadd.f32 %v1184_v8, %v925_v7  ;;  %v2288_v16 = vor.u32 %v2618_v60, %v2287_v53  ;;  %v2463_v60 = vld [vmem:[%s4689_s0 + $0x2c0] sm:$0xf]  ;;  %v2465_v8 = vld [vmem:[%s4689_s0 + $0x2c8] sm:$0xf0] }
 0x172   :  { %4798 = vst [vmem:[#allocation31_spill] sm:$0xff] %v3613_v0  ;;  %v1285_v3 = vpack.c.bf16 %v3613_v0, %v3613_v0  ;;  %1113 = vmatmul.bf16.gmra.mxu1 %v2284_v51 }
 0x173   :  { %4801 = vst [vmem:[#allocation34_spill] sm:$0xff] %v3665_v15 }
 0x174   :  { %1386 = vst.msk [vmem:[%s4690_s2 + $0x68] sm:$0xf] %vm1359_vm0, %v1285_v3  ;;  %v2289_v3 = vld [vmem:[%s4689_s0 + $0x168] sm:$0xf0] }
 0x175   :  { %v2292_v22 = vor.u32 %v2617_v62, %v2289_v3  ;;  %v2662_v62 = vld [vmem:[%s4689_s0 + $0x2c4] sm:$0xf0]  ;;  %v2661_v3 = vld [vmem:[%s4689_s0 + $0x2c4] sm:$0xf] }
 0x176   :  { %v817_v30 = vpop.f32.mrf.mxu0  ;;  %v2464_v7 = vor.u32 %v2662_v62, %v2463_v60  ;;  %v2619_v60 = vld [vmem:[%s4689_s0 + $0x174] sm:$0xf]  ;;  %v2297_v62 = vld [vmem:[%s4689_s0 + $0x178] sm:$0xf0] }
 0x177   :  { %v1076_v31 = vpop.f32.mrf.mxu1 }
 0x178   :  { %v3641_v47 = vadd.f32 %v1076_v31, %v817_v30  ;;  %v1329_v30 = vpack.c.bf16 %v3665_v15, %v3665_v15  ;;  %v927_v39 = vpop.f32.mrf.mxu2 }
 0x17a   :  { %4800 = vst [vmem:[#allocation33_spill] sm:$0xff] %v3641_v47  ;;  %v1286_v51 = vpack.c.bf16 %v3641_v47, %v3641_v47  ;;  %969 = vmatmul.bf16.gmra.mxu2 %v2464_v7 }
 0x17b   :  { %1430 = vst.msk [vmem:[%s4690_s2 + $0x118] sm:$0xf] %vm1359_vm0, %v1329_v30 }
 0x17c   :  { %1387 = vst.msk [vmem:[%s4690_s2 + $0x6c] sm:$0xf] %vm1359_vm0, %v1286_v51  ;;  %v1186_v51 = vpop.f32.mrf.mxu3 }
 0x17d   :  { %v3681_v53 = vadd.f32 %v1186_v51, %v927_v39  ;;  %v2295_v39 = vld [vmem:[%s4689_s0 + $0x170] sm:$0xf]  ;;  %v2620_v51 = vld [vmem:[%s4689_s0 + $0x174] sm:$0xf0] }
 0x17e   :  { %v820_v23 = vpop.f32.mrf.mxu0 }
 0x17f   :  { %v1079_v25 = vpop.f32.mrf.mxu1  ;;  %4802 = vst [vmem:[#allocation35_spill] sm:$0xff] %v3681_v53 }
 0x180   :  { %v3669_v31 = vadd.f32 %v1079_v25, %v820_v23  ;;  %v1330_v23 = vpack.c.bf16 %v3681_v53, %v3681_v53  ;;  %v2468_v25 = vor.u32 %v2661_v3, %v2465_v8  ;;  %v930_v3 = vpop.f32.mrf.mxu2 }
 0x181   :  { %859 = vmatmul.bf16.gmra.mxu0 %v2288_v16 }
 0x182   :  { %v1287_v37 = vpack.c.bf16 %v3669_v31, %v3669_v31  ;;  %1118 = vmatmul.bf16.gmra.mxu1 %v2292_v22  ;;  %1431 = vst.msk [vmem:[%s4690_s2 + $0x11c] sm:$0xf] %vm1359_vm0, %v1330_v23  ;;  %1228 = vmatmul.bf16.gmra.mxu3 %v2468_v25 }
 0x184   :  { %1388 = vst.msk [vmem:[%s4690_s2 + $0x70] sm:$0xf] %vm1359_vm0, %v1287_v37  ;;  %v1189_v7 = vpop.f32.mrf.mxu3 }
 0x185   :  { %v3721_v8 = vadd.f32 %v1189_v7, %v930_v3 }
 0x186   :  { %v822_v16 = vpop.f32.mrf.mxu0 }
 0x187   :  { %v1081_v22 = vpop.f32.mrf.mxu1  ;;  %4803 = vst [vmem:[#allocation36_spill] sm:$0xff] %v3721_v8  ;;  %v1331_v53 = vpack.c.bf16 %v3721_v8, %v3721_v8 }
 0x188   :  { %v3697_v30 = vadd.f32 %v1081_v22, %v822_v16  ;;  %v2296_v16 = vor.u32 %v2620_v51, %v2295_v39  ;;  %v2300_v22 = vor.u32 %v2619_v60, %v2297_v62  ;;  %v932_v3 = vpop.f32.mrf.mxu2  ;;  %v2471_v60 = vld [vmem:[%s4689_s0 + $0x2d0] sm:$0xf]  ;;  %v2663_v62 = vld [vmem:[%s4689_s0 + $0x2d4] sm:$0xf] }
 0x189   :  { %1432 = vst.msk [vmem:[%s4690_s2 + $0x120] sm:$0xf] %vm1359_vm0, %v1331_v53  ;;  %v2664_v53 = vld [vmem:[%s4689_s0 + $0x2d4] sm:$0xf0] }
 0x18a   :  { %v1288_v37 = vpack.c.bf16 %v3697_v30, %v3697_v30  ;;  %v2472_v7 = vor.u32 %v2664_v53, %v2471_v60  ;;  %v2303_v60 = vld [vmem:[%s4689_s0 + $0x180] sm:$0xf]  ;;  %v2622_v53 = vld [vmem:[%s4689_s0 + $0x184] sm:$0xf0] }
 0x18c   :  { %1389 = vst.msk [vmem:[%s4690_s2 + $0x74] sm:$0xf] %vm1359_vm0, %v1288_v37  ;;  %v1191_v39 = vpop.f32.mrf.mxu3  ;;  %974 = vmatmul.bf16.gmra.mxu2 %v2472_v7  ;;  %v2305_v7 = vld [vmem:[%s4689_s0 + $0x188] sm:$0xf0] }
 0x18d   :  { %v3737_v51 = vadd.f32 %v1191_v39, %v932_v3 }
 0x18e   :  { %v825_v23 = vpop.f32.mrf.mxu0 }
 0x18f   :  { %v1084_v25 = vpop.f32.mrf.mxu1  ;;  %4805 = vst [vmem:[#allocation38_spill] sm:$0xff] %v3737_v51 }
 0x190   :  { %v3725_v15 = vadd.f32 %v1084_v25, %v825_v23  ;;  %v1332_v25 = vpack.c.bf16 %v3737_v51, %v3737_v51 }
 0x191   :  { %864 = vmatmul.bf16.gmra.mxu0 %v2296_v16  ;;  %v2473_v16 = vld [vmem:[%s4689_s0 + $0x2d8] sm:$0xf0] }
 0x192   :  { %4804 = vst [vmem:[#allocation37_spill] sm:$0xff] %v3725_v15  ;;  %v1289_v37 = vpack.c.bf16 %v3725_v15, %v3725_v15  ;;  %1123 = vmatmul.bf16.gmra.mxu1 %v2300_v22 }
 0x193   :  { %1433 = vst.msk [vmem:[%s4690_s2 + $0x124] sm:$0xf] %vm1359_vm0, %v1332_v25  ;;  %v2304_v25 = vor.u32 %v2622_v53, %v2303_v60 }
 0x194   :  { %1390 = vst.msk [vmem:[%s4690_s2 + $0x78] sm:$0xf] %vm1359_vm0, %v1289_v37  ;;  %v2476_v37 = vor.u32 %v2663_v62, %v2473_v16  ;;  %v2621_v62 = vld [vmem:[%s4689_s0 + $0x184] sm:$0xf]  ;;  %v935_v16 = vpop.f32.mrf.mxu2 }
 0x196   :  { %v827_v22 = vpop.f32.mrf.mxu0  ;;  %1233 = vmatmul.bf16.gmra.mxu3 %v2476_v37  ;;  %v2308_v37 = vor.u32 %v2621_v62, %v2305_v7  ;;  %v2481_v7 = vld [vmem:[%s4689_s0 + $0x2e8] sm:$0xf0] }
 0x197   :  { %v1086_v23 = vpop.f32.mrf.mxu1 }
 0x198   :  { %v3753_v3 = vadd.f32 %v1086_v23, %v827_v22  ;;  %v1194_v22 = vpop.f32.mrf.mxu3 }
 0x199   :  { %v3777_v23 = vadd.f32 %v1194_v22, %v935_v16 }
 0x19a   :  { %4806 = vst [vmem:[#allocation39_spill] sm:$0xff] %v3753_v3  ;;  %v1290_v39 = vpack.c.bf16 %v3753_v3, %v3753_v3 }
 0x19b   :  { %4807 = vst [vmem:[#allocation40_spill] sm:$0xff] %v3777_v23  ;;  %v1333_v11 = vpack.c.bf16 %v3777_v23, %v3777_v23 }
 0x19c   :  { %1391 = vst.msk [vmem:[%s4690_s2 + $0x7c] sm:$0xf] %vm1359_vm0, %v1290_v39  ;;  %v937_v16 = vpop.f32.mrf.mxu2 }
 0x19d   :  { %1434 = vst.msk [vmem:[%s4690_s2 + $0x128] sm:$0xf] %vm1359_vm0, %v1333_v11  ;;  %v2666_v11 = vld [vmem:[%s4689_s0 + $0x2e4] sm:$0xf0] }
 0x19e   :  { %v830_v51 = vpop.f32.mrf.mxu0 }
 0x19f   :  { %v1089_v8 = vpop.f32.mrf.mxu1 }
 0x1a0   :  { %v3781_v42 = vadd.f32 %v1089_v8, %v830_v51  ;;  %v1196_v60 = vpop.f32.mrf.mxu3  ;;  %v2479_v8 = vld [vmem:[%s4689_s0 + $0x2e0] sm:$0xf]  ;;  %v2665_v51 = vld [vmem:[%s4689_s0 + $0x2e4] sm:$0xf] }
 0x1a1   :  { %869 = vmatmul.bf16.gmra.mxu0 %v2304_v25  ;;  %v3793_v53 = vadd.f32 %v1196_v60, %v937_v16  ;;  %v2480_v62 = vor.u32 %v2666_v11, %v2479_v8 }
 0x1a2   :  { %v1291_v39 = vpack.c.bf16 %v3781_v42, %v3781_v42  ;;  %1128 = vmatmul.bf16.gmra.mxu1 %v2308_v37 }
 0x1a3   :  { %4808 = vst [vmem:[#allocation41_spill] sm:$0xff] %v3793_v53  ;;  %v1334_v37 = vpack.c.bf16 %v3793_v53, %v3793_v53  ;;  %979 = vmatmul.bf16.gmra.mxu2 %v2480_v62 }
 0x1a4   :  { %1392 = vst.msk [vmem:[%s4690_s2 + $0x80] sm:$0xf] %vm1359_vm0, %v1291_v39  ;;  %v2484_v39 = vor.u32 %v2665_v51, %v2481_v7  ;;  %v940_v8 = vpop.f32.mrf.mxu2 }
 0x1a5   :  { %1435 = vst.msk [vmem:[%s4690_s2 + $0x12c] sm:$0xf] %vm1359_vm0, %v1334_v37 }
 0x1a6   :  { %v832_v22 = vpop.f32.mrf.mxu0  ;;  %1238 = vmatmul.bf16.gmra.mxu3 %v2484_v39 }
 0x1a7   :  { %v1091_v25 = vpop.f32.mrf.mxu1 }
 0x1a8   :  { %v3809_v16 = vadd.f32 %v1091_v25, %v832_v22  ;;  %v1199_v11 = vpop.f32.mrf.mxu3 }
 0x1a9   :  { %v3821_v51 = vadd.f32 %v1199_v11, %v940_v8  ;;  %v2487_v11 = vld [vmem:[%s4689_s0 + $0x2f0] sm:$0xf] }
 0x1aa   :  { %v1292_v60 = vpack.c.bf16 %v3809_v16, %v3809_v16 }
 0x1ab   :  { %4809 = vst [vmem:[#allocation42_spill] sm:$0xff] %v3821_v51  ;;  %v1335_v22 = vpack.c.bf16 %v3821_v51, %v3821_v51 }
 0x1ac   :  { %1393 = vst.msk [vmem:[%s4690_s2 + $0x84] sm:$0xf] %vm1359_vm0, %v1292_v60  ;;  %v942_v39 = vpop.f32.mrf.mxu2 }
 0x1ad   :  { %1436 = vst.msk [vmem:[%s4690_s2 + $0x130] sm:$0xf] %vm1359_vm0, %v1335_v22 }
 0x1ae   :  { %v835_v7 = vpop.f32.mrf.mxu0 }
 0x1af   :  { %v1094_v62 = vpop.f32.mrf.mxu1 }
 0x1b0   :  { %v3825_v25 = vadd.f32 %v1094_v62, %v835_v7  ;;  %v1201_v60 = vpop.f32.mrf.mxu3  ;;  %v2668_v7 = vld [vmem:[%s4689_s0 + $0x2f4] sm:$0xf0]  ;;  %v2667_v62 = vld [vmem:[%s4689_s0 + $0x2f4] sm:$0xf] }
 0x1b1   :  { %v3837_v8 = vadd.f32 %v1201_v60, %v942_v39  ;;  %v2488_v22 = vor.u32 %v2668_v7, %v2487_v11 }
 0x1b2   :  { %4810 = vst [vmem:[#allocation43_spill] sm:$0xff] %v3825_v25  ;;  %v1293_v37 = vpack.c.bf16 %v3825_v25, %v3825_v25 }
 0x1b3   :  { %4811 = vst [vmem:[#allocation44_spill] sm:$0xff] %v3837_v8  ;;  %v1336_v60 = vpack.c.bf16 %v3837_v8, %v3837_v8  ;;  %984 = vmatmul.bf16.gmra.mxu2 %v2488_v22 }
 0x1b4   :  { %1394 = vst.msk [vmem:[%s4690_s2 + $0x88] sm:$0xf] %vm1359_vm0, %v1293_v37  ;;  %v2489_v37 = vld [vmem:[%s4689_s0 + $0x2f8] sm:$0xf0]  ;;  %v945_v7 = vpop.f32.mrf.mxu2 }
 0x1b5   :  { %v2492_v53 = vor.u32 %v2667_v62, %v2489_v37  ;;  %1437 = vst.msk [vmem:[%s4690_s2 + $0x134] sm:$0xf] %vm1359_vm0, %v1336_v60 }
 0x1b6   :  { %v837_v51 = vpop.f32.mrf.mxu0 }
 0x1b7   :  { %v1096_v39 = vpop.f32.mrf.mxu1  ;;  %1243 = vmatmul.bf16.gmra.mxu3 %v2492_v53 }
 0x1b8   :  { %v3853_v23 = vadd.f32 %v1096_v39, %v837_v51  ;;  %v1204_v8 = vpop.f32.mrf.mxu3 }
 0x1b9   :  { %v3865_v62 = vadd.f32 %v1204_v8, %v945_v7  ;;  %v2495_v7 = vld [vmem:[%s4689_s0 + $0x300] sm:$0xf] }
 0x1ba   :  { %4812 = vst [vmem:[#allocation45_spill] sm:$0xff] %v3853_v23  ;;  %v1294_v11 = vpack.c.bf16 %v3853_v23, %v3853_v23 }
 0x1bb   :  { %4813 = vst [vmem:[#allocation46_spill] sm:$0xff] %v3865_v62  ;;  %v1337_v37 = vpack.c.bf16 %v3865_v62, %v3865_v62 }
 0x1bc   :  { %1395 = vst.msk [vmem:[%s4690_s2 + $0x8c] sm:$0xf] %vm1359_vm0, %v1294_v11  ;;  %v947_v60 = vpop.f32.mrf.mxu2 }
 0x1bd   :  { %1438 = vst.msk [vmem:[%s4690_s2 + $0x138] sm:$0xf] %vm1359_vm0, %v1337_v37 }
 0x1be   :  { %v840_v51 = vpop.f32.mrf.mxu0 }
 0x1bf   :  { %v1099_v22 = vpop.f32.mrf.mxu1 }
 0x1c0   :  { %v3869_v39 = vadd.f32 %v1099_v22, %v840_v51  ;;  %v1206_v8 = vpop.f32.mrf.mxu3  ;;  %v2670_v51 = vld [vmem:[%s4689_s0 + $0x304] sm:$0xf0]  ;;  %v2669_v22 = vld [vmem:[%s4689_s0 + $0x304] sm:$0xf] }
 0x1c1   :  { %v3881_v11 = vadd.f32 %v1206_v8, %v947_v60  ;;  %v2496_v37 = vor.u32 %v2670_v51, %v2495_v7  ;;  %v1466_v7 = vsel %vm1465_vm1, %v2945_v38, 0.0  ;;  %v1469_v51 = vsel %vm1465_vm1, %v2985_v58, 0.0 }
 0x1c2   :  { %v1295_v53 = vpack.c.bf16 %v3869_v39, %v3869_v39 }
 0x1c3   :  { %4814 = vst [vmem:[#allocation47_spill] sm:$0xff] %v3881_v11  ;;  %v1338_v62 = vpack.c.bf16 %v3881_v11, %v3881_v11  ;;  %989 = vmatmul.bf16.gmra.mxu2 %v2496_v37  ;;  %v1471_v37 = vsel %vm1465_vm1, %v3005_v4, 0.0 }
 0x1c4   :  { %1396 = vst.msk [vmem:[%s4690_s2 + $0x90] sm:$0xf] %vm1359_vm0, %v1295_v53  ;;  %v2497_v53 = vld [vmem:[%s4689_s0 + $0x308] sm:$0xf0]  ;;  %v950_v48 = vpop.f32.mrf.mxu2 }
 0x1c5   :  { %v2500_v57 = vor.u32 %v2669_v22, %v2497_v53  ;;  %1439 = vst.msk [vmem:[%s4690_s2 + $0x13c] sm:$0xf] %vm1359_vm0, %v1338_v62  ;;  %v1468_v53 = vadd.f32 %v1467_v29, %v1466_v7  ;;  %v1475_v7 = vsel %vm1465_vm1, %v3045_v24, 0.0 }
 0x1c6   :  { %v842_v60 = vpop.f32.mrf.mxu0 }
 0x1c7   :  { %v1101_v8 = vpop.f32.mrf.mxu1  ;;  %1248 = vmatmul.bf16.gmra.mxu3 %v2500_v57  ;;  %v1470_v62 = vadd.f32 %v1469_v51, %v1468_v53 }
 0x1c8   :  { %v3899_v50 = vadd.f32 %v1101_v8, %v842_v60  ;;  %v1209_v57 = vpop.f32.mrf.mxu3  ;;  %v1473_v8 = vsel %vm1465_vm1, %v3025_v14, 0.0 }
 0x1c9   :  { %v3917_v60 = vadd.f32 %v1209_v57, %v950_v48  ;;  %v1472_v58 = vadd.f32 %v1471_v37, %v1470_v62  ;;  %v1477_v48 = vsel %vm1465_vm1, %v3065_v34, 0.0  ;;  %v1479_v37 = vsel %vm1465_vm1, %v3085_v45, 0.0  ;;  %v2503_v57 = vld [vmem:[%s4689_s0 + $0x310] sm:$0xf]  ;;  %v2671_v62 = vld [vmem:[%s4689_s0 + $0x314] sm:$0xf] }
 0x1ca   :  { %v1296_v22 = vpack.c.bf16 %v3899_v50, %v3899_v50  ;;  %v1483_v45 = vsel %vm1465_vm1, %v3137_v12, 0.0 }
 0x1cb   :  { %v1339_v29 = vpack.c.bf16 %v3917_v60, %v3917_v60  ;;  %v1474_v26 = vadd.f32 %v1473_v8, %v1472_v58  ;;  %v1481_v8 = vsel %vm1465_vm1, %v3109_v61, 0.0 }
 0x1cc   :  { %1397 = vst.msk [vmem:[%s4690_s2 + $0x94] sm:$0xf] %vm1359_vm0, %v1296_v22  ;;  %v952_v53 = vpop.f32.mrf.mxu2 }
 0x1cd   :  { %1440 = vst.msk [vmem:[%s4690_s2 + $0x140] sm:$0xf] %vm1359_vm0, %v1339_v29  ;;  %v1476_v22 = vadd.f32 %v1475_v7, %v1474_v26  ;;  %v2672_v26 = vld [vmem:[%s4689_s0 + $0x314] sm:$0xf0]  ;;  %v2505_v7 = vld [vmem:[%s4689_s0 + $0x318] sm:$0xf0] }
 0x1ce   :  { %v845_v38 = vpop.f32.mrf.mxu0  ;;  %v2504_v29 = vor.u32 %v2672_v26, %v2503_v57 }
 0x1cf   :  { %v1104_v11 = vpop.f32.mrf.mxu1  ;;  %v1478_v58 = vadd.f32 %v1477_v48, %v1476_v22 }
 0x1d0   :  { %v3925_v4 = vadd.f32 %v1104_v11, %v845_v38  ;;  %v1211_v38 = vpop.f32.mrf.mxu3 }
 0x1d1   :  { %v3941_v11 = vadd.f32 %v1211_v38, %v952_v53  ;;  %v1480_v48 = vadd.f32 %v1479_v37, %v1478_v58  ;;  %v2508_v38 = vor.u32 %v2671_v62, %v2505_v7  ;;  %v1485_v37 = vsel %vm1465_vm1, %v3165_v28, 0.0 }
 0x1d2   :  { %4815 = vst [vmem:[#allocation48_spill] sm:$0xff] %v3925_v4  ;;  %v1297_v51 = vpack.c.bf16 %v3925_v4, %v3925_v4  ;;  %v1487_v62 = vsel %vm1465_vm1, %v3193_v44, 0.0 }
 0x1d3   :  { %v1340_v53 = vpack.c.bf16 %v3941_v11, %v3941_v11  ;;  %994 = vmatmul.bf16.gmra.mxu2 %v2504_v29  ;;  %v1482_v24 = vadd.f32 %v1481_v8, %v1480_v48  ;;  %v1489_v48 = vsel %vm1465_vm1, %v3221_v63, 0.0 }
 0x1d4   :  { %1398 = vst.msk [vmem:[%s4690_s2 + $0x98] sm:$0xf] %vm1359_vm0, %v1297_v51  ;;  %v955_v26 = vpop.f32.mrf.mxu2 }
 0x1d5   :  { %1441 = vst.msk [vmem:[%s4690_s2 + $0x144] sm:$0xf] %vm1359_vm0, %v1340_v53  ;;  %v1484_v57 = vadd.f32 %v1483_v45, %v1482_v24  ;;  %v1491_v45 = vsel %vm1465_vm1, %v3249_v17, 0.0 }
 0x1d6   :  { %v847_v51 = vpop.f32.mrf.mxu0 }
 0x1d7   :  { %v1106_v22 = vpop.f32.mrf.mxu1  ;;  %1253 = vmatmul.bf16.gmra.mxu3 %v2508_v38  ;;  %v1486_v29 = vadd.f32 %v1485_v37, %v1484_v57  ;;  %v1493_v37 = vsel %vm1465_vm1, %v3277_v36, 0.0 }
 0x1d8   :  { %v3961_v34 = vadd.f32 %v1106_v22, %v847_v51  ;;  %v1214_v8 = vpop.f32.mrf.mxu3 }
 0x1d9   :  { %v3977_v7 = vadd.f32 %v1214_v8, %v955_v26  ;;  %v1488_v51 = vadd.f32 %v1487_v62, %v1486_v29  ;;  %v1495_v62 = vsel %vm1465_vm1, %v3305_v56, 0.0 }
 0x1da   :  { %4816 = vst [vmem:[#allocation49_spill] sm:$0xff] %v3961_v34  ;;  %v1298_v58 = vpack.c.bf16 %v3961_v34, %v3961_v34 }
 0x1db   :  { %v1341_v24 = vpack.c.bf16 %v3977_v7, %v3977_v7  ;;  %v1490_v44 = vadd.f32 %v1489_v48, %v1488_v51  ;;  %v1497_v51 = vsel %vm1465_vm1, %v3333_v13, 0.0 }
 0x1dc   :  { %1399 = vst.msk [vmem:[%s4690_s2 + $0x9c] sm:$0xf] %vm1359_vm0, %v1298_v58  ;;  %v957_v26 = vpop.f32.mrf.mxu2 }
 0x1dd   :  { %1442 = vst.msk [vmem:[%s4690_s2 + $0x148] sm:$0xf] %vm1359_vm0, %v1341_v24  ;;  %v1492_v57 = vadd.f32 %v1491_v45, %v1490_v44  ;;  %v1499_v45 = vsel %vm1465_vm1, %v3361_v35, 0.0 }
 0x1de   :  { %v850_v22 = vpop.f32.mrf.mxu0 }
 0x1df   :  { %v1109_v53 = vpop.f32.mrf.mxu1  ;;  %v1494_v29 = vadd.f32 %v1493_v37, %v1492_v57  ;;  %v1501_v37 = vsel %vm1465_vm1, %v3389_v59, 0.0 }
 0x1e0   :  { %v3985_v38 = vadd.f32 %v1109_v53, %v850_v22  ;;  %v1216_v8 = vpop.f32.mrf.mxu3 }
 0x1e1   :  { %v4001_v48 = vadd.f32 %v1216_v8, %v957_v26  ;;  %v1496_v22 = vadd.f32 %v1495_v62, %v1494_v29  ;;  %v1503_v62 = vsel %vm1465_vm1, %v3417_v20, 0.0 }
 0x1e2   :  { %v1299_v58 = vpack.c.bf16 %v3985_v38, %v3985_v38 }
 0x1e3   :  { %v1342_v44 = vpack.c.bf16 %v4001_v48, %v4001_v48  ;;  %v1498_v36 = vadd.f32 %v1497_v51, %v1496_v22  ;;  %v1505_v22 = vsel %vm1465_vm1, %v3445_v46, 0.0 }
 0x1e4   :  { %1400 = vst.msk [vmem:[%s4690_s2 + $0xa0] sm:$0xf] %vm1359_vm0, %v1299_v58  ;;  %v960_v26 = vpop.f32.mrf.mxu2 }
 0x1e5   :  { %1443 = vst.msk [vmem:[%s4690_s2 + $0x14c] sm:$0xf] %vm1359_vm0, %v1342_v44  ;;  %v1500_v57 = vadd.f32 %v1499_v45, %v1498_v36  ;;  %v1507_v45 = vsel %vm1465_vm1, %v3473_v10, 0.0 }
 0x1e6   :  { %v852_v53 = vpop.f32.mrf.mxu0 }
 0x1e7   :  { %v1111_v24 = vpop.f32.mrf.mxu1  ;;  %v1502_v29 = vadd.f32 %v1501_v37, %v1500_v57  ;;  %v1509_v37 = vsel %vm1465_vm1, %v3501_v40, 0.0 }
 0x1e8   :  { %v4009_v56 = vadd.f32 %v1111_v24, %v852_v53  ;;  %v1219_v8 = vpop.f32.mrf.mxu3 }
 0x1e9   :  { %v4025_v51 = vadd.f32 %v1219_v8, %v960_v26  ;;  %v1504_v53 = vadd.f32 %v1503_v62, %v1502_v29  ;;  %v1511_v62 = vsel %vm1465_vm1, %v3529_v9, 0.0 }
 0x1ea   :  { %v1300_v58 = vpack.c.bf16 %v4009_v56, %v4009_v56 }
 0x1eb   :  { %v1343_v36 = vpack.c.bf16 %v4025_v51, %v4025_v51  ;;  %v1506_v59 = vadd.f32 %v1505_v22, %v1504_v53  ;;  %v1513_v53 = vsel %vm1465_vm1, %v3557_v43, 0.0 }
 0x1ec   :  { %1401 = vst.msk [vmem:[%s4690_s2 + $0xa4] sm:$0xf] %vm1359_vm0, %v1300_v58  ;;  %v962_v26 = vpop.f32.mrf.mxu2 }
 0x1ed   :  { %1444 = vst.msk [vmem:[%s4690_s2 + $0x150] sm:$0xf] %vm1359_vm0, %v1343_v36  ;;  %v1508_v57 = vadd.f32 %v1507_v45, %v1506_v59  ;;  %v1515_v45 = vsel %vm1465_vm1, %v3585_v18, 0.0 }
 0x1ee   :  { %v855_v24 = vpop.f32.mrf.mxu0 }
 0x1ef   :  { %v1114_v44 = vpop.f32.mrf.mxu1  ;;  %v1510_v29 = vadd.f32 %v1509_v37, %v1508_v57  ;;  %v1517_v37 = vsel %vm1465_vm1, %v3613_v0, 0.0 }
 0x1f0   :  { %v4033_v20 = vadd.f32 %v1114_v44, %v855_v24  ;;  %v1221_v8 = vpop.f32.mrf.mxu3 }
 0x1f1   :  { %v4049_v22 = vadd.f32 %v1221_v8, %v962_v26  ;;  %v1512_v24 = vadd.f32 %v1511_v62, %v1510_v29  ;;  %v1519_v62 = vsel %vm1465_vm1, %v3641_v47, 0.0 }
 0x1f2   :  { %4817 = vst [vmem:[#allocation50_spill] sm:$0xff] %v4033_v20  ;;  %v1301_v58 = vpack.c.bf16 %v4033_v20, %v4033_v20 }
 0x1f3   :  { %v1344_v59 = vpack.c.bf16 %v4049_v22, %v4049_v22  ;;  %v1514_v40 = vadd.f32 %v1513_v53, %v1512_v24  ;;  %v1521_v24 = vsel %vm1465_vm1, %v3669_v31, 0.0 }
 0x1f4   :  { %1402 = vst.msk [vmem:[%s4690_s2 + $0xa8] sm:$0xf] %vm1359_vm0, %v1301_v58  ;;  %v965_v26 = vpop.f32.mrf.mxu2 }
 0x1f5   :  { %1445 = vst.msk [vmem:[%s4690_s2 + $0x154] sm:$0xf] %vm1359_vm0, %v1344_v59  ;;  %v1516_v57 = vadd.f32 %v1515_v45, %v1514_v40  ;;  %v1523_v45 = vsel %vm1465_vm1, %v3697_v30, 0.0 }
 0x1f6   :  { %v857_v44 = vpop.f32.mrf.mxu0 }
 0x1f7   :  { %v1116_v36 = vpop.f32.mrf.mxu1  ;;  %v1518_v29 = vadd.f32 %v1517_v37, %v1516_v57  ;;  %v1525_v37 = vsel %vm1465_vm1, %v3725_v15, 0.0 }
 0x1f8   :  { %v4057_v9 = vadd.f32 %v1116_v36, %v857_v44  ;;  %v1224_v8 = vpop.f32.mrf.mxu3 }
 0x1f9   :  { %v4073_v53 = vadd.f32 %v1224_v8, %v965_v26  ;;  %v1520_v44 = vadd.f32 %v1519_v62, %v1518_v29  ;;  %v1527_v62 = vsel %vm1465_vm1, %v3753_v3, 0.0 }
 0x1fa   :  { %4818 = vst [vmem:[#allocation51_spill] sm:$0xff] %v4057_v9  ;;  %v1302_v58 = vpack.c.bf16 %v4057_v9, %v4057_v9 }
 0x1fb   :  { %v1345_v40 = vpack.c.bf16 %v4073_v53, %v4073_v53  ;;  %v1522_v0 = vadd.f32 %v1521_v24, %v1520_v44  ;;  %v1529_v44 = vsel %vm1465_vm1, %v3781_v42, 0.0 }
 0x1fc   :  { %1403 = vst.msk [vmem:[%s4690_s2 + $0xac] sm:$0xf] %vm1359_vm0, %v1302_v58  ;;  %v967_v26 = vpop.f32.mrf.mxu2 }
 0x1fd   :  { %1446 = vst.msk [vmem:[%s4690_s2 + $0x158] sm:$0xf] %vm1359_vm0, %v1345_v40  ;;  %v1524_v57 = vadd.f32 %v1523_v45, %v1522_v0  ;;  %v1531_v45 = vsel %vm1465_vm1, %v3809_v16, 0.0 }
 0x1fe   :  { %v860_v36 = vpop.f32.mrf.mxu0 }
 0x1ff   :  { %v1119_v59 = vpop.f32.mrf.mxu1  ;;  %v1526_v29 = vadd.f32 %v1525_v37, %v1524_v57  ;;  %v1533_v37 = vsel %vm1465_vm1, %v3825_v25, 0.0 }
 0x200   :  { %v4081_v47 = vadd.f32 %v1119_v59, %v860_v36  ;;  %v1226_v8 = vpop.f32.mrf.mxu3 }
 0x201   :  { %v4097_v24 = vadd.f32 %v1226_v8, %v967_v26  ;;  %v1528_v36 = vadd.f32 %v1527_v62, %v1526_v29  ;;  %v1535_v62 = vsel %vm1465_vm1, %v3853_v23, 0.0  ;;  %v1541_v23 = vsel %vm1465_vm1, %v3925_v4, 0.0 }
 0x202   :  { %v1303_v58 = vpack.c.bf16 %v4081_v47, %v4081_v47 }
 0x203   :  { %v1346_v0 = vpack.c.bf16 %v4097_v24, %v4097_v24  ;;  %v1530_v15 = vadd.f32 %v1529_v44, %v1528_v36  ;;  %v1537_v44 = vsel %vm1465_vm1, %v3869_v39, 0.0 }
 0x204   :  { %1404 = vst.msk [vmem:[%s4690_s2 + $0xb0] sm:$0xf] %vm1359_vm0, %v1303_v58  ;;  %v970_v26 = vpop.f32.mrf.mxu2 }
 0x205   :  { %1447 = vst.msk [vmem:[%s4690_s2 + $0x15c] sm:$0xf] %vm1359_vm0, %v1346_v0  ;;  %v1532_v57 = vadd.f32 %v1531_v45, %v1530_v15  ;;  %v1539_v15 = vsel %vm1465_vm1, %v3899_v50, 0.0 }
 0x206   :  { %v862_v59 = vpop.f32.mrf.mxu0 }
 0x207   :  { %v1121_v40 = vpop.f32.mrf.mxu1  ;;  %v1534_v29 = vadd.f32 %v1533_v37, %v1532_v57  ;;  %v1543_v57 = vsel %vm1465_vm1, %v3961_v34, 0.0 }
 0x208   :  { %v4105_v3 = vadd.f32 %v1121_v40, %v862_v59  ;;  %v1229_v8 = vpop.f32.mrf.mxu3 }
 0x209   :  { %v1536_v36 = vadd.f32 %v1535_v62, %v1534_v29  ;;  %v4137_v62 = vadd.f32 %v1229_v8, %v970_v26  ;;  %v1547_v26 = vsel %vm1465_vm1, %v4009_v56, 0.0 }
 0x20a   :  { %4819 = vst [vmem:[#allocation52_spill] sm:$0xff] %v4105_v3  ;;  %v1304_v58 = vpack.c.bf16 %v4105_v3, %v4105_v3 }
 0x20b   :  { %v1538_v45 = vadd.f32 %v1537_v44, %v1536_v36 }
 0x20c   :  { %1405 = vst.msk [vmem:[%s4690_s2 + $0xb4] sm:$0xf] %vm1359_vm0, %v1304_v58  ;;  %v972_v37 = vpop.f32.mrf.mxu2 }
 0x20d   :  { %v1540_v25 = vadd.f32 %v1539_v15, %v1538_v45 }
 0x20e   :  { %v865_v59 = vpop.f32.mrf.mxu0 }
 0x20f   :  { %v1124_v40 = vpop.f32.mrf.mxu1  ;;  %v1542_v44 = vadd.f32 %v1541_v23, %v1540_v25  ;;  %v1549_v25 = vsel %vm1465_vm1, %v4033_v20, 0.0 }
 0x210   :  { %v4125_v0 = vadd.f32 %v1124_v40, %v865_v59  ;;  %v1231_v29 = vpop.f32.mrf.mxu3  ;;  %v1545_v59 = vsel %vm1465_vm1, %v3985_v38, 0.0  ;;  %v1347_v40 = vpack.c.bf16 %v4137_v62, %v4137_v62 }
 0x211   :  { %v4139_v36 = vadd.f32 %v1231_v29, %v972_v37  ;;  %v1544_v15 = vadd.f32 %v1543_v57, %v1542_v44  ;;  %v1551_v57 = vsel %vm1465_vm1, %v4057_v9, 0.0 }
 0x212   :  { %4820 = vst [vmem:[#allocation53_spill] sm:$0xff] %v4125_v0  ;;  %v1305_v58 = vpack.c.bf16 %v4125_v0, %v4125_v0  ;;  %v1557_v9 = vsel %vm1465_vm1, %v4125_v0, 0.0 }
 0x213   :  { %v1348_v4 = vpack.c.bf16 %v4139_v36, %v4139_v36  ;;  %1448 = vst.msk [vmem:[%s4690_s2 + $0x160] sm:$0xf] %vm1359_vm0, %v1347_v40  ;;  %v1546_v23 = vadd.f32 %v1545_v59, %v1544_v15 }
 0x214   :  { %1406 = vst.msk [vmem:[%s4690_s2 + $0xb8] sm:$0xf] %vm1359_vm0, %v1305_v58 }
 0x215   :  { %1449 = vst.msk [vmem:[%s4690_s2 + $0x164] sm:$0xf] %vm1359_vm0, %v1348_v4  ;;  %v1548_v37 = vadd.f32 %v1547_v26, %v1546_v23  ;;  %v1553_v4 = vsel %vm1465_vm1, %v4081_v47, 0.0 }
 0x216   :  { %v867_v45 = vpop.f32.mrf.mxu0 }
 0x217   :  { %v1126_v34 = vpop.f32.mrf.mxu1  ;;  %v1550_v44 = vadd.f32 %v1549_v25, %v1548_v37 }
 0x218   :  { %v4149_v8 = vadd.f32 %v1126_v34, %v867_v45  ;;  %v975_v34 = vpop.f32.mrf.mxu2  ;;  %v1555_v45 = vsel %vm1465_vm1, %v4105_v3, 0.0 }
 0x219   :  { %v1234_v29 = vpop.f32.mrf.mxu3  ;;  %v1552_v59 = vadd.f32 %v1551_v57, %v1550_v44 }
 0x21a   :  { %4821 = vst [vmem:[#allocation54_spill] sm:$0xff] %v4149_v8  ;;  %v1306_v58 = vpack.c.bf16 %v4149_v8, %v4149_v8  ;;  %v1559_v37 = vsel %vm1465_vm1, %v4149_v8, 0.0  ;;  %v4185_v57 = vadd.f32 %v1234_v29, %v975_v34 }
 0x21b   :  { %v1554_v23 = vadd.f32 %v1553_v4, %v1552_v59 }
 0x21c   :  { %1407 = vst.msk [vmem:[%s4690_s2 + $0xbc] sm:$0xf] %vm1359_vm0, %v1306_v58 }
 0x21d   :  { %v1556_v20 = vadd.f32 %v1555_v45, %v1554_v23 }
 0x21e   :  { %v870_v40 = vpop.f32.mrf.mxu0 }
 0x21f   :  { %v1129_v15 = vpop.f32.mrf.mxu1  ;;  %v1558_v4 = vadd.f32 %v1557_v9, %v1556_v20 }
 0x220   :  { %v4173_v26 = vadd.f32 %v1129_v15, %v870_v40  ;;  %v977_v25 = vpop.f32.mrf.mxu2  ;;  %v1349_v15 = vpack.c.bf16 %v4185_v57, %v4185_v57 }
 0x221   :  { %v1236_v44 = vpop.f32.mrf.mxu3  ;;  %v1560_v45 = vadd.f32 %v1559_v37, %v1558_v4  ;;  %v1569_v4 = vsel %vm1465_vm1, %v3161_v21, 0.0 }
 0x222   :  { %v1307_v58 = vpack.c.bf16 %v4173_v26, %v4173_v26  ;;  %v4187_v59 = vadd.f32 %v1236_v44, %v977_v25  ;;  %v1561_v40 = vsel %vm1465_vm1, %v4173_v26, 0.0  ;;  %1450 = vst.msk [vmem:[%s4690_s2 + $0x168] sm:$0xf] %vm1359_vm0, %v1349_v15  ;;  %v1571_v15 = vsel %vm1465_vm1, %v3177_v32, 0.0 }
 0x223   :  { %v1562_v20 = vadd.f32 %v1561_v40, %v1560_v45 }
 0x224   :  { %1408 = vst.msk [vmem:[%s4690_s2 + $0xc0] sm:$0xf] %vm1359_vm0, %v1307_v58  ;;  %v1350_v0 = vpack.c.bf16 %v4187_v59, %v4187_v59  ;;  %v1565_v58 = vsel %vm1465_vm1, %v3105_v54, 0.0 }
 0x226   :  { %v872_v23 = vpop.f32.mrf.mxu0  ;;  %1451 = vst.msk [vmem:[%s4690_s2 + $0x16c] sm:$0xf] %vm1359_vm0, %v1350_v0  ;;  %v1567_v0 = vsel %vm1465_vm1, %v3121_v1, 0.0 }
 0x227   :  { %v1131_v8 = vpop.f32.mrf.mxu1 }
 0x228   :  { %v4195_v3 = vadd.f32 %v1131_v8, %v872_v23  ;;  %v980_v8 = vpop.f32.mrf.mxu2 }
 0x229   :  { %v1239_v25 = vpop.f32.mrf.mxu3 }
 0x22a   :  { %v1308_v9 = vpack.c.bf16 %v4195_v3, %v4195_v3  ;;  %v1563_v34 = vsel %vm1465_vm1, %v4195_v3, 0.0 }
 0x22b   :  { %v1564_v29 = vadd.f32 %v1563_v34, %v1562_v20  ;;  %v1573_v20 = vsel %vm1465_vm1, %v3217_v55, 0.0  ;;  %v4223_v34 = vadd.f32 %v1239_v25, %v980_v8  ;;  %v1579_v25 = vsel %vm1465_vm1, %v3289_v41, 0.0 }
 0x22c   :  { %1409 = vst.msk [vmem:[%s4690_s2 + $0xc4] sm:$0xf] %vm1359_vm0, %v1308_v9 }
 0x22d   :  { %v1566_v37 = vadd.f32 %v1565_v58, %v1564_v29 }
 0x22f   :  { %v1568_v44 = vadd.f32 %v1567_v0, %v1566_v37  ;;  %v1575_v37 = vsel %vm1465_vm1, %v3233_v5, 0.0  ;;  %v1351_v0 = vpack.c.bf16 %v4223_v34, %v4223_v34 }
 0x230   :  { %v982_v23 = vpop.f32.mrf.mxu2 }
 0x231   :  { %v1570_v40 = vadd.f32 %v1569_v4, %v1568_v44  ;;  %v1241_v9 = vpop.f32.mrf.mxu3  ;;  %1452 = vst.msk [vmem:[%s4690_s2 + $0x170] sm:$0xf] %vm1359_vm0, %v1351_v0  ;;  %v1585_v0 = vsel %vm1465_vm1, %v3385_v49, 0.0  ;;  %v4830_v49 = vld [vmem:[#allocation32_spill] sm:$0xff] }
 0x232   :  { %v4225_v58 = vadd.f32 %v1241_v9, %v982_v23  ;;  %v1581_v23 = vsel %vm1465_vm1, %v3329_v6, 0.0 }
 0x233   :  { %v1572_v45 = vadd.f32 %v1571_v15, %v1570_v40  ;;  %v1577_v40 = vsel %vm1465_vm1, %v3273_v27, 0.0 }
 0x234   :  { %4822 = vst [vmem:[#allocation55_spill] sm:$0xff] %v4225_v58  ;;  %v1352_v4 = vpack.c.bf16 %v4225_v58, %v4225_v58 }
 0x235   :  { %v1574_v29 = vadd.f32 %v1573_v20, %v1572_v45 }
 0x236   :  { %1453 = vst.msk [vmem:[%s4690_s2 + $0x174] sm:$0xf] %vm1359_vm0, %v1352_v4  ;;  %v1587_v4 = vsel %vm1465_vm1, %v3401_v2, 0.0 }
 0x237   :  { %v1576_v44 = vadd.f32 %v1575_v37, %v1574_v29  ;;  %v1583_v29 = vsel %vm1465_vm1, %v3345_v19, 0.0 }
 0x238   :  { %v985_v45 = vpop.f32.mrf.mxu2 }
 0x239   :  { %v1578_v8 = vadd.f32 %v1577_v40, %v1576_v44 }
 0x23a   :  { %v1244_v20 = vpop.f32.mrf.mxu3 }
 0x23b   :  { %v1580_v15 = vadd.f32 %v1579_v25, %v1578_v8  ;;  %v1589_v8 = vsel %vm1465_vm1, %v3441_v33, 0.0  ;;  %v4255_v25 = vadd.f32 %v1244_v20, %v985_v45 }
 0x23d   :  { %v1582_v9 = vadd.f32 %v1581_v23, %v1580_v15  ;;  %4823 = vst [vmem:[#allocation56_spill] sm:$0xff] %v4255_v25 }
 0x23f   :  { %v1584_v37 = vadd.f32 %v1583_v29, %v1582_v9  ;;  %v1591_v9 = vsel %vm1465_vm1, %v3457_v52, 0.0  ;;  %v1353_v29 = vpack.c.bf16 %v4255_v25, %v4255_v25  ;;  %v4828_v52 = vld [vmem:[#allocation29_spill] sm:$0xff] }
 0x240   :  { %v987_v41 = vpop.f32.mrf.mxu2  ;;  %v1599_v33 = vsel %vm1465_vm1, %v4828_v52, 0.0  ;;  %v4834_v52 = vld [vmem:[#allocation35_spill] sm:$0xff] }
 0x241   :  { %v1586_v44 = vadd.f32 %v1585_v0, %v1584_v37  ;;  %1454 = vst.msk [vmem:[%s4690_s2 + $0x178] sm:$0xf] %vm1359_vm0, %v1353_v29 }
 0x242   :  { %v1246_v6 = vpop.f32.mrf.mxu3 }
 0x243   :  { %v1588_v40 = vadd.f32 %v1587_v4, %v1586_v44  ;;  %v4257_v23 = vadd.f32 %v1246_v6, %v987_v41  ;;  %v4825_v44 = vld [vmem:[#allocation24_spill] sm:$0xff]  ;;  %v4826_v6 = vld [vmem:[#allocation26_spill] sm:$0xff] }
 0x244   :  { %v1593_v4 = vsel %vm1465_vm1, %v4825_v44, 0.0  ;;  %v1595_v45 = vsel %vm1465_vm1, %v4826_v6, 0.0 }
 0x245   :  { %v1590_v15 = vadd.f32 %v1589_v8, %v1588_v40  ;;  %4824 = vst [vmem:[#allocation57_spill] sm:$0xff] %v4257_v23  ;;  %v1354_v0 = vpack.c.bf16 %v4257_v23, %v4257_v23  ;;  %v4827_v8 = vld [vmem:[#allocation28_spill] sm:$0xff] }
 0x247   :  { %v1592_v37 = vadd.f32 %v1591_v9, %v1590_v15  ;;  %1455 = vst.msk [vmem:[%s4690_s2 + $0x17c] sm:$0xf] %vm1359_vm0, %v1354_v0  ;;  %v1597_v15 = vsel %vm1465_vm1, %v4827_v8, 0.0  ;;  %v1603_v0 = vsel %vm1465_vm1, %v4830_v49, 0.0 }
 0x248   :  { %v990_v40 = vpop.f32.mrf.mxu2 }
 0x249   :  { %v1594_v41 = vadd.f32 %v1593_v4, %v1592_v37  ;;  %v4829_v37 = vld [vmem:[#allocation30_spill] sm:$0xff] }
 0x24a   :  { %v1249_v9 = vpop.f32.mrf.mxu3  ;;  %v1601_v4 = vsel %vm1465_vm1, %v4829_v37, 0.0  ;;  %v4840_v37 = vld [vmem:[#allocation44_spill] sm:$0xff] }
 0x24b   :  { %v1596_v20 = vadd.f32 %v1595_v45, %v1594_v41  ;;  %v4831_v41 = vld [vmem:[#allocation34_spill] sm:$0xff]  ;;  %v4287_v27 = vadd.f32 %v1249_v9, %v990_v40 }
 0x24c   :  { %v1605_v45 = vsel %vm1465_vm1, %v4831_v41, 0.0 }
 0x24d   :  { %v1598_v44 = vadd.f32 %v1597_v15, %v1596_v20  ;;  %4832 = vst [vmem:[#allocation58_spill] sm:$0xff] %v4287_v27 }
 0x24f   :  { %v1600_v29 = vadd.f32 %v1599_v33, %v1598_v44  ;;  %v1607_v33 = vsel %vm1465_vm1, %v4834_v52, 0.0  ;;  %v1355_v44 = vpack.c.bf16 %v4287_v27, %v4287_v27  ;;  %v4838_v52 = vld [vmem:[#allocation41_spill] sm:$0xff] }
 0x250   :  { %v992_v6 = vpop.f32.mrf.mxu2  ;;  %v1615_v41 = vsel %vm1465_vm1, %v4838_v52, 0.0  ;;  %v4844_v52 = vld [vmem:[#allocation47_spill] sm:$0xff] }
 0x251   :  { %v1602_v2 = vadd.f32 %v1601_v4, %v1600_v29  ;;  %v4835_v4 = vld [vmem:[#allocation36_spill] sm:$0xff]  ;;  %1456 = vst.msk [vmem:[%s4690_s2 + $0x180] sm:$0xf] %vm1359_vm0, %v1355_v44 }
 0x252   :  { %v1251_v8 = vpop.f32.mrf.mxu3 }
 0x253   :  { %v1604_v19 = vadd.f32 %v1603_v0, %v1602_v2  ;;  %v4289_v15 = vadd.f32 %v1251_v8, %v992_v6  ;;  %v1609_v0 = vsel %vm1465_vm1, %v4835_v4, 0.0  ;;  %v4836_v6 = vld [vmem:[#allocation38_spill] sm:$0xff] }
 0x254   :  { %v1611_v40 = vsel %vm1465_vm1, %v4836_v6, 0.0 }
 0x255   :  { %v1606_v20 = vadd.f32 %v1605_v45, %v1604_v19  ;;  %4833 = vst [vmem:[#allocation59_spill] sm:$0xff] %v4289_v15  ;;  %v1356_v2 = vpack.c.bf16 %v4289_v15, %v4289_v15  ;;  %v4837_v45 = vld [vmem:[#allocation40_spill] sm:$0xff] }
 0x257   :  { %v1608_v29 = vadd.f32 %v1607_v33, %v1606_v20  ;;  %1457 = vst.msk [vmem:[%s4690_s2 + $0x184] sm:$0xf] %vm1359_vm0, %v1356_v2  ;;  %v1613_v20 = vsel %vm1465_vm1, %v4837_v45, 0.0  ;;  %v1619_v2 = vsel %vm1465_vm1, %v4840_v37, 0.0 }
 0x258   :  { %v995_v9 = vpop.f32.mrf.mxu2 }
 0x259   :  { %v1610_v19 = vadd.f32 %v1609_v0, %v1608_v29  ;;  %v4839_v29 = vld [vmem:[#allocation42_spill] sm:$0xff] }
 0x25a   :  { %v1254_v33 = vpop.f32.mrf.mxu3  ;;  %v1617_v0 = vsel %vm1465_vm1, %v4839_v29, 0.0 }
 0x25b   :  { %v1612_v8 = vadd.f32 %v1611_v40, %v1610_v19  ;;  %v4841_v19 = vld [vmem:[#allocation46_spill] sm:$0xff]  ;;  %v4319_v55 = vadd.f32 %v1254_v33, %v995_v9 }
 0x25c   :  { %v1621_v40 = vsel %vm1465_vm1, %v4841_v19, 0.0 }
 0x25d   :  { %v1614_v4 = vadd.f32 %v1613_v20, %v1612_v8  ;;  %4842 = vst [vmem:[#allocation42_spill] sm:$0xff] %v4319_v55 }
 0x25f   :  { %v1616_v44 = vadd.f32 %v1615_v41, %v1614_v4  ;;  %v1623_v41 = vsel %vm1465_vm1, %v4844_v52, 0.0  ;;  %v1357_v4 = vpack.c.bf16 %v4319_v55, %v4319_v55 }
 0x260   :  { %v997_v6 = vpop.f32.mrf.mxu2 }
 0x261   :  { %v1618_v49 = vadd.f32 %v1617_v0, %v1616_v44  ;;  %v1625_v0 = vsel %vm1465_vm1, %v3917_v60, 0.0  ;;  %1458 = vst.msk [vmem:[%s4690_s2 + $0x188] sm:$0xf] %vm1359_vm0, %v1357_v4  ;;  %v1635_v4 = vsel %vm1465_vm1, %v4049_v22, 0.0 }
 0x262   :  { %v1256_v45 = vpop.f32.mrf.mxu3 }
 0x263   :  { %v1620_v5 = vadd.f32 %v1619_v2, %v1618_v49  ;;  %v4321_v20 = vadd.f32 %v1256_v45, %v997_v6  ;;  %v1627_v6 = vsel %vm1465_vm1, %v3941_v11, 0.0  ;;  %v1629_v45 = vsel %vm1465_vm1, %v3977_v7, 0.0 }
 0x264   :  { %v1631_v2 = vsel %vm1465_vm1, %v4001_v48, 0.0 }
 0x265   :  { %v1622_v8 = vadd.f32 %v1621_v40, %v1620_v5  ;;  %4843 = vst [vmem:[#allocation44_spill] sm:$0xff] %v4321_v20  ;;  %v1358_v49 = vpack.c.bf16 %v4321_v20, %v4321_v20 }
 0x267   :  { %v1624_v44 = vadd.f32 %v1623_v41, %v1622_v8  ;;  %1459 = vst.msk [vmem:[%s4690_s2 + $0x18c] sm:$0xf] %vm1359_vm0, %v1358_v49  ;;  %v1633_v8 = vsel %vm1465_vm1, %v4025_v51, 0.0  ;;  %v1637_v49 = vsel %vm1465_vm1, %v4073_v53, 0.0 }
 0x269   :  { %v1626_v5 = vadd.f32 %v1625_v0, %v1624_v44 }
 0x26b   :  { %v1628_v9 = vadd.f32 %v1627_v6, %v1626_v5  ;;  %v1639_v5 = vsel %vm1465_vm1, %v4097_v24, 0.0 }
 0x26d   :  { %v1630_v33 = vadd.f32 %v1629_v45, %v1628_v9  ;;  %v1641_v9 = vsel %vm1465_vm1, %v4137_v62, 0.0 }
 0x26f   :  { %v1632_v40 = vadd.f32 %v1631_v2, %v1630_v33  ;;  %v1643_v33 = vsel %vm1465_vm1, %v4139_v36, 0.0 }
 0x271   :  { %v1634_v41 = vadd.f32 %v1633_v8, %v1632_v40  ;;  %v1645_v40 = vsel %vm1465_vm1, %v4185_v57, 0.0 }
 0x273   :  { %v1636_v44 = vadd.f32 %v1635_v4, %v1634_v41  ;;  %v1647_v41 = vsel %vm1465_vm1, %v4187_v59, 0.0 }
 0x275   :  { %v1638_v0 = vadd.f32 %v1637_v49, %v1636_v44  ;;  %v1649_v44 = vsel %vm1465_vm1, %v4223_v34, 0.0 }
 0x277   :  { %v1640_v6 = vadd.f32 %v1639_v5, %v1638_v0  ;;  %v1651_v0 = vsel %vm1465_vm1, %v4225_v58, 0.0 }
 0x279   :  { %v1642_v45 = vadd.f32 %v1641_v9, %v1640_v6  ;;  %v1653_v6 = vsel %vm1465_vm1, %v4255_v25, 0.0 }
 0x27b   :  { %v1644_v2 = vadd.f32 %v1643_v33, %v1642_v45  ;;  %v1655_v45 = vsel %vm1465_vm1, %v4257_v23, 0.0 }
 0x27d   :  { %v1646_v8 = vadd.f32 %v1645_v40, %v1644_v2  ;;  %v1657_v2 = vsel %vm1465_vm1, %v4287_v27, 0.0 }
 0x27f   :  { %v1648_v4 = vadd.f32 %v1647_v41, %v1646_v8  ;;  %v1659_v8 = vsel %vm1465_vm1, %v4289_v15, 0.0 }
 0x281   :  { %v1650_v49 = vadd.f32 %v1649_v44, %v1648_v4  ;;  %v1661_v4 = vsel %vm1465_vm1, %v4319_v55, 0.0 }
 0x283   :  { %v1652_v5 = vadd.f32 %v1651_v0, %v1650_v49  ;;  %v1663_v49 = vsel %vm1465_vm1, %v4321_v20, 0.0 }
 0x285   :  { %v1654_v9 = vadd.f32 %v1653_v6, %v1652_v5  ;;  %v2708_v5 = vmov 800.0  }
 0x286   :  { %2706 = vrcp.f32 %v2708_v5  ;;  %v4847_v5 = vld [vmem:[#allocation3_spill] sm:$0xff] }
 0x287   :  { %v1656_v33 = vadd.f32 %v1655_v45, %v1654_v9 }
 0x289   :  { %v1658_v40 = vadd.f32 %v1657_v2, %v1656_v33 }
 0x28b   :  { %v1660_v41 = vadd.f32 %v1659_v8, %v1658_v40 }
 0x28c   :  { %v2707_v9 = vpop.eup %2706 }
 0x28d   :  { %v1662_v44 = vadd.f32 %v1661_v4, %v1660_v41  ;;  %v1673_v23 = vmul.f32 800.0, %v2707_v9  ;;  %vm1678_vm2 = vweird.f32 %v2707_v9 }
 0x28f   :  { %v1664_v0 = vadd.f32 %v1663_v49, %v1662_v44  ;;  %v1674_v33 = vsub.f32 1.0, %v1673_v23  ;;  %v4846_v44 = vld [vmem:[#allocation2_spill] sm:$0xff] }
 0x291   :  { %v1665_v6 = vrot.slane %v1664_v0, 4  ;;  %v1675_v25 = vmul.f32 %v2707_v9, %v1674_v33 }
 0x293   :  { %v1666_v45 = vadd.f32 %v1665_v6, %v1664_v0  ;;  %v1676_v40 = vadd.f32 %v2707_v9, %v1675_v25  ;;  %v4848_v6 = vld [vmem:[#allocation4_spill] sm:$0xff] }
 0x295   :  { %v1667_v27 = vrot.slane %v1666_v45, 2  ;;  %v1680_v41 = vsel %vm1678_vm2, %v2707_v9, %v1676_v40 }
 0x297   :  { %v1668_v2 = vadd.f32 %v1667_v27, %v1666_v45  ;;  %v4849_v27 = vld [vmem:[#allocation5_spill] sm:$0xff] }
 0x299   :  { %v1669_v15 = vrot.slane %v1668_v2, 1 }
 0x29b   :  { %v4377_v8 = vadd.f32 %v1669_v15, %v1668_v2  ;;  %v4850_v2 = vld [vmem:[#allocation6_spill] sm:$0xff] }
 0x29d   :  { %4845 = vst [vmem:[#allocation46_spill] sm:$0xff] %v4377_v8  ;;  %v4380_v4 = vmul.f32 %v1680_v41, %v4377_v8 }
 0x29f   :  { %v1687_v49 = vsub.f32 %v4846_v44, %v4380_v4  ;;  %v1688_v0 = vsub.f32 %v4847_v5, %v4380_v4  ;;  %v1689_v23 = vsub.f32 %v4848_v6, %v4380_v4  ;;  %v1690_v45 = vsub.f32 %v4849_v27, %v4380_v4  ;;  %v4851_v6 = vld [vmem:[#allocation7_spill] sm:$0xff]  ;;  %v4852_v27 = vld [vmem:[#allocation8_spill] sm:$0xff] }
 0x2a0   :  { %v1691_v15 = vsub.f32 %v3025_v14, %v4380_v4  ;;  %v1692_v40 = vsub.f32 %v4850_v2, %v4380_v4  ;;  %v1693_v20 = vsub.f32 %v4851_v6, %v4380_v4  ;;  %v1694_v14 = vsub.f32 %v4852_v27, %v4380_v4 }
 0x2a1   :  { %v1787_v25 = vmul.f32 %v1687_v49, %v1687_v49  ;;  %v1788_v33 = vmul.f32 %v1688_v0, %v1688_v0  ;;  %v1789_v9 = vmul.f32 %v1689_v23, %v1689_v23  ;;  %v1790_v41 = vmul.f32 %v1690_v45, %v1690_v45 }
 0x2a2   :  { %v1791_v55 = vmul.f32 %v1691_v15, %v1691_v15  ;;  %v1792_v23 = vmul.f32 %v1692_v40, %v1692_v40  ;;  %v1695_v45 = vsub.f32 %v3109_v61, %v4380_v4  ;;  %v1696_v15 = vsub.f32 %v3137_v12, %v4380_v4  ;;  %v4853_v61 = vld [vmem:[#allocation9_spill] sm:$0xff] }
 0x2a3   :  { %v1887_v44 = vsel %vm1465_vm1, %v1787_v25, 0.0  ;;  %v1888_v5 = vsel %vm1465_vm1, %v1788_v33, 0.0  ;;  %v1890_v49 = vsel %vm1465_vm1, %v1789_v9, 0.0  ;;  %v1892_v58 = vsel %vm1465_vm1, %v1790_v41, 0.0 }
 0x2a4   :  { %v1889_v8 = vadd.f32 %v1888_v5, %v1887_v44  ;;  %v1793_v25 = vmul.f32 %v1693_v20, %v1693_v20  ;;  %v1894_v33 = vsel %vm1465_vm1, %v1791_v55, 0.0  ;;  %v1794_v5 = vmul.f32 %v1694_v14, %v1694_v14 }
 0x2a5   :  { %v1697_v40 = vsub.f32 %v3165_v28, %v4380_v4  ;;  %v1795_v6 = vmul.f32 %v1695_v45, %v1695_v45  ;;  %v1698_v20 = vsub.f32 %v4853_v61, %v4380_v4  ;;  %v1699_v12 = vsub.f32 %v3221_v63, %v4380_v4  ;;  %v4855_v63 = vld [vmem:[#allocation15_spill] sm:$0xff] }
 0x2a6   :  { %v1891_v0 = vadd.f32 %v1890_v49, %v1889_v8  ;;  %v1896_v8 = vsel %vm1465_vm1, %v1792_v23, 0.0  ;;  %v1796_v49 = vmul.f32 %v1696_v15, %v1696_v15  ;;  %v1900_v55 = vsel %vm1465_vm1, %v1794_v5, 0.0 }
 0x2a7   :  { %v1797_v27 = vmul.f32 %v1697_v40, %v1697_v40  ;;  %v1902_v14 = vsel %vm1465_vm1, %v1795_v6, 0.0  ;;  %v1700_v28 = vsub.f32 %v3249_v17, %v4380_v4  ;;  %v1799_v15 = vmul.f32 %v1699_v12, %v1699_v12 }
 0x2a8   :  { %v1893_v2 = vadd.f32 %v1892_v58, %v1891_v0  ;;  %v1898_v58 = vsel %vm1465_vm1, %v1793_v25, 0.0  ;;  %v1904_v45 = vsel %vm1465_vm1, %v1796_v49, 0.0  ;;  %v1703_v17 = vsub.f32 %v3333_v13, %v4380_v4  ;;  %v4857_v13 = vld [vmem:[#allocation21_spill] sm:$0xff] }
 0x2a9   :  { %v1906_v5 = vsel %vm1465_vm1, %v1797_v27, 0.0  ;;  %v1800_v40 = vmul.f32 %v1700_v28, %v1700_v28  ;;  %v1910_v61 = vsel %vm1465_vm1, %v1799_v15, 0.0  ;;  %v1704_v49 = vsub.f32 %v3361_v35, %v4380_v4  ;;  %v4856_v27 = vld [vmem:[#allocation19_spill] sm:$0xff] }
 0x2aa   :  { %v1895_v44 = vadd.f32 %v1894_v33, %v1893_v2  ;;  %v1798_v2 = vmul.f32 %v1698_v20, %v1698_v20  ;;  %v4854_v33 = vld [vmem:[#allocation13_spill] sm:$0xff]  ;;  %v1707_v35 = vsub.f32 %v3445_v46, %v4380_v4  ;;  %v4859_v46 = vld [vmem:[#allocation27_spill] sm:$0xff] }
 0x2ac   :  { %v1897_v9 = vadd.f32 %v1896_v8, %v1895_v44  ;;  %v1701_v44 = vsub.f32 %v4854_v33, %v4380_v4  ;;  %v1908_v6 = vsel %vm1465_vm1, %v1798_v2, 0.0 }
 0x2ae   :  { %v1899_v41 = vadd.f32 %v1898_v58, %v1897_v9  ;;  %v1702_v9 = vsub.f32 %v4855_v63, %v4380_v4  ;;  %v1708_v63 = vsub.f32 %v3473_v10, %v4380_v4  ;;  %v1711_v10 = vsub.f32 %v3557_v43, %v4380_v4  ;;  %v4861_v43 = vld [vmem:[#allocation33_spill] sm:$0xff] }
 0x2b0   :  { %v1901_v0 = vadd.f32 %v1900_v55, %v1899_v41  ;;  %v1801_v41 = vmul.f32 %v1701_v44, %v1701_v44  ;;  %v1802_v55 = vmul.f32 %v1702_v9, %v1702_v9 }
 0x2b2   :  { %v1903_v23 = vadd.f32 %v1902_v14, %v1901_v0  ;;  %v1912_v0 = vsel %vm1465_vm1, %v1800_v40, 0.0  ;;  %v1705_v14 = vsub.f32 %v4856_v27, %v4380_v4  ;;  %v1914_v28 = vsel %vm1465_vm1, %v1801_v41, 0.0 }
 0x2b3   :  { %v1916_v33 = vsel %vm1465_vm1, %v1802_v55, 0.0  ;;  %v1807_v41 = vmul.f32 %v1707_v35, %v1707_v35  ;;  %v1808_v55 = vmul.f32 %v1708_v63, %v1708_v63 }
 0x2b4   :  { %v1905_v25 = vadd.f32 %v1904_v45, %v1903_v23  ;;  %v1803_v23 = vmul.f32 %v1703_v17, %v1703_v17  ;;  %v1706_v45 = vsub.f32 %v4857_v13, %v4380_v4  ;;  %v1805_v15 = vmul.f32 %v1705_v14, %v1705_v14 }
 0x2b5   :  { %v1926_v14 = vsel %vm1465_vm1, %v1807_v41, 0.0  ;;  %v1928_v13 = vsel %vm1465_vm1, %v1808_v55, 0.0 }
 0x2b6   :  { %v1907_v8 = vadd.f32 %v1906_v5, %v1905_v25  ;;  %v1804_v25 = vmul.f32 %v1704_v49, %v1704_v49  ;;  %v1918_v5 = vsel %vm1465_vm1, %v1803_v23, 0.0  ;;  %v1806_v9 = vmul.f32 %v1706_v45, %v1706_v45 }
 0x2b7   :  { %v1710_v49 = vsub.f32 %v4859_v46, %v4380_v4  ;;  %v4862_v46 = vld [vmem:[#allocation37_spill] sm:$0xff] }
 0x2b8   :  { %v1909_v58 = vadd.f32 %v1908_v6, %v1907_v8  ;;  %v1920_v40 = vsel %vm1465_vm1, %v1804_v25, 0.0  ;;  %v4860_v25 = vld [vmem:[#allocation31_spill] sm:$0xff] }
 0x2ba   :  { %v1911_v20 = vadd.f32 %v1910_v61, %v1909_v58  ;;  %v4858_v58 = vld [vmem:[#allocation25_spill] sm:$0xff]  ;;  %v1922_v61 = vsel %vm1465_vm1, %v1805_v15, 0.0 }
 0x2bb   :  { %v1709_v17 = vsub.f32 %v4858_v58, %v4380_v4 }
 0x2bc   :  { %v1913_v12 = vadd.f32 %v1912_v0, %v1911_v20  ;;  %v1924_v0 = vsel %vm1465_vm1, %v1806_v9, 0.0 }
 0x2bd   :  { %v1809_v27 = vmul.f32 %v1709_v17, %v1709_v17  ;;  %v1716_v17 = vsub.f32 %v3697_v30, %v4380_v4  ;;  %v1719_v30 = vsub.f32 %v3781_v42, %v4380_v4  ;;  %v4865_v42 = vld [vmem:[#allocation45_spill] sm:$0xff] }
 0x2be   :  { %v1915_v2 = vadd.f32 %v1914_v28, %v1913_v12  ;;  %v1712_v28 = vsub.f32 %v3585_v18, %v4380_v4  ;;  %v1715_v18 = vsub.f32 %v3669_v31, %v4380_v4  ;;  %v4863_v31 = vld [vmem:[#allocation39_spill] sm:$0xff] }
 0x2bf   :  { %v1930_v35 = vsel %vm1465_vm1, %v1809_v27, 0.0  ;;  %v1816_v27 = vmul.f32 %v1716_v17, %v1716_v17 }
 0x2c0   :  { %v1917_v44 = vadd.f32 %v1916_v33, %v1915_v2  ;;  %v1810_v2 = vmul.f32 %v1710_v49, %v1710_v49  ;;  %v1713_v33 = vsub.f32 %v4860_v25, %v4380_v4  ;;  %v1717_v49 = vsub.f32 %v4862_v46, %v4380_v4 }
 0x2c1   :  { %v1815_v55 = vmul.f32 %v1715_v18, %v1715_v18 }
 0x2c2   :  { %v1919_v8 = vadd.f32 %v1918_v5, %v1917_v44  ;;  %v1811_v44 = vmul.f32 %v1711_v10, %v1711_v10  ;;  %v1714_v5 = vsub.f32 %v4861_v43, %v4380_v4  ;;  %v1932_v63 = vsel %vm1465_vm1, %v1810_v2, 0.0 }
 0x2c3   :  { %v1718_v10 = vsub.f32 %v4863_v31, %v4380_v4  ;;  %v1942_v2 = vsel %vm1465_vm1, %v1815_v55, 0.0  ;;  %v1819_v43 = vmul.f32 %v1719_v30, %v1719_v30 }
 0x2c4   :  { %v1921_v6 = vadd.f32 %v1920_v40, %v1919_v8  ;;  %v1812_v8 = vmul.f32 %v1712_v28, %v1712_v28  ;;  %v1813_v40 = vmul.f32 %v1713_v33, %v1713_v33  ;;  %v1814_v41 = vmul.f32 %v1714_v5, %v1714_v5 }
 0x2c5   :  { %v1817_v28 = vmul.f32 %v1717_v49, %v1717_v49  ;;  %v1818_v25 = vmul.f32 %v1718_v10, %v1718_v10  ;;  %v1944_v33 = vsel %vm1465_vm1, %v1816_v27, 0.0  ;;  %v4866_v49 = vld [vmem:[#allocation48_spill] sm:$0xff] }
 0x2c6   :  { %v1923_v20 = vadd.f32 %v1922_v61, %v1921_v6  ;;  %v1934_v6 = vsel %vm1465_vm1, %v1811_v44, 0.0  ;;  %v1936_v61 = vsel %vm1465_vm1, %v1812_v8, 0.0  ;;  %v1725_v55 = vsub.f32 %v4866_v49, %v4380_v4 }
 0x2c7   :  { %v1946_v5 = vsel %vm1465_vm1, %v1817_v28, 0.0  ;;  %v1948_v18 = vsel %vm1465_vm1, %v1818_v25, 0.0 }
 0x2c8   :  { %v1925_v12 = vadd.f32 %v1924_v0, %v1923_v20  ;;  %v1938_v0 = vsel %vm1465_vm1, %v1813_v40, 0.0  ;;  %v1825_v30 = vmul.f32 %v1725_v55, %v1725_v55 }
 0x2ca   :  { %v1927_v23 = vadd.f32 %v1926_v14, %v1925_v12  ;;  %v1940_v14 = vsel %vm1465_vm1, %v1814_v41, 0.0  ;;  %v1724_v41 = vsub.f32 %v3899_v50, %v4380_v4  ;;  %v1727_v50 = vsub.f32 %v3985_v38, %v4380_v4  ;;  %v4869_v38 = vld [vmem:[#allocation51_spill] sm:$0xff] }
 0x2cc   :  { %v1929_v45 = vadd.f32 %v1928_v13, %v1927_v23  ;;  %v1824_v27 = vmul.f32 %v1724_v41, %v1724_v41 }
 0x2ce   :  { %v1931_v15 = vadd.f32 %v1930_v35, %v1929_v45  ;;  %v1720_v45 = vsub.f32 %v3809_v16, %v4380_v4  ;;  %v4864_v35 = vld [vmem:[#allocation43_spill] sm:$0xff]  ;;  %v1723_v16 = vsub.f32 %v3869_v39, %v4380_v4  ;;  %v4867_v39 = vld [vmem:[#allocation49_spill] sm:$0xff]  ;;  %v1960_v25 = vsel %vm1465_vm1, %v1824_v27, 0.0 }
 0x2cf   :  { %v1726_v10 = vsub.f32 %v4867_v39, %v4380_v4  ;;  %v1735_v27 = vsub.f32 %v4173_v26, %v4380_v4  ;;  %v1738_v26 = vsub.f32 %v3121_v1, %v4380_v4  ;;  %v4873_v1 = vld [vmem:[#allocation10_spill] sm:$0xff] }
 0x2d0   :  { %v1933_v9 = vadd.f32 %v1932_v63, %v1931_v15  ;;  %v1721_v15 = vsub.f32 %v4864_v35, %v4380_v4  ;;  %v1722_v63 = vsub.f32 %v4865_v42, %v4380_v4 }
 0x2d2   :  { %v1935_v58 = vadd.f32 %v1934_v6, %v1933_v9  ;;  %v1820_v9 = vmul.f32 %v1720_v45, %v1720_v45  ;;  %v1821_v6 = vmul.f32 %v1721_v15, %v1721_v15  ;;  %v1826_v45 = vmul.f32 %v1726_v10, %v1726_v10 }
 0x2d3   :  { %v1827_v15 = vmul.f32 %v1727_v50, %v1727_v50 }
 0x2d4   :  { %v1937_v20 = vadd.f32 %v1936_v61, %v1935_v58  ;;  %v1950_v58 = vsel %vm1465_vm1, %v1819_v43, 0.0  ;;  %v1822_v61 = vmul.f32 %v1722_v63, %v1722_v63  ;;  %v1962_v43 = vsel %vm1465_vm1, %v1825_v30, 0.0 }
 0x2d5   :  { %v1964_v63 = vsel %vm1465_vm1, %v1826_v45, 0.0  ;;  %v1736_v30 = vsub.f32 %v4195_v3, %v4380_v4  ;;  %v1737_v45 = vsub.f32 %v3105_v54, %v4380_v4  ;;  %v1739_v3 = vsub.f32 %v3161_v21, %v4380_v4  ;;  %v4874_v21 = vld [vmem:[#allocation11_spill] sm:$0xff] }
 0x2d6   :  { %v1939_v12 = vadd.f32 %v1938_v0, %v1937_v20  ;;  %v1952_v20 = vsel %vm1465_vm1, %v1820_v9, 0.0  ;;  %v1823_v0 = vmul.f32 %v1723_v16, %v1723_v16  ;;  %v1740_v54 = vsub.f32 %v3177_v32, %v4380_v4  ;;  %v4875_v32 = vld [vmem:[#allocation12_spill] sm:$0xff] }
 0x2d8   :  { %v1941_v23 = vadd.f32 %v1940_v14, %v1939_v12  ;;  %v1954_v12 = vsel %vm1465_vm1, %v1821_v6, 0.0  ;;  %v1956_v14 = vsel %vm1465_vm1, %v1822_v61, 0.0  ;;  %v1958_v28 = vsel %vm1465_vm1, %v1823_v0, 0.0  ;;  %v4870_v6 = vld [vmem:[#allocation52_spill] sm:$0xff] }
 0x2da   :  { %v1943_v13 = vadd.f32 %v1942_v2, %v1941_v23 }
 0x2dc   :  { %v1945_v44 = vadd.f32 %v1944_v33, %v1943_v13  ;;  %v1728_v13 = vsub.f32 %v4009_v56, %v4380_v4  ;;  %v1731_v56 = vsub.f32 %v4081_v47, %v4380_v4  ;;  %v4872_v47 = vld [vmem:[#allocation54_spill] sm:$0xff] }
 0x2de   :  { %v1947_v8 = vadd.f32 %v1946_v5, %v1945_v44  ;;  %v4868_v44 = vld [vmem:[#allocation50_spill] sm:$0xff]  ;;  %v1828_v42 = vmul.f32 %v1728_v13, %v1728_v13  ;;  %v1831_v49 = vmul.f32 %v1731_v56, %v1731_v56  ;;  %v1741_v56 = vsub.f32 %v4873_v1, %v4380_v4 }
 0x2df   :  { %v1729_v35 = vsub.f32 %v4868_v44, %v4380_v4 }
 0x2e0   :  { %v1949_v40 = vadd.f32 %v1948_v18, %v1947_v8  ;;  %v1730_v8 = vsub.f32 %v4869_v38, %v4380_v4  ;;  %v1968_v41 = vsel %vm1465_vm1, %v1828_v42, 0.0  ;;  %v1838_v42 = vmul.f32 %v1738_v26, %v1738_v26 }
 0x2e1   :  { %v1829_v18 = vmul.f32 %v1729_v35, %v1729_v35  ;;  %v1836_v35 = vmul.f32 %v1736_v30, %v1736_v30 }
 0x2e2   :  { %v1951_v17 = vadd.f32 %v1950_v58, %v1949_v40  ;;  %v1966_v40 = vsel %vm1465_vm1, %v1827_v15, 0.0  ;;  %v1732_v58 = vsub.f32 %v4870_v6, %v4380_v4  ;;  %v1742_v6 = vsub.f32 %v4874_v21, %v4380_v4 }
 0x2e3   :  { %v1970_v55 = vsel %vm1465_vm1, %v1829_v18, 0.0  ;;  %v1839_v18 = vmul.f32 %v1739_v3, %v1739_v3 }
 0x2e4   :  { %v1953_v46 = vadd.f32 %v1952_v20, %v1951_v17  ;;  %v1830_v17 = vmul.f32 %v1730_v8, %v1730_v8  ;;  %v4871_v20 = vld [vmem:[#allocation53_spill] sm:$0xff] }
 0x2e6   :  { %v1955_v31 = vadd.f32 %v1954_v12, %v1953_v46  ;;  %v1733_v46 = vsub.f32 %v4871_v20, %v4380_v4  ;;  %v1734_v12 = vsub.f32 %v4872_v47, %v4380_v4  ;;  %v1972_v39 = vsel %vm1465_vm1, %v1830_v17, 0.0 }
 0x2e7   :  { %v1988_v17 = vsel %vm1465_vm1, %v1838_v42, 0.0  ;;  %v1841_v20 = vmul.f32 %v1741_v56, %v1741_v56  ;;  %v1842_v47 = vmul.f32 %v1742_v6, %v1742_v6 }
 0x2e8   :  { %v1957_v23 = vadd.f32 %v1956_v14, %v1955_v31  ;;  %v1832_v31 = vmul.f32 %v1732_v58, %v1732_v58  ;;  %v1833_v14 = vmul.f32 %v1733_v46, %v1733_v46  ;;  %v1840_v58 = vmul.f32 %v1740_v54, %v1740_v54 }
 0x2e9   :  { %v1990_v46 = vsel %vm1465_vm1, %v1839_v18, 0.0 }
 0x2ea   :  { %v1959_v2 = vadd.f32 %v1958_v28, %v1957_v23  ;;  %v1974_v23 = vsel %vm1465_vm1, %v1831_v49, 0.0  ;;  %v1834_v28 = vmul.f32 %v1734_v12, %v1734_v12  ;;  %v1992_v12 = vsel %vm1465_vm1, %v1840_v58, 0.0 }
 0x2ec   :  { %v1961_v33 = vadd.f32 %v1960_v25, %v1959_v2  ;;  %v1976_v2 = vsel %vm1465_vm1, %v1832_v31, 0.0  ;;  %v1835_v25 = vmul.f32 %v1735_v27, %v1735_v27  ;;  %v1980_v15 = vsel %vm1465_vm1, %v1834_v28, 0.0 }
 0x2ee   :  { %v1963_v5 = vadd.f32 %v1962_v43, %v1961_v33  ;;  %v1978_v33 = vsel %vm1465_vm1, %v1833_v14, 0.0  ;;  %v1982_v38 = vsel %vm1465_vm1, %v1835_v25, 0.0  ;;  %v1994_v14 = vsel %vm1465_vm1, %v1841_v20, 0.0 }
 0x2f0   :  { %v1965_v9 = vadd.f32 %v1964_v63, %v1963_v5  ;;  %v1837_v5 = vmul.f32 %v1737_v45, %v1737_v45  ;;  %v1984_v63 = vsel %vm1465_vm1, %v1836_v35, 0.0  ;;  %v4879_v45 = vld [vmem:[#allocation18_spill] sm:$0xff]  ;;  %v4880_v35 = vld [vmem:[#allocation20_spill] sm:$0xff] }
 0x2f1   :  { %v1747_v25 = vsub.f32 %v4879_v45, %v4380_v4 }
 0x2f2   :  { %v1967_v16 = vadd.f32 %v1966_v40, %v1965_v9  ;;  %v1986_v40 = vsel %vm1465_vm1, %v1837_v5, 0.0 }
 0x2f3   :  { %v1847_v54 = vmul.f32 %v1747_v25, %v1747_v25 }
 0x2f4   :  { %v1969_v61 = vadd.f32 %v1968_v41, %v1967_v16 }
 0x2f5   :  { %v2006_v58 = vsel %vm1465_vm1, %v1847_v54, 0.0 }
 0x2f6   :  { %v1971_v0 = vadd.f32 %v1970_v55, %v1969_v61  ;;  %v1743_v61 = vsub.f32 %v4875_v32, %v4380_v4  ;;  %v4876_v55 = vld [vmem:[#allocation14_spill] sm:$0xff] }
 0x2f8   :  { %v1973_v10 = vadd.f32 %v1972_v39, %v1971_v0  ;;  %v1744_v0 = vsub.f32 %v4876_v55, %v4380_v4  ;;  %v4877_v39 = vld [vmem:[#allocation16_spill] sm:$0xff]  ;;  %v1843_v27 = vmul.f32 %v1743_v61, %v1743_v61 }
 0x2fa   :  { %v1975_v50 = vadd.f32 %v1974_v23, %v1973_v10  ;;  %v1745_v10 = vsub.f32 %v4877_v39, %v4380_v4  ;;  %v1844_v28 = vmul.f32 %v1744_v0, %v1744_v0 }
 0x2fc   :  { %v1977_v13 = vadd.f32 %v1976_v2, %v1975_v50  ;;  %v4878_v50 = vld [vmem:[#allocation17_spill] sm:$0xff]  ;;  %v1996_v2 = vsel %vm1465_vm1, %v1842_v47, 0.0  ;;  %v2000_v3 = vsel %vm1465_vm1, %v1844_v28, 0.0 }
 0x2fd   :  { %v1746_v30 = vsub.f32 %v4878_v50, %v4380_v4 }
 0x2fe   :  { %v1979_v44 = vadd.f32 %v1978_v33, %v1977_v13  ;;  %v1845_v33 = vmul.f32 %v1745_v10, %v1745_v10 }
 0x300   :  { %v1981_v43 = vadd.f32 %v1980_v15, %v1979_v44  ;;  %v1998_v44 = vsel %vm1465_vm1, %v1843_v27, 0.0  ;;  %v1748_v15 = vsub.f32 %v4880_v35, %v4380_v4  ;;  %v2002_v42 = vsel %vm1465_vm1, %v1845_v33, 0.0 }
 0x302   :  { %v1983_v8 = vadd.f32 %v1982_v38, %v1981_v43  ;;  %v1846_v43 = vmul.f32 %v1746_v30, %v1746_v30  ;;  %v4881_v38 = vld [vmem:[#allocation22_spill] sm:$0xff]  ;;  %v1848_v56 = vmul.f32 %v1748_v15, %v1748_v15 }
 0x304   :  { %v1985_v9 = vadd.f32 %v1984_v63, %v1983_v8  ;;  %v1749_v8 = vsub.f32 %v4881_v38, %v4380_v4  ;;  %v2004_v18 = vsel %vm1465_vm1, %v1846_v43, 0.0  ;;  %v2008_v20 = vsel %vm1465_vm1, %v1848_v56, 0.0 }
 0x306   :  { %v1987_v16 = vadd.f32 %v1986_v40, %v1985_v9  ;;  %v4882_v9 = vld [vmem:[#allocation23_spill] sm:$0xff]  ;;  %v1849_v6 = vmul.f32 %v1749_v8, %v1749_v8 }
 0x307   :  { %v1750_v1 = vsub.f32 %v4882_v9, %v4380_v4 }
 0x308   :  { %v1989_v41 = vadd.f32 %v1988_v17, %v1987_v16  ;;  %v4883_v16 = vld [vmem:[#allocation24_spill] sm:$0xff]  ;;  %v2010_v47 = vsel %vm1465_vm1, %v1849_v6, 0.0 }
 0x309   :  { %v1751_v21 = vsub.f32 %v4883_v16, %v4380_v4  ;;  %v1850_v61 = vmul.f32 %v1750_v1, %v1750_v1 }
 0x30a   :  { %v1991_v49 = vadd.f32 %v1990_v46, %v1989_v41  ;;  %v4884_v41 = vld [vmem:[#allocation26_spill] sm:$0xff] }
 0x30b   :  { %v1752_v32 = vsub.f32 %v4884_v41, %v4380_v4  ;;  %v1851_v0 = vmul.f32 %v1751_v21, %v1751_v21  ;;  %v2012_v27 = vsel %vm1465_vm1, %v1850_v61, 0.0 }
 0x30c   :  { %v1993_v31 = vadd.f32 %v1992_v12, %v1991_v49  ;;  %v4885_v49 = vld [vmem:[#allocation28_spill] sm:$0xff] }
 0x30d   :  { %v1753_v55 = vsub.f32 %v4885_v49, %v4380_v4  ;;  %v1852_v10 = vmul.f32 %v1752_v32, %v1752_v32  ;;  %v2014_v28 = vsel %vm1465_vm1, %v1851_v0, 0.0 }
 0x30e   :  { %v1995_v23 = vadd.f32 %v1994_v14, %v1993_v31  ;;  %v4886_v31 = vld [vmem:[#allocation29_spill] sm:$0xff] }
 0x30f   :  { %v1754_v39 = vsub.f32 %v4886_v31, %v4380_v4  ;;  %v1853_v30 = vmul.f32 %v1753_v55, %v1753_v55  ;;  %v2016_v33 = vsel %vm1465_vm1, %v1852_v10, 0.0 }
 0x310   :  { %v1997_v13 = vadd.f32 %v1996_v2, %v1995_v23  ;;  %v4887_v23 = vld [vmem:[#allocation30_spill] sm:$0xff] }
 0x311   :  { %v1755_v50 = vsub.f32 %v4887_v23, %v4380_v4  ;;  %v1854_v25 = vmul.f32 %v1754_v39, %v1754_v39  ;;  %v2018_v43 = vsel %vm1465_vm1, %v1853_v30, 0.0  ;;  %v1765_v30 = vsub.f32 %v4841_v19, %v4380_v4 }
 0x312   :  { %v1999_v26 = vadd.f32 %v1998_v44, %v1997_v13  ;;  %v4888_v13 = vld [vmem:[#allocation32_spill] sm:$0xff]  ;;  %v1768_v19 = vsub.f32 %v3941_v11, %v4380_v4  ;;  %v1771_v11 = vsub.f32 %v4025_v51, %v4380_v4  ;;  %v1774_v51 = vsub.f32 %v4097_v24, %v4380_v4 }
 0x313   :  { %v1756_v45 = vsub.f32 %v4888_v13, %v4380_v4  ;;  %v1855_v15 = vmul.f32 %v1755_v50, %v1755_v50  ;;  %v2020_v54 = vsel %vm1465_vm1, %v1854_v25, 0.0  ;;  %v1777_v24 = vsub.f32 %v4185_v57, %v4380_v4  ;;  %v4895_v57 = vld [vmem:[#allocation55_spill] sm:$0xff] }
 0x314   :  { %v2001_v5 = vadd.f32 %v2000_v3, %v1999_v26  ;;  %v4889_v26 = vld [vmem:[#allocation34_spill] sm:$0xff] }
 0x315   :  { %v1757_v35 = vsub.f32 %v4889_v26, %v4380_v4  ;;  %v1856_v8 = vmul.f32 %v1756_v45, %v1756_v45  ;;  %v2022_v56 = vsel %vm1465_vm1, %v1855_v15, 0.0 }
 0x316   :  { %v2003_v63 = vadd.f32 %v2002_v42, %v2001_v5  ;;  %v4890_v5 = vld [vmem:[#allocation35_spill] sm:$0xff] }
 0x317   :  { %v1758_v38 = vsub.f32 %v4890_v5, %v4380_v4  ;;  %v1857_v1 = vmul.f32 %v1757_v35, %v1757_v35  ;;  %v2024_v6 = vsel %vm1465_vm1, %v1856_v8, 0.0 }
 0x318   :  { %v2005_v40 = vadd.f32 %v2004_v18, %v2003_v63  ;;  %v4891_v63 = vld [vmem:[#allocation36_spill] sm:$0xff] }
 0x319   :  { %v1759_v9 = vsub.f32 %v4891_v63, %v4380_v4  ;;  %v1858_v21 = vmul.f32 %v1758_v38, %v1758_v38  ;;  %v2026_v61 = vsel %vm1465_vm1, %v1857_v1, 0.0 }
 0x31a   :  { %v2007_v17 = vadd.f32 %v2006_v58, %v2005_v40  ;;  %v4892_v40 = vld [vmem:[#allocation38_spill] sm:$0xff] }
 0x31b   :  { %v1760_v16 = vsub.f32 %v4892_v40, %v4380_v4  ;;  %v1859_v32 = vmul.f32 %v1759_v9, %v1759_v9  ;;  %v2028_v0 = vsel %vm1465_vm1, %v1858_v21, 0.0  ;;  %v1871_v21 = vmul.f32 %v1771_v11, %v1771_v11 }
 0x31c   :  { %v2009_v46 = vadd.f32 %v2008_v20, %v2007_v17  ;;  %v4893_v17 = vld [vmem:[#allocation40_spill] sm:$0xff] }
 0x31d   :  { %v1761_v41 = vsub.f32 %v4893_v17, %v4380_v4  ;;  %v1860_v55 = vmul.f32 %v1760_v16, %v1760_v16  ;;  %v2030_v39 = vsel %vm1465_vm1, %v1859_v32, 0.0 }
 0x31e   :  { %v2011_v12 = vadd.f32 %v2010_v47, %v2009_v46  ;;  %v4894_v46 = vld [vmem:[#allocation41_spill] sm:$0xff] }
 0x31f   :  { %v1762_v49 = vsub.f32 %v4894_v46, %v4380_v4  ;;  %v1861_v31 = vmul.f32 %v1761_v41, %v1761_v41  ;;  %v2032_v23 = vsel %vm1465_vm1, %v1860_v55, 0.0 }
 0x320   :  { %v2013_v14 = vadd.f32 %v2012_v27, %v2011_v12  ;;  %v1763_v12 = vsub.f32 %v4839_v29, %v4380_v4  ;;  %v1764_v27 = vsub.f32 %v4840_v37, %v4380_v4  ;;  %v1766_v29 = vsub.f32 %v4844_v52, %v4380_v4 }
 0x321   :  { %v1767_v37 = vsub.f32 %v3917_v60, %v4380_v4  ;;  %v1769_v52 = vsub.f32 %v3977_v7, %v4380_v4  ;;  %v1770_v60 = vsub.f32 %v4001_v48, %v4380_v4  ;;  %v1772_v7 = vsub.f32 %v4049_v22, %v4380_v4 }
 0x322   :  { %v2015_v2 = vadd.f32 %v2014_v28, %v2013_v14  ;;  %v1862_v14 = vmul.f32 %v1762_v49, %v1762_v49  ;;  %v1863_v28 = vmul.f32 %v1763_v12, %v1763_v12  ;;  %v1864_v45 = vmul.f32 %v1764_v27, %v1764_v27 }
 0x323   :  { %v1866_v15 = vmul.f32 %v1766_v29, %v1766_v29  ;;  %v1867_v5 = vmul.f32 %v1767_v37, %v1767_v37  ;;  %v1869_v9 = vmul.f32 %v1769_v52, %v1769_v52  ;;  %v1773_v48 = vsub.f32 %v4073_v53, %v4380_v4 }
 0x324   :  { %v2017_v44 = vadd.f32 %v2016_v33, %v2015_v2  ;;  %v2034_v2 = vsel %vm1465_vm1, %v1861_v31, 0.0  ;;  %v2036_v25 = vsel %vm1465_vm1, %v1862_v14, 0.0  ;;  %v2038_v26 = vsel %vm1465_vm1, %v1863_v28, 0.0 }
 0x325   :  { %v2046_v1 = vsel %vm1465_vm1, %v1867_v5, 0.0  ;;  %v1872_v17 = vmul.f32 %v1772_v7, %v1772_v7  ;;  %v1775_v22 = vsub.f32 %v4137_v62, %v4380_v4  ;;  %v1776_v53 = vsub.f32 %v4139_v36, %v4380_v4  ;;  %v4899_v5 = vld [vmem:[#allocation59_spill] sm:$0xff] }
 0x326   :  { %v2019_v3 = vadd.f32 %v2018_v43, %v2017_v44  ;;  %v1865_v44 = vmul.f32 %v1765_v30, %v1765_v30  ;;  %v2040_v43 = vsel %vm1465_vm1, %v1864_v45, 0.0  ;;  %v1874_v49 = vmul.f32 %v1774_v51, %v1774_v51 }
 0x327   :  { %v2056_v55 = vsel %vm1465_vm1, %v1872_v17, 0.0  ;;  %v1778_v62 = vsub.f32 %v4187_v59, %v4380_v4  ;;  %v1779_v36 = vsub.f32 %v4223_v34, %v4380_v4  ;;  %v1877_v14 = vmul.f32 %v1777_v24, %v1777_v24  ;;  %v4896_v59 = vld [vmem:[#allocation56_spill] sm:$0xff]  ;;  %v4897_v34 = vld [vmem:[#allocation57_spill] sm:$0xff] }
 0x328   :  { %v2021_v42 = vadd.f32 %v2020_v54, %v2019_v3  ;;  %v2042_v38 = vsel %vm1465_vm1, %v1865_v44, 0.0  ;;  %v1868_v54 = vmul.f32 %v1768_v19, %v1768_v19  ;;  %v1780_v30 = vsub.f32 %v4895_v57, %v4380_v4  ;;  %v4898_v19 = vld [vmem:[#allocation58_spill] sm:$0xff] }
 0x329   :  { %v1878_v28 = vmul.f32 %v1778_v62, %v1778_v62  ;;  %v1781_v29 = vsub.f32 %v4896_v59, %v4380_v4  ;;  %v1879_v45 = vmul.f32 %v1779_v36, %v1779_v36  ;;  %v1782_v37 = vsub.f32 %v4897_v34, %v4380_v4 }
 0x32a   :  { %v2023_v18 = vadd.f32 %v2022_v56, %v2021_v42  ;;  %v2044_v42 = vsel %vm1465_vm1, %v1866_v15, 0.0  ;;  %v2048_v40 = vsel %vm1465_vm1, %v1868_v54, 0.0  ;;  %v1880_v44 = vmul.f32 %v1780_v30, %v1780_v30 }
 0x32b   :  { %v1783_v15 = vsub.f32 %v4898_v19, %v4380_v4 }
 0x32c   :  { %v2025_v58 = vadd.f32 %v2024_v6, %v2023_v18  ;;  %v1870_v18 = vmul.f32 %v1770_v60, %v1770_v60  ;;  %v2050_v6 = vsel %vm1465_vm1, %v1869_v9, 0.0  ;;  %v2072_v60 = vsel %vm1465_vm1, %v1880_v44, 0.0 }
 0x32d   :  { %v1883_v11 = vmul.f32 %v1783_v15, %v1783_v15 }
 0x32e   :  { %v2027_v20 = vadd.f32 %v2026_v61, %v2025_v58  ;;  %v2052_v41 = vsel %vm1465_vm1, %v1870_v18, 0.0  ;;  %v1873_v61 = vmul.f32 %v1773_v48, %v1773_v48 }
 0x330   :  { %v2029_v47 = vadd.f32 %v2028_v0, %v2027_v20  ;;  %v2054_v20 = vsel %vm1465_vm1, %v1871_v21, 0.0  ;;  %v2058_v12 = vsel %vm1465_vm1, %v1873_v61, 0.0  ;;  %v2078_v21 = vsel %vm1465_vm1, %v1883_v11, 0.0 }
 0x332   :  { %v2031_v10 = vadd.f32 %v2030_v39, %v2029_v47  ;;  %v1875_v47 = vmul.f32 %v1775_v22, %v1775_v22  ;;  %v1876_v39 = vmul.f32 %v1776_v53, %v1776_v53 }
 0x334   :  { %v2033_v50 = vadd.f32 %v2032_v23, %v2031_v10  ;;  %v2060_v10 = vsel %vm1465_vm1, %v1874_v49, 0.0  ;;  %v2062_v23 = vsel %vm1465_vm1, %v1875_v47, 0.0 }
 0x336   :  { %v2035_v13 = vadd.f32 %v2034_v2, %v2033_v50  ;;  %v2064_v2 = vsel %vm1465_vm1, %v1876_v39, 0.0 }
 0x338   :  { %v2037_v33 = vadd.f32 %v2036_v25, %v2035_v13  ;;  %v2066_v25 = vsel %vm1465_vm1, %v1877_v14, 0.0 }
 0x33a   :  { %v2039_v35 = vadd.f32 %v2038_v26, %v2037_v33  ;;  %v2068_v26 = vsel %vm1465_vm1, %v1878_v28, 0.0 }
 0x33c   :  { %v2041_v3 = vadd.f32 %v2040_v43, %v2039_v35  ;;  %v1881_v43 = vmul.f32 %v1781_v29, %v1781_v29 }
 0x33e   :  { %v2043_v8 = vadd.f32 %v2042_v38, %v2041_v3  ;;  %v2070_v3 = vsel %vm1465_vm1, %v1879_v45, 0.0  ;;  %v1784_v38 = vsub.f32 %v4899_v5, %v4380_v4  ;;  %v2074_v9 = vsel %vm1465_vm1, %v1881_v43, 0.0 }
 0x340   :  { %v2045_v63 = vadd.f32 %v2044_v42, %v2043_v8  ;;  %v1882_v8 = vmul.f32 %v1782_v37, %v1782_v37  ;;  %v4900_v42 = vld [vmem:[#allocation42_spill] sm:$0xff]  ;;  %v1884_v18 = vmul.f32 %v1784_v38, %v1784_v38 }
 0x342   :  { %v2047_v56 = vadd.f32 %v2046_v1, %v2045_v63  ;;  %v1785_v63 = vsub.f32 %v4900_v42, %v4380_v4  ;;  %v2080_v51 = vsel %vm1465_vm1, %v1884_v18, 0.0 }
 0x344   :  { %v2049_v16 = vadd.f32 %v2048_v40, %v2047_v56  ;;  %v4901_v56 = vld [vmem:[#allocation44_spill] sm:$0xff]  ;;  %v2076_v40 = vsel %vm1465_vm1, %v1882_v8, 0.0  ;;  %v1885_v48 = vmul.f32 %v1785_v63, %v1785_v63 }
 0x345   :  { %v1786_v7 = vsub.f32 %v4901_v56, %v4380_v4 }
 0x346   :  { %v2051_v58 = vadd.f32 %v2050_v6, %v2049_v16 }
 0x348   :  { %v2053_v32 = vadd.f32 %v2052_v41, %v2051_v58  ;;  %v1886_v58 = vmul.f32 %v1786_v7, %v1786_v7  ;;  %v2082_v41 = vsel %vm1465_vm1, %v1885_v48, 0.0 }
 0x34a   :  { %v2055_v46 = vadd.f32 %v2054_v20, %v2053_v32  ;;  %v2084_v22 = vsel %vm1465_vm1, %v1886_v58, 0.0 }
 0x34c   :  { %v2057_v0 = vadd.f32 %v2056_v55, %v2055_v46  ;;  %v2093_v55 = vmul.f32 %v4380_v4, %v4380_v4 }
 0x34e   :  { %v2059_v31 = vadd.f32 %v2058_v12, %v2057_v0  ;;  %v2095_v47 = vmul.f32 0.0, %v2093_v55 }
 0x350   :  { %v2061_v27 = vadd.f32 %v2060_v10, %v2059_v31  ;;  %v4902_v31 = vld [vmem:[#allocation46_spill] sm:$0xff] }
 0x352   :  { %v2063_v50 = vadd.f32 %v2062_v23, %v2061_v27 }
 0x354   :  { %v2065_v13 = vadd.f32 %v2064_v2, %v2063_v50 }
 0x356   :  { %v2067_v33 = vadd.f32 %v2066_v25, %v2065_v13 }
 0x358   :  { %v2069_v35 = vadd.f32 %v2068_v26, %v2067_v33 }
 0x35a   :  { %v2071_v52 = vadd.f32 %v2070_v3, %v2069_v35 }
 0x35c   :  { %v2073_v54 = vadd.f32 %v2072_v60, %v2071_v52 }
 0x35e   :  { %v2075_v1 = vadd.f32 %v2074_v9, %v2073_v54 }
 0x360   :  { %v2077_v16 = vadd.f32 %v2076_v40, %v2075_v1 }
 0x362   :  { %v2079_v6 = vadd.f32 %v2078_v21, %v2077_v16 }
 0x364   :  { %v2081_v17 = vadd.f32 %v2080_v51, %v2079_v6 }
 0x366   :  { %v2083_v32 = vadd.f32 %v2082_v41, %v2081_v17 }
 0x368   :  { %v2085_v61 = vadd.f32 %v2084_v22, %v2083_v32 }
 0x36a   :  { %v2086_v20 = vrot.slane %v2085_v61, 4 }
 0x36c   :  { %v2087_v46 = vadd.f32 %v2086_v20, %v2085_v61 }
 0x36e   :  { %v2088_v53 = vrot.slane %v2087_v46, 2 }
 0x370   :  { %v2089_v49 = vadd.f32 %v2088_v53, %v2087_v46 }
 0x372   :  { %v2090_v0 = vrot.slane %v2089_v49, 1 }
 0x374   :  { %v2091_v24 = vadd.f32 %v2090_v0, %v2089_v49 }
 0x376   :  { %v2096_v12 = vsub.f32 %v2091_v24, %v2095_v47 }
 0x378   :  { %v2098_v62 = vsel %vm2097_vm3, %v4902_v31, %v2096_v12 }
 0x379   :  { %2100 = vst.msk [vmem:[%s4691_s3] sm:$0x3] %vm2099_vm4, %v2098_v62 }

// kernel: atari_features_forward.5
= control target key start
LH: loop header
LB: loop body
LE: loop exit
PB: predicated region body
PF: predicated region fallthrough
CT: control target
= control target key end

     0   :  { %vm811_vm0 = vcmask 519168   ;;  %vm839_vm1 = vcmask 523264   ;;  %vm1003_vm3 = vcmask 1040384   ;;  %vm1005_vm4 = vcmask 517120   ;;  %s2076_s1 = inlined_call_operand.vmem [shape: bf16[512,64], index: 1, kind: input, shape index: {}]   ;;  %s2077_s0 = inlined_call_operand.vmem [shape: bf16[176,512], index: 0, kind: input, shape index: {}]   ;;  %s2078_s2 = inlined_call_operand.vmem [shape: bf16[176,64], index: 2, kind: output, shape index: {0}]   ;;  %s2079_s3 = inlined_call_operand.vmem [shape: f32[1,2,64], index: 3, kind: output, shape index: {1}]  }
   0x1   :  { %v1370_v0 = vld [vmem:[%s2076_s1 + $0x38] sm:$0xff]  ;;  %v1369_v4 = vld [vmem:[%s2076_s1 + $0x30] sm:$0xff]  ;;  %v1368_v8 = vld [vmem:[%s2076_s1 + $0x28] sm:$0xff] }
   0x2   :  { %v1378_v1 = vld [vmem:[%s2076_s1 + $0x78] sm:$0xff]  ;;  %533 = vmatpush.bf16.msra.mxu0 %v1370_v0  ;;  %v1377_v5 = vld [vmem:[%s2076_s1 + $0x70] sm:$0xff]  ;;  %v1376_v9 = vld [vmem:[%s2076_s1 + $0x68] sm:$0xff] }
   0x3   :  { %v1386_v2 = vld [vmem:[%s2076_s1 + $0xb8] sm:$0xff]  ;;  %597 = vmatpush.bf16.msra.mxu1 %v1378_v1  ;;  %v1385_v6 = vld [vmem:[%s2076_s1 + $0xb0] sm:$0xff]  ;;  %v1384_v10 = vld [vmem:[%s2076_s1 + $0xa8] sm:$0xff] }
   0x4   :  { %v1394_v3 = vld [vmem:[%s2076_s1 + $0xf8] sm:$0xff]  ;;  %661 = vmatpush.bf16.msra.mxu2 %v1386_v2  ;;  %v1393_v7 = vld [vmem:[%s2076_s1 + $0xf0] sm:$0xff]  ;;  %v1392_v11 = vld [vmem:[%s2076_s1 + $0xe8] sm:$0xff] }
   0x5   :  { %725 = vmatpush.bf16.msra.mxu3 %v1394_v3  ;;  %v1367_v12 = vld [vmem:[%s2076_s1 + $0x20] sm:$0xff]  ;;  %v1366_v16 = vld [vmem:[%s2076_s1 + $0x18] sm:$0xff]  ;;  %v1365_v20 = vld [vmem:[%s2076_s1 + $0x10] sm:$0xff] }
   0x6   :  { %534 = vmatpush.bf16.msra.mxu0 %v1369_v4  ;;  %v1375_v13 = vld [vmem:[%s2076_s1 + $0x60] sm:$0xff]  ;;  %v1374_v17 = vld [vmem:[%s2076_s1 + $0x58] sm:$0xff]  ;;  %v1373_v21 = vld [vmem:[%s2076_s1 + $0x50] sm:$0xff] }
   0x7   :  { %598 = vmatpush.bf16.msra.mxu1 %v1377_v5  ;;  %v1383_v14 = vld [vmem:[%s2076_s1 + $0xa0] sm:$0xff]  ;;  %v1382_v18 = vld [vmem:[%s2076_s1 + $0x98] sm:$0xff]  ;;  %v1381_v22 = vld [vmem:[%s2076_s1 + $0x90] sm:$0xff] }
   0x8   :  { %662 = vmatpush.bf16.msra.mxu2 %v1385_v6  ;;  %v1391_v15 = vld [vmem:[%s2076_s1 + $0xe0] sm:$0xff]  ;;  %v1390_v19 = vld [vmem:[%s2076_s1 + $0xd8] sm:$0xff]  ;;  %v1389_v23 = vld [vmem:[%s2076_s1 + $0xd0] sm:$0xff] }
   0x9   :  { %726 = vmatpush.bf16.msra.mxu3 %v1393_v7  ;;  %v1364_v24 = vld [vmem:[%s2076_s1 + $0x8] sm:$0xff]  ;;  %v1363_v28 = vld [vmem:[%s2076_s1] sm:$0xff]  ;;  %v1321_v33 = vld [vmem:[%s2077_s0 + $0xc] sm:$0xf0] }
   0xa   :  { %535 = vmatpush.bf16.msra.mxu0 %v1368_v8  ;;  %v1372_v25 = vld [vmem:[%s2076_s1 + $0x48] sm:$0xff]  ;;  %v1371_v29 = vld [vmem:[%s2076_s1 + $0x40] sm:$0xff]  ;;  %v1019_v35 = vld [vmem:[%s2077_s0 + $0x10] sm:$0xf0] }
   0xb   :  { %599 = vmatpush.bf16.msra.mxu1 %v1376_v9  ;;  %v1380_v26 = vld [vmem:[%s2076_s1 + $0x88] sm:$0xff]  ;;  %v1379_v30 = vld [vmem:[%s2076_s1 + $0x80] sm:$0xff]  ;;  %v1322_v37 = vld [vmem:[%s2077_s0 + $0x14] sm:$0xf0] }
   0xc   :  { %663 = vmatpush.bf16.msra.mxu2 %v1384_v10  ;;  %v1388_v27 = vld [vmem:[%s2076_s1 + $0xc8] sm:$0xff]  ;;  %v1387_v31 = vld [vmem:[%s2076_s1 + $0xc0] sm:$0xff]  ;;  %v1027_v39 = vld [vmem:[%s2077_s0 + $0x18] sm:$0xf0] }
   0xd   :  { %727 = vmatpush.bf16.msra.mxu3 %v1392_v11  ;;  %v1017_v32 = vld [vmem:[%s2077_s0] sm:$0xf]  ;;  %v1319_v34 = vld [vmem:[%s2077_s0 + $0x4] sm:$0xf]  ;;  %v1025_v36 = vld [vmem:[%s2077_s0 + $0x8] sm:$0xf] }
   0xe   :  { %536 = vmatpush.bf16.msra.mxu0 %v1367_v12  ;;  %v1320_v38 = vld [vmem:[%s2077_s0 + $0xc] sm:$0xf]  ;;  %v1018_v40 = vor.u32 %v1321_v33, %v1017_v32  ;;  %v1022_v41 = vor.u32 %v1319_v34, %v1019_v35  ;;  %v1026_v42 = vor.u32 %v1322_v37, %v1025_v36  ;;  %v1033_v44 = vld [vmem:[%s2077_s0 + $0x20] sm:$0xf]  ;;  %v1325_v45 = vld [vmem:[%s2077_s0 + $0x2c] sm:$0xf0] }
   0xf   :  { %600 = vmatpush.bf16.msra.mxu1 %v1375_v13  ;;  %v1030_v43 = vor.u32 %v1320_v38, %v1027_v39  ;;  %v1323_v46 = vld [vmem:[%s2077_s0 + $0x24] sm:$0xf]  ;;  %v1035_v47 = vld [vmem:[%s2077_s0 + $0x30] sm:$0xf0]  ;;  %v1041_v48 = vld [vmem:[%s2077_s0 + $0x28] sm:$0xf]  ;;  %v1034_v52 = vor.u32 %v1325_v45, %v1033_v44 }
  0x10   :  { %664 = vmatpush.bf16.msra.mxu2 %v1383_v14  ;;  %v1326_v49 = vld [vmem:[%s2077_s0 + $0x34] sm:$0xf0]  ;;  %v1324_v50 = vld [vmem:[%s2077_s0 + $0x2c] sm:$0xf]  ;;  %v1043_v51 = vld [vmem:[%s2077_s0 + $0x38] sm:$0xf0]  ;;  %v1038_v53 = vor.u32 %v1323_v46, %v1035_v47 }
  0x11   :  { %728 = vmatpush.bf16.msra.mxu3 %v1391_v15  ;;  %v1042_v54 = vor.u32 %v1326_v49, %v1041_v48  ;;  %v1046_v55 = vor.u32 %v1324_v50, %v1043_v51  ;;  %v1049_v56 = vld [vmem:[%s2077_s0 + $0x40] sm:$0xf]  ;;  %v1329_v57 = vld [vmem:[%s2077_s0 + $0x4c] sm:$0xf0]  ;;  %v1327_v58 = vld [vmem:[%s2077_s0 + $0x44] sm:$0xf] }
  0x12   :  { %537 = vmatpush.bf16.msra.mxu0 %v1366_v16  ;;  %v1051_v59 = vld [vmem:[%s2077_s0 + $0x50] sm:$0xf0]  ;;  %v1057_v60 = vld [vmem:[%s2077_s0 + $0x48] sm:$0xf]  ;;  %v1330_v61 = vld [vmem:[%s2077_s0 + $0x54] sm:$0xf0]  ;;  %v1050_v0 = vor.u32 %v1329_v57, %v1049_v56 }
  0x13   :  { %601 = vmatpush.bf16.msra.mxu1 %v1374_v17  ;;  %v1328_v62 = vld [vmem:[%s2077_s0 + $0x4c] sm:$0xf]  ;;  %v1059_v63 = vld [vmem:[%s2077_s0 + $0x58] sm:$0xf0]  ;;  %v1054_v1 = vor.u32 %v1327_v58, %v1051_v59  ;;  %v1058_v2 = vor.u32 %v1330_v61, %v1057_v60  ;;  %v1065_v4 = vld [vmem:[%s2077_s0 + $0x60] sm:$0xf] }
  0x14   :  { %665 = vmatpush.bf16.msra.mxu2 %v1382_v18  ;;  %v1062_v3 = vor.u32 %v1328_v62, %v1059_v63  ;;  %v1333_v5 = vld [vmem:[%s2077_s0 + $0x6c] sm:$0xf0]  ;;  %v1331_v6 = vld [vmem:[%s2077_s0 + $0x64] sm:$0xf]  ;;  %v1067_v7 = vld [vmem:[%s2077_s0 + $0x70] sm:$0xf0] }
  0x15   :  { %729 = vmatpush.bf16.msra.mxu3 %v1390_v19  ;;  %v1073_v8 = vld [vmem:[%s2077_s0 + $0x68] sm:$0xf]  ;;  %v1334_v9 = vld [vmem:[%s2077_s0 + $0x74] sm:$0xf0]  ;;  %v1332_v10 = vld [vmem:[%s2077_s0 + $0x6c] sm:$0xf]  ;;  %v1066_v12 = vor.u32 %v1333_v5, %v1065_v4  ;;  %v1070_v13 = vor.u32 %v1331_v6, %v1067_v7 }
  0x16   :  { %538 = vmatpush.bf16.msra.mxu0 %v1365_v20  ;;  %v1075_v11 = vld [vmem:[%s2077_s0 + $0x78] sm:$0xf0]  ;;  %v1074_v14 = vor.u32 %v1334_v9, %v1073_v8  ;;  %v1081_v16 = vld [vmem:[%s2077_s0 + $0x80] sm:$0xf]  ;;  %v1337_v17 = vld [vmem:[%s2077_s0 + $0x8c] sm:$0xf0] }
  0x17   :  { %602 = vmatpush.bf16.msra.mxu1 %v1373_v21  ;;  %v1078_v15 = vor.u32 %v1332_v10, %v1075_v11  ;;  %v1335_v18 = vld [vmem:[%s2077_s0 + $0x84] sm:$0xf]  ;;  %v1083_v19 = vld [vmem:[%s2077_s0 + $0x90] sm:$0xf0]  ;;  %v1089_v20 = vld [vmem:[%s2077_s0 + $0x88] sm:$0xf] }
  0x18   :  { %666 = vmatpush.bf16.msra.mxu2 %v1381_v22  ;;  %v1338_v21 = vld [vmem:[%s2077_s0 + $0x94] sm:$0xf0]  ;;  %v1336_v22 = vld [vmem:[%s2077_s0 + $0x8c] sm:$0xf]  ;;  %v1105_v32 = vld [vmem:[%s2077_s0 + $0xa8] sm:$0xf] }
  0x19   :  { %730 = vmatpush.bf16.msra.mxu3 %v1389_v23  ;;  %v1091_v23 = vld [vmem:[%s2077_s0 + $0x98] sm:$0xf0]  ;;  %v1342_v33 = vld [vmem:[%s2077_s0 + $0xb4] sm:$0xf0]  ;;  %v1340_v34 = vld [vmem:[%s2077_s0 + $0xac] sm:$0xf] }
  0x1a   :  { %539 = vmatpush.bf16.msra.mxu0 %v1364_v24  ;;  %v1082_v24 = vor.u32 %v1337_v17, %v1081_v16  ;;  %v1107_v35 = vld [vmem:[%s2077_s0 + $0xb8] sm:$0xf0]  ;;  %v1106_v38 = vor.u32 %v1342_v33, %v1105_v32  ;;  %v1121_v44 = vld [vmem:[%s2077_s0 + $0xc8] sm:$0xf]  ;;  %v1346_v45 = vld [vmem:[%s2077_s0 + $0xd4] sm:$0xf0] }
  0x1b   :  { %603 = vmatpush.bf16.msra.mxu1 %v1372_v25  ;;  %v1086_v25 = vor.u32 %v1335_v18, %v1083_v19  ;;  %v1110_v39 = vor.u32 %v1340_v34, %v1107_v35  ;;  %v1344_v46 = vld [vmem:[%s2077_s0 + $0xcc] sm:$0xf]  ;;  %v1123_v47 = vld [vmem:[%s2077_s0 + $0xd8] sm:$0xf0]  ;;  %v1122_v50 = vor.u32 %v1346_v45, %v1121_v44  ;;  %v1137_v56 = vld [vmem:[%s2077_s0 + $0xe8] sm:$0xf] }
  0x1c   :  { %667 = vmatpush.bf16.msra.mxu2 %v1380_v26  ;;  %v1090_v26 = vor.u32 %v1338_v21, %v1089_v20  ;;  %v1126_v51 = vor.u32 %v1344_v46, %v1123_v47  ;;  %v1350_v57 = vld [vmem:[%s2077_s0 + $0xf4] sm:$0xf0]  ;;  %v1348_v58 = vld [vmem:[%s2077_s0 + $0xec] sm:$0xf]  ;;  %v1139_v59 = vld [vmem:[%s2077_s0 + $0xf8] sm:$0xf0] }
  0x1d   :  { %731 = vmatpush.bf16.msra.mxu3 %v1388_v27  ;;  %v1094_v27 = vor.u32 %v1336_v22, %v1091_v23  ;;  %v1138_v62 = vor.u32 %v1350_v57, %v1137_v56  ;;  %v1142_v63 = vor.u32 %v1348_v58, %v1139_v59  ;;  %v1153_v4 = vld [vmem:[%s2077_s0 + $0x108] sm:$0xf]  ;;  %v1354_v5 = vld [vmem:[%s2077_s0 + $0x114] sm:$0xf0]  ;;  %v1352_v6 = vld [vmem:[%s2077_s0 + $0x10c] sm:$0xf] }
  0x1e   :  { %540 = vmatpush.bf16.msra.mxu0 %v1363_v28  ;;  %v1097_v28 = vld [vmem:[%s2077_s0 + $0xa0] sm:$0xf]  ;;  %v1155_v7 = vld [vmem:[%s2077_s0 + $0x118] sm:$0xf0]  ;;  %v1357_v22 = vld [vmem:[%s2077_s0 + $0x12c] sm:$0xf0] }
  0x1f   :  { %604 = vmatpush.bf16.msra.mxu1 %v1371_v29  ;;  %v1341_v29 = vld [vmem:[%s2077_s0 + $0xac] sm:$0xf0]  ;;  %v1161_v21 = vld [vmem:[%s2077_s0 + $0x120] sm:$0xf]  ;;  %v1360_v56 = vld [vmem:[%s2077_s0 + $0x14c] sm:$0xf] }
  0x20   :  { %668 = vmatpush.bf16.msra.mxu2 %v1379_v30  ;;  %v1339_v30 = vld [vmem:[%s2077_s0 + $0xa4] sm:$0xf]  ;;  %v1098_v36 = vor.u32 %v1341_v29, %v1097_v28  ;;  %v1356_v28 = vld [vmem:[%s2077_s0 + $0x12c] sm:$0xf]  ;;  %v1171_v29 = vld [vmem:[%s2077_s0 + $0x138] sm:$0xf0]  ;;  %v1162_v33 = vor.u32 %v1357_v22, %v1161_v21 }
  0x21   :  { %732 = vmatpush.bf16.msra.mxu3 %v1387_v31  ;;  %541 = vmatmul.bf16.vlgmr.msra.gmra.mxu0 %v1018_v40  ;;  %v1099_v31 = vld [vmem:[%s2077_s0 + $0xb0] sm:$0xf0]  ;;  %v1113_v40 = vld [vmem:[%s2077_s0 + $0xc0] sm:$0xf]  ;;  %v1187_v57 = vld [vmem:[%s2077_s0 + $0x158] sm:$0xf0] }
  0x22   :  { %605 = vmatmul.bf16.vlgmr.msra.gmra.mxu1 %v1022_v41  ;;  %v1102_v37 = vor.u32 %v1339_v30, %v1099_v31  ;;  %v1345_v41 = vld [vmem:[%s2077_s0 + $0xcc] sm:$0xf0] }
  0x23   :  { %669 = vmatmul.bf16.vlgmr.msra.gmra.mxu2 %v1026_v42  ;;  %v1343_v42 = vld [vmem:[%s2077_s0 + $0xc4] sm:$0xf]  ;;  %v1114_v48 = vor.u32 %v1345_v41, %v1113_v40 }
  0x24   :  { %733 = vmatmul.bf16.vlgmr.msra.gmra.mxu3 %v1030_v43  ;;  %v1115_v43 = vld [vmem:[%s2077_s0 + $0xd0] sm:$0xf0] }
  0x25   :  { %v1118_v49 = vor.u32 %v1343_v42, %v1115_v43 }
  0x31   :  { %546 = vmatmul.bf16.gmra.mxu0 %v1034_v52  ;;  %v1129_v52 = vld [vmem:[%s2077_s0 + $0xe0] sm:$0xf] }
  0x32   :  { %610 = vmatmul.bf16.gmra.mxu1 %v1038_v53  ;;  %v1349_v53 = vld [vmem:[%s2077_s0 + $0xec] sm:$0xf0] }
  0x33   :  { %674 = vmatmul.bf16.gmra.mxu2 %v1042_v54  ;;  %v1347_v54 = vld [vmem:[%s2077_s0 + $0xe4] sm:$0xf]  ;;  %v1130_v60 = vor.u32 %v1349_v53, %v1129_v52  ;;  %v1179_v53 = vld [vmem:[%s2077_s0 + $0x150] sm:$0xf0] }
  0x34   :  { %738 = vmatmul.bf16.gmra.mxu3 %v1046_v55  ;;  %v1131_v55 = vld [vmem:[%s2077_s0 + $0xf0] sm:$0xf0]  ;;  %v1359_v52 = vld [vmem:[%s2077_s0 + $0x144] sm:$0xf] }
  0x35   :  { %v1134_v61 = vor.u32 %v1347_v54, %v1131_v55  ;;  %v1185_v54 = vld [vmem:[%s2077_s0 + $0x148] sm:$0xf]  ;;  %v1362_v55 = vld [vmem:[%s2077_s0 + $0x154] sm:$0xf0] }
  0x41   :  { %551 = vmatmul.bf16.gmra.mxu0 %v1050_v0  ;;  %v1145_v0 = vld [vmem:[%s2077_s0 + $0x100] sm:$0xf] }
  0x42   :  { %615 = vmatmul.bf16.gmra.mxu1 %v1054_v1  ;;  %v1353_v1 = vld [vmem:[%s2077_s0 + $0x10c] sm:$0xf0] }
  0x43   :  { %679 = vmatmul.bf16.gmra.mxu2 %v1058_v2  ;;  %v1351_v2 = vld [vmem:[%s2077_s0 + $0x104] sm:$0xf]  ;;  %v1146_v8 = vor.u32 %v1353_v1, %v1145_v0 }
  0x44   :  { %743 = vmatmul.bf16.gmra.mxu3 %v1062_v3  ;;  %v1147_v3 = vld [vmem:[%s2077_s0 + $0x110] sm:$0xf0] }
  0x45   :  { %v1150_v9 = vor.u32 %v1351_v2, %v1147_v3  ;;  %v1186_v2 = vor.u32 %v1362_v55, %v1185_v54  ;;  %v1190_v3 = vor.u32 %v1360_v56, %v1187_v57 }
  0x51   :  { %556 = vmatmul.bf16.gmra.mxu0 %v1066_v12  ;;  %v1154_v12 = vor.u32 %v1354_v5, %v1153_v4 }
  0x52   :  { %620 = vmatmul.bf16.gmra.mxu1 %v1070_v13  ;;  %v1158_v13 = vor.u32 %v1352_v6, %v1155_v7 }
  0x53   :  { %684 = vmatmul.bf16.gmra.mxu2 %v1074_v14 }
  0x54   :  { %748 = vmatmul.bf16.gmra.mxu3 %v1078_v15 }
  0x61   :  { %561 = vmatmul.bf16.gmra.mxu0 %v1082_v24  ;;  %v1355_v24 = vld [vmem:[%s2077_s0 + $0x124] sm:$0xf] }
  0x62   :  { %625 = vmatmul.bf16.gmra.mxu1 %v1086_v25  ;;  %v1163_v25 = vld [vmem:[%s2077_s0 + $0x130] sm:$0xf0] }
  0x63   :  { %689 = vmatmul.bf16.gmra.mxu2 %v1090_v26  ;;  %v1169_v26 = vld [vmem:[%s2077_s0 + $0x128] sm:$0xf]  ;;  %v1166_v34 = vor.u32 %v1355_v24, %v1163_v25 }
  0x64   :  { %753 = vmatmul.bf16.gmra.mxu3 %v1094_v27  ;;  %v1358_v27 = vld [vmem:[%s2077_s0 + $0x134] sm:$0xf0] }
  0x71   :  { %566 = vmatmul.bf16.gmra.mxu0 %v1098_v36 }
  0x72   :  { %630 = vmatmul.bf16.gmra.mxu1 %v1102_v37 }
  0x73   :  { %694 = vmatmul.bf16.gmra.mxu2 %v1106_v38  ;;  %v1170_v38 = vor.u32 %v1358_v27, %v1169_v26 }
  0x74   :  { %758 = vmatmul.bf16.gmra.mxu3 %v1110_v39  ;;  %v1174_v39 = vor.u32 %v1356_v28, %v1171_v29 }
  0x81   :  { %571 = vmatmul.bf16.gmra.mxu0 %v1114_v48 }
  0x82   :  { %635 = vmatmul.bf16.gmra.mxu1 %v1118_v49  ;;  %v1177_v49 = vld [vmem:[%s2077_s0 + $0x140] sm:$0xf] }
  0x83   :  { %699 = vmatmul.bf16.gmra.mxu2 %v1122_v50  ;;  %v1361_v50 = vld [vmem:[%s2077_s0 + $0x14c] sm:$0xf0] }
  0x84   :  { %763 = vmatmul.bf16.gmra.mxu3 %v1126_v51 }
  0x91   :  { %576 = vmatmul.bf16.gmra.mxu0 %v1130_v60 }
  0x92   :  { %640 = vmatmul.bf16.gmra.mxu1 %v1134_v61  ;;  %v1178_v61 = vor.u32 %v1361_v50, %v1177_v49 }
  0x93   :  { %704 = vmatmul.bf16.gmra.mxu2 %v1138_v62  ;;  %v1182_v62 = vor.u32 %v1359_v52, %v1179_v53 }
  0x94   :  { %768 = vmatmul.bf16.gmra.mxu3 %v1142_v63 }
  0x9e   :  { %v542_v10 = vpop.f32.mrf.mxu0 }
  0x9f   :  { %v606_v11 = vpop.f32.mrf.mxu1 }
  0xa0   :  { %v607_v14 = vadd.f32 %v606_v11, %v542_v10 }
  0xa1   :  { %581 = vmatmul.bf16.gmra.mxu0 %v1146_v8 }
  0xa2   :  { %645 = vmatmul.bf16.gmra.mxu1 %v1150_v9 }
  0xa3   :  { %709 = vmatmul.bf16.gmra.mxu2 %v1154_v12 }
  0xa4   :  { %773 = vmatmul.bf16.gmra.mxu3 %v1158_v13 }
  0xa6   :  { %v670_v15 = vpop.f32.mrf.mxu2  ;;  %v544_v18 = vpop.f32.mrf.mxu0 }
  0xa7   :  { %v734_v16 = vpop.f32.mrf.mxu3  ;;  %v671_v17 = vadd.f32 %v670_v15, %v607_v14  ;;  %v608_v19 = vpop.f32.mrf.mxu1 }
  0xa8   :  { %v609_v30 = vadd.f32 %v608_v19, %v544_v18 }
  0xa9   :  { %v1731_v20 = vadd.f32 %v734_v16, %v671_v17 }
  0xab   :  { %v789_v23 = vpack.c.bf16 %v1731_v20, %v1731_v20 }
  0xad   :  { %812 = vst.msk [vmem:[%s2078_s2] sm:$0xf] %vm811_vm0, %v789_v23 }
  0xae   :  { %v672_v31 = vpop.f32.mrf.mxu2  ;;  %v547_v36 = vpop.f32.mrf.mxu0 }
  0xaf   :  { %v736_v32 = vpop.f32.mrf.mxu3  ;;  %v673_v35 = vadd.f32 %v672_v31, %v609_v30  ;;  %v611_v37 = vpop.f32.mrf.mxu1 }
  0xb0   :  { %v612_v42 = vadd.f32 %v611_v37, %v547_v36 }
  0xb1   :  { %v1763_v40 = vadd.f32 %v736_v32, %v673_v35  ;;  %586 = vmatmul.bf16.gmra.mxu0 %v1162_v33 }
  0xb2   :  { %650 = vmatmul.bf16.gmra.mxu1 %v1166_v34 }
  0xb3   :  { %v790_v41 = vpack.c.bf16 %v1763_v40, %v1763_v40  ;;  %714 = vmatmul.bf16.gmra.mxu2 %v1170_v38 }
  0xb4   :  { %778 = vmatmul.bf16.gmra.mxu3 %v1174_v39 }
  0xb5   :  { %813 = vst.msk [vmem:[%s2078_s2 + $0x4] sm:$0xf] %vm811_vm0, %v790_v41 }
  0xb6   :  { %v675_v43 = vpop.f32.mrf.mxu2  ;;  %v549_v46 = vpop.f32.mrf.mxu0 }
  0xb7   :  { %v739_v44 = vpop.f32.mrf.mxu3  ;;  %v676_v45 = vadd.f32 %v675_v43, %v612_v42  ;;  %v613_v47 = vpop.f32.mrf.mxu1 }
  0xb8   :  { %v614_v58 = vadd.f32 %v613_v47, %v549_v46 }
  0xb9   :  { %v1771_v48 = vadd.f32 %v739_v44, %v676_v45 }
  0xbb   :  { %v791_v51 = vpack.c.bf16 %v1771_v48, %v1771_v48 }
  0xbd   :  { %814 = vst.msk [vmem:[%s2078_s2 + $0x8] sm:$0xf] %vm811_vm0, %v791_v51 }
  0xbe   :  { %v677_v59 = vpop.f32.mrf.mxu2  ;;  %v552_v0 = vpop.f32.mrf.mxu0 }
  0xbf   :  { %v741_v60 = vpop.f32.mrf.mxu3  ;;  %v678_v63 = vadd.f32 %v677_v59, %v614_v58  ;;  %v616_v1 = vpop.f32.mrf.mxu1 }
  0xc0   :  { %v617_v6 = vadd.f32 %v616_v1, %v552_v0 }
  0xc1   :  { %v1803_v4 = vadd.f32 %v741_v60, %v678_v63  ;;  %591 = vmatmul.bf16.gmra.mxu0 %v1178_v61 }
  0xc2   :  { %655 = vmatmul.bf16.gmra.mxu1 %v1182_v62 }
  0xc3   :  { %v792_v5 = vpack.c.bf16 %v1803_v4, %v1803_v4  ;;  %719 = vmatmul.bf16.gmra.mxu2 %v1186_v2 }
  0xc4   :  { %783 = vmatmul.bf16.gmra.mxu3 %v1190_v3 }
  0xc5   :  { %815 = vst.msk [vmem:[%s2078_s2 + $0xc] sm:$0xf] %vm811_vm0, %v792_v5 }
  0xc6   :  { %v680_v7 = vpop.f32.mrf.mxu2  ;;  %v554_v10 = vpop.f32.mrf.mxu0 }
  0xc7   :  { %v744_v8 = vpop.f32.mrf.mxu3  ;;  %v681_v9 = vadd.f32 %v680_v7, %v617_v6  ;;  %v618_v11 = vpop.f32.mrf.mxu1 }
  0xc8   :  { %v619_v14 = vadd.f32 %v618_v11, %v554_v10 }
  0xc9   :  { %v1811_v12 = vadd.f32 %v744_v8, %v681_v9 }
  0xcb   :  { %v793_v13 = vpack.c.bf16 %v1811_v12, %v1811_v12 }
  0xcd   :  { %816 = vst.msk [vmem:[%s2078_s2 + $0x10] sm:$0xf] %vm811_vm0, %v793_v13 }
  0xce   :  { %v682_v15 = vpop.f32.mrf.mxu2  ;;  %v557_v18 = vpop.f32.mrf.mxu0 }
  0xcf   :  { %v746_v16 = vpop.f32.mrf.mxu3  ;;  %v683_v17 = vadd.f32 %v682_v15, %v619_v14  ;;  %v621_v19 = vpop.f32.mrf.mxu1 }
  0xd0   :  { %v622_v23 = vadd.f32 %v621_v19, %v557_v18 }
  0xd1   :  { %v1819_v21 = vadd.f32 %v746_v16, %v683_v17 }
  0xd3   :  { %v794_v22 = vpack.c.bf16 %v1819_v21, %v1819_v21 }
  0xd5   :  { %817 = vst.msk [vmem:[%s2078_s2 + $0x14] sm:$0xf] %vm811_vm0, %v794_v22 }
  0xd6   :  { %v685_v24 = vpop.f32.mrf.mxu2  ;;  %v559_v27 = vpop.f32.mrf.mxu0 }
  0xd7   :  { %v749_v25 = vpop.f32.mrf.mxu3  ;;  %v686_v26 = vadd.f32 %v685_v24, %v622_v23  ;;  %v623_v28 = vpop.f32.mrf.mxu1 }
  0xd8   :  { %v624_v31 = vadd.f32 %v623_v28, %v559_v27 }
  0xd9   :  { %v1827_v29 = vadd.f32 %v749_v25, %v686_v26 }
  0xdb   :  { %v795_v30 = vpack.c.bf16 %v1827_v29, %v1827_v29 }
  0xdd   :  { %818 = vst.msk [vmem:[%s2078_s2 + $0x18] sm:$0xf] %vm811_vm0, %v795_v30 }
  0xde   :  { %v687_v32 = vpop.f32.mrf.mxu2  ;;  %v562_v35 = vpop.f32.mrf.mxu0 }
  0xdf   :  { %v751_v33 = vpop.f32.mrf.mxu3  ;;  %v688_v34 = vadd.f32 %v687_v32, %v624_v31  ;;  %v626_v36 = vpop.f32.mrf.mxu1 }
  0xe0   :  { %v627_v39 = vadd.f32 %v626_v36, %v562_v35 }
  0xe1   :  { %v1835_v37 = vadd.f32 %v751_v33, %v688_v34 }
  0xe3   :  { %v796_v38 = vpack.c.bf16 %v1835_v37, %v1835_v37 }
  0xe5   :  { %819 = vst.msk [vmem:[%s2078_s2 + $0x1c] sm:$0xf] %vm811_vm0, %v796_v38 }
  0xe6   :  { %v690_v41 = vpop.f32.mrf.mxu2  ;;  %v564_v44 = vpop.f32.mrf.mxu0 }
  0xe7   :  { %v754_v42 = vpop.f32.mrf.mxu3  ;;  %v691_v43 = vadd.f32 %v690_v41, %v627_v39  ;;  %v628_v45 = vpop.f32.mrf.mxu1 }
  0xe8   :  { %v629_v49 = vadd.f32 %v628_v45, %v564_v44 }
  0xe9   :  { %v1843_v46 = vadd.f32 %v754_v42, %v691_v43 }
  0xeb   :  { %v797_v47 = vpack.c.bf16 %v1843_v46, %v1843_v46 }
  0xed   :  { %820 = vst.msk [vmem:[%s2078_s2 + $0x20] sm:$0xf] %vm811_vm0, %v797_v47 }
  0xee   :  { %v692_v50 = vpop.f32.mrf.mxu2  ;;  %v567_v53 = vpop.f32.mrf.mxu0 }
  0xef   :  { %v756_v51 = vpop.f32.mrf.mxu3  ;;  %v693_v52 = vadd.f32 %v692_v50, %v629_v49  ;;  %v631_v54 = vpop.f32.mrf.mxu1 }
  0xf0   :  { %v632_v57 = vadd.f32 %v631_v54, %v567_v53 }
  0xf1   :  { %v1851_v55 = vadd.f32 %v756_v51, %v693_v52 }
  0xf3   :  { %v798_v56 = vpack.c.bf16 %v1851_v55, %v1851_v55 }
  0xf5   :  { %821 = vst.msk [vmem:[%s2078_s2 + $0x24] sm:$0xf] %vm811_vm0, %v798_v56 }
  0xf6   :  { %v695_v58 = vpop.f32.mrf.mxu2  ;;  %v569_v61 = vpop.f32.mrf.mxu0 }
  0xf7   :  { %v759_v59 = vpop.f32.mrf.mxu3  ;;  %v696_v60 = vadd.f32 %v695_v58, %v632_v57  ;;  %v633_v62 = vpop.f32.mrf.mxu1  ;;  %v841_v57 = vsel %vm839_vm1, %v1763_v40, 0.0 }
  0xf8   :  { %v634_v1 = vadd.f32 %v633_v62, %v569_v61 }
  0xf9   :  { %v1859_v63 = vadd.f32 %v759_v59, %v696_v60  ;;  %v840_v59 = vsel %vm839_vm1, %v1731_v20, 0.0  ;;  %v843_v60 = vsel %vm839_vm1, %v1771_v48, 0.0 }
  0xfa   :  { %v842_v62 = vadd.f32 %v841_v57, %v840_v59 }
  0xfb   :  { %v799_v0 = vpack.c.bf16 %v1859_v63, %v1859_v63 }
  0xfd   :  { %822 = vst.msk [vmem:[%s2078_s2 + $0x28] sm:$0xf] %vm811_vm0, %v799_v0  ;;  %v845_v0 = vsel %vm839_vm1, %v1803_v4, 0.0 }
  0xfe   :  { %v697_v2 = vpop.f32.mrf.mxu2  ;;  %v572_v6 = vpop.f32.mrf.mxu0 }
  0xff   :  { %v761_v3 = vpop.f32.mrf.mxu3  ;;  %v698_v5 = vadd.f32 %v697_v2, %v634_v1  ;;  %v636_v7 = vpop.f32.mrf.mxu1  ;;  %v844_v2 = vadd.f32 %v843_v60, %v842_v62 }
 0x100   :  { %v637_v10 = vadd.f32 %v636_v7, %v572_v6  ;;  %v847_v6 = vsel %vm839_vm1, %v1811_v12, 0.0 }
 0x101   :  { %v1867_v8 = vadd.f32 %v761_v3, %v698_v5 }
 0x103   :  { %v800_v9 = vpack.c.bf16 %v1867_v8, %v1867_v8 }
 0x105   :  { %823 = vst.msk [vmem:[%s2078_s2 + $0x2c] sm:$0xf] %vm811_vm0, %v800_v9 }
 0x106   :  { %v700_v11 = vpop.f32.mrf.mxu2  ;;  %v574_v15 = vpop.f32.mrf.mxu0 }
 0x107   :  { %v764_v13 = vpop.f32.mrf.mxu3  ;;  %v701_v14 = vadd.f32 %v700_v11, %v637_v10  ;;  %v638_v16 = vpop.f32.mrf.mxu1  ;;  %v846_v11 = vadd.f32 %v845_v0, %v844_v2 }
 0x108   :  { %v639_v19 = vadd.f32 %v638_v16, %v574_v15  ;;  %v851_v16 = vsel %vm839_vm1, %v1827_v29, 0.0 }
 0x109   :  { %v1875_v17 = vadd.f32 %v764_v13, %v701_v14  ;;  %v849_v13 = vsel %vm839_vm1, %v1819_v21, 0.0  ;;  %v848_v15 = vadd.f32 %v847_v6, %v846_v11 }
 0x10b   :  { %v801_v18 = vpack.c.bf16 %v1875_v17, %v1875_v17 }
 0x10d   :  { %824 = vst.msk [vmem:[%s2078_s2 + $0x30] sm:$0xf] %vm811_vm0, %v801_v18 }
 0x10e   :  { %v702_v22 = vpop.f32.mrf.mxu2  ;;  %v577_v25 = vpop.f32.mrf.mxu0 }
 0x10f   :  { %v766_v23 = vpop.f32.mrf.mxu3  ;;  %v703_v24 = vadd.f32 %v702_v22, %v639_v19  ;;  %v641_v26 = vpop.f32.mrf.mxu1  ;;  %v850_v22 = vadd.f32 %v849_v13, %v848_v15 }
 0x110   :  { %v642_v30 = vadd.f32 %v641_v26, %v577_v25 }
 0x111   :  { %v1883_v27 = vadd.f32 %v766_v23, %v703_v24  ;;  %v853_v23 = vsel %vm839_vm1, %v1835_v37, 0.0  ;;  %v852_v24 = vadd.f32 %v851_v16, %v850_v22 }
 0x113   :  { %v802_v28 = vpack.c.bf16 %v1883_v27, %v1883_v27  ;;  %v865_v57 = vsel %vm839_vm1, %v1883_v27, 0.0 }
 0x115   :  { %825 = vst.msk [vmem:[%s2078_s2 + $0x34] sm:$0xf] %vm811_vm0, %v802_v28  ;;  %v855_v28 = vsel %vm839_vm1, %v1843_v46, 0.0 }
 0x116   :  { %v705_v31 = vpop.f32.mrf.mxu2  ;;  %v579_v34 = vpop.f32.mrf.mxu0 }
 0x117   :  { %v769_v32 = vpop.f32.mrf.mxu3  ;;  %v706_v33 = vadd.f32 %v705_v31, %v642_v30  ;;  %v643_v35 = vpop.f32.mrf.mxu1 }
 0x118   :  { %v644_v39 = vadd.f32 %v643_v35, %v579_v34  ;;  %v857_v34 = vsel %vm839_vm1, %v1851_v55, 0.0 }
 0x119   :  { %v1891_v36 = vadd.f32 %v769_v32, %v706_v33  ;;  %v854_v33 = vadd.f32 %v853_v23, %v852_v24 }
 0x11b   :  { %v803_v38 = vpack.c.bf16 %v1891_v36, %v1891_v36 }
 0x11d   :  { %826 = vst.msk [vmem:[%s2078_s2 + $0x38] sm:$0xf] %vm811_vm0, %v803_v38  ;;  %v856_v38 = vadd.f32 %v855_v28, %v854_v33 }
 0x11e   :  { %v707_v41 = vpop.f32.mrf.mxu2  ;;  %v582_v44 = vpop.f32.mrf.mxu0 }
 0x11f   :  { %v771_v42 = vpop.f32.mrf.mxu3  ;;  %v708_v43 = vadd.f32 %v707_v41, %v644_v39  ;;  %v646_v45 = vpop.f32.mrf.mxu1  ;;  %v859_v39 = vsel %vm839_vm1, %v1859_v63, 0.0 }
 0x120   :  { %v647_v50 = vadd.f32 %v646_v45, %v582_v44 }
 0x121   :  { %v1899_v47 = vadd.f32 %v771_v42, %v708_v43  ;;  %v858_v42 = vadd.f32 %v857_v34, %v856_v38  ;;  %v861_v43 = vsel %vm839_vm1, %v1867_v8, 0.0 }
 0x123   :  { %v804_v49 = vpack.c.bf16 %v1899_v47, %v1899_v47  ;;  %v860_v45 = vadd.f32 %v859_v39, %v858_v42  ;;  %v869_v2 = vsel %vm839_vm1, %v1899_v47, 0.0 }
 0x125   :  { %827 = vst.msk [vmem:[%s2078_s2 + $0x3c] sm:$0xf] %vm811_vm0, %v804_v49 }
 0x126   :  { %v710_v51 = vpop.f32.mrf.mxu2  ;;  %v584_v54 = vpop.f32.mrf.mxu0 }
 0x127   :  { %v774_v52 = vpop.f32.mrf.mxu3  ;;  %v711_v53 = vadd.f32 %v710_v51, %v647_v50  ;;  %v648_v56 = vpop.f32.mrf.mxu1  ;;  %v863_v51 = vsel %vm839_vm1, %v1875_v17, 0.0 }
 0x128   :  { %v649_v1 = vadd.f32 %v648_v56, %v584_v54 }
 0x129   :  { %v1909_v58 = vadd.f32 %v774_v52, %v711_v53  ;;  %v862_v53 = vadd.f32 %v861_v43, %v860_v45 }
 0x12b   :  { %v805_v61 = vpack.c.bf16 %v1909_v58, %v1909_v58  ;;  %v864_v60 = vadd.f32 %v863_v51, %v862_v53 }
 0x12d   :  { %828 = vst.msk [vmem:[%s2078_s2 + $0x40] sm:$0xf] %vm811_vm0, %v805_v61  ;;  %v867_v61 = vsel %vm839_vm1, %v1891_v36, 0.0 }
 0x12e   :  { %v712_v3 = vpop.f32.mrf.mxu2  ;;  %v587_v9 = vpop.f32.mrf.mxu0 }
 0x12f   :  { %v776_v5 = vpop.f32.mrf.mxu3  ;;  %v713_v7 = vadd.f32 %v712_v3, %v649_v1  ;;  %v651_v10 = vpop.f32.mrf.mxu1  ;;  %v866_v1 = vadd.f32 %v865_v57, %v864_v60 }
 0x130   :  { %v652_v19 = vadd.f32 %v651_v10, %v587_v9  ;;  %v1398_v10 = vmov 162.0  }
 0x131   :  { %v1927_v14 = vadd.f32 %v776_v5, %v713_v7  ;;  %v868_v3 = vadd.f32 %v867_v61, %v866_v1  ;;  %v871_v7 = vsel %vm839_vm1, %v1909_v58, 0.0  ;;  %1396 = vrcp.f32 %v1398_v10 }
 0x133   :  { %v806_v18 = vpack.c.bf16 %v1927_v14, %v1927_v14  ;;  %v870_v11 = vadd.f32 %v869_v2, %v868_v3  ;;  %v873_v13 = vsel %vm839_vm1, %v1927_v14, 0.0 }
 0x135   :  { %829 = vst.msk [vmem:[%s2078_s2 + $0x44] sm:$0xf] %vm811_vm0, %v806_v18  ;;  %v872_v16 = vadd.f32 %v871_v7, %v870_v11 }
 0x136   :  { %v715_v25 = vpop.f32.mrf.mxu2  ;;  %v589_v31 = vpop.f32.mrf.mxu0 }
 0x137   :  { %v779_v26 = vpop.f32.mrf.mxu3  ;;  %v716_v30 = vadd.f32 %v715_v25, %v652_v19  ;;  %v653_v32 = vpop.f32.mrf.mxu1  ;;  %v874_v24 = vadd.f32 %v873_v13, %v872_v16 }
 0x138   :  { %v654_v44 = vadd.f32 %v653_v32, %v589_v31  ;;  %v1397_v25 = vpop.eup %1396 }
 0x139   :  { %v1943_v35 = vadd.f32 %v779_v26, %v716_v30  ;;  %v891_v39 = vmul.f32 162.0, %v1397_v25  ;;  %vm896_vm2 = vweird.f32 %v1397_v25 }
 0x13b   :  { %v807_v41 = vpack.c.bf16 %v1943_v35, %v1943_v35  ;;  %v875_v22 = vsel %vm839_vm1, %v1943_v35, 0.0 }
 0x13c   :  { %v876_v30 = vadd.f32 %v875_v22, %v874_v24 }
 0x13d   :  { %830 = vst.msk [vmem:[%s2078_s2 + $0x48] sm:$0xf] %vm811_vm0, %v807_v41 }
 0x13e   :  { %v717_v49 = vpop.f32.mrf.mxu2  ;;  %v592_v54 = vpop.f32.mrf.mxu0 }
 0x13f   :  { %v781_v50 = vpop.f32.mrf.mxu3  ;;  %v718_v52 = vadd.f32 %v717_v49, %v654_v44  ;;  %v656_v56 = vpop.f32.mrf.mxu1  ;;  %v892_v49 = vsub.f32 1.0, %v891_v39 }
 0x140   :  { %v657_v0 = vadd.f32 %v656_v56, %v592_v54 }
 0x141   :  { %v1959_v59 = vadd.f32 %v781_v50, %v718_v52  ;;  %v893_v52 = vmul.f32 %v1397_v25, %v892_v49 }
 0x143   :  { %v808_v62 = vpack.c.bf16 %v1959_v59, %v1959_v59  ;;  %v877_v26 = vsel %vm839_vm1, %v1959_v59, 0.0  ;;  %v894_v56 = vadd.f32 %v1397_v25, %v893_v52 }
 0x144   :  { %v878_v34 = vadd.f32 %v877_v26, %v876_v30 }
 0x145   :  { %831 = vst.msk [vmem:[%s2078_s2 + $0x4c] sm:$0xf] %vm811_vm0, %v808_v62  ;;  %v898_v61 = vsel %vm896_vm2, %v1397_v25, %v894_v56 }
 0x146   :  { %v720_v5 = vpop.f32.mrf.mxu2  ;;  %v594_v18 = vpop.f32.mrf.mxu0 }
 0x147   :  { %v784_v6 = vpop.f32.mrf.mxu3  ;;  %v721_v9 = vadd.f32 %v720_v5, %v657_v0  ;;  %v658_v19 = vpop.f32.mrf.mxu1 }
 0x148   :  { %v659_v28 = vadd.f32 %v658_v19, %v594_v18 }
 0x149   :  { %v1975_v15 = vadd.f32 %v784_v6, %v721_v9 }
 0x14b   :  { %v809_v23 = vpack.c.bf16 %v1975_v15, %v1975_v15  ;;  %v879_v32 = vsel %vm839_vm1, %v1975_v15, 0.0 }
 0x14c   :  { %v880_v42 = vadd.f32 %v879_v32, %v878_v34 }
 0x14d   :  { %832 = vst.msk [vmem:[%s2078_s2 + $0x50] sm:$0xf] %vm811_vm0, %v809_v23 }
 0x14e   :  { %v722_v31 = vpop.f32.mrf.mxu2 }
 0x14f   :  { %v723_v33 = vadd.f32 %v722_v31, %v659_v28  ;;  %v786_v38 = vpop.f32.mrf.mxu3 }
 0x151   :  { %v1989_v41 = vadd.f32 %v786_v38, %v723_v33 }
 0x153   :  { %v810_v43 = vpack.c.bf16 %v1989_v41, %v1989_v41  ;;  %v881_v44 = vsel %vm839_vm1, %v1989_v41, 0.0 }
 0x154   :  { %v882_v45 = vadd.f32 %v881_v44, %v880_v42 }
 0x155   :  { %833 = vst.msk [vmem:[%s2078_s2 + $0x54] sm:$0xf] %vm811_vm0, %v810_v43 }
 0x156   :  { %v883_v50 = vrot.slane %v882_v45, 4 }
 0x158   :  { %v884_v51 = vadd.f32 %v883_v50, %v882_v45 }
 0x15a   :  { %v885_v53 = vrot.slane %v884_v51, 2 }
 0x15c   :  { %v886_v54 = vadd.f32 %v885_v53, %v884_v51 }
 0x15e   :  { %v887_v57 = vrot.slane %v886_v54, 1 }
 0x160   :  { %v1999_v60 = vadd.f32 %v887_v57, %v886_v54 }
 0x162   :  { %v2002_v62 = vmul.f32 %v898_v61, %v1999_v60 }
 0x164   :  { %v905_v0 = vsub.f32 %v1731_v20, %v2002_v62  ;;  %v906_v1 = vsub.f32 %v1763_v40, %v2002_v62  ;;  %v907_v2 = vsub.f32 %v1771_v48, %v2002_v62  ;;  %v908_v3 = vsub.f32 %v1803_v4, %v2002_v62 }
 0x165   :  { %v909_v7 = vsub.f32 %v1811_v12, %v2002_v62  ;;  %v910_v10 = vsub.f32 %v1819_v21, %v2002_v62  ;;  %v911_v48 = vsub.f32 %v1827_v29, %v2002_v62  ;;  %v912_v12 = vsub.f32 %v1835_v37, %v2002_v62 }
 0x166   :  { %v927_v5 = vmul.f32 %v905_v0, %v905_v0  ;;  %v928_v6 = vmul.f32 %v906_v1, %v906_v1  ;;  %v929_v9 = vmul.f32 %v907_v2, %v907_v2  ;;  %v930_v11 = vmul.f32 %v908_v3, %v908_v3 }
 0x167   :  { %v931_v16 = vmul.f32 %v909_v7, %v909_v7  ;;  %v932_v19 = vmul.f32 %v910_v10, %v910_v10  ;;  %v913_v23 = vsub.f32 %v1843_v46, %v2002_v62  ;;  %v933_v24 = vmul.f32 %v911_v48, %v911_v48 }
 0x168   :  { %v949_v20 = vsel %vm839_vm1, %v927_v5, 0.0  ;;  %v950_v40 = vsel %vm839_vm1, %v928_v6, 0.0  ;;  %v952_v4 = vsel %vm839_vm1, %v929_v9, 0.0  ;;  %v954_v22 = vsel %vm839_vm1, %v930_v11, 0.0 }
 0x169   :  { %v951_v13 = vadd.f32 %v950_v40, %v949_v20  ;;  %v956_v25 = vsel %vm839_vm1, %v931_v16, 0.0  ;;  %v914_v29 = vsub.f32 %v1851_v55, %v2002_v62  ;;  %v934_v28 = vmul.f32 %v912_v12, %v912_v12 }
 0x16a   :  { %v958_v30 = vsel %vm839_vm1, %v932_v19, 0.0  ;;  %v915_v37 = vsub.f32 %v1859_v63, %v2002_v62  ;;  %v935_v32 = vmul.f32 %v913_v23, %v913_v23  ;;  %v960_v33 = vsel %vm839_vm1, %v933_v24, 0.0 }
 0x16b   :  { %v953_v18 = vadd.f32 %v952_v4, %v951_v13  ;;  %v916_v46 = vsub.f32 %v1867_v8, %v2002_v62  ;;  %v936_v38 = vmul.f32 %v914_v29, %v914_v29  ;;  %v962_v39 = vsel %vm839_vm1, %v934_v28, 0.0 }
 0x16c   :  { %v917_v55 = vsub.f32 %v1875_v17, %v2002_v62  ;;  %v937_v43 = vmul.f32 %v915_v37, %v915_v37  ;;  %v964_v44 = vsel %vm839_vm1, %v935_v32, 0.0  ;;  %v918_v63 = vsub.f32 %v1883_v27, %v2002_v62 }
 0x16d   :  { %v955_v21 = vadd.f32 %v954_v22, %v953_v18  ;;  %v938_v49 = vmul.f32 %v916_v46, %v916_v46  ;;  %v966_v50 = vsel %vm839_vm1, %v936_v38, 0.0  ;;  %v919_v8 = vsub.f32 %v1891_v36, %v2002_v62 }
 0x16e   :  { %v939_v52 = vmul.f32 %v917_v55, %v917_v55  ;;  %v968_v53 = vsel %vm839_vm1, %v937_v43, 0.0  ;;  %v920_v17 = vsub.f32 %v1899_v47, %v2002_v62  ;;  %v940_v56 = vmul.f32 %v918_v63, %v918_v63 }
 0x16f   :  { %v957_v26 = vadd.f32 %v956_v25, %v955_v21  ;;  %v970_v57 = vsel %vm839_vm1, %v938_v49, 0.0  ;;  %v921_v27 = vsub.f32 %v1909_v58, %v2002_v62  ;;  %v941_v0 = vmul.f32 %v919_v8, %v919_v8 }
 0x170   :  { %v972_v1 = vsel %vm839_vm1, %v939_v52, 0.0  ;;  %v922_v36 = vsub.f32 %v1927_v14, %v2002_v62  ;;  %v942_v3 = vmul.f32 %v920_v17, %v920_v17  ;;  %v974_v5 = vsel %vm839_vm1, %v940_v56, 0.0 }
 0x171   :  { %v959_v31 = vadd.f32 %v958_v30, %v957_v26  ;;  %v923_v47 = vsub.f32 %v1943_v35, %v2002_v62  ;;  %v943_v7 = vmul.f32 %v921_v27, %v921_v27  ;;  %v976_v9 = vsel %vm839_vm1, %v941_v0, 0.0 }
 0x172   :  { %v924_v58 = vsub.f32 %v1959_v59, %v2002_v62  ;;  %v944_v11 = vmul.f32 %v922_v36, %v922_v36  ;;  %v978_v20 = vsel %vm839_vm1, %v942_v3, 0.0  ;;  %v925_v14 = vsub.f32 %v1975_v15, %v2002_v62 }
 0x173   :  { %v961_v34 = vadd.f32 %v960_v33, %v959_v31  ;;  %v945_v13 = vmul.f32 %v923_v47, %v923_v47  ;;  %v980_v48 = vsel %vm839_vm1, %v943_v7, 0.0  ;;  %v926_v35 = vsub.f32 %v1989_v41, %v2002_v62 }
 0x174   :  { %v946_v4 = vmul.f32 %v924_v58, %v924_v58  ;;  %v982_v18 = vsel %vm839_vm1, %v944_v11, 0.0  ;;  %v947_v19 = vmul.f32 %v925_v14, %v925_v14  ;;  %v999_v37 = vmul.f32 %v2002_v62, %v2002_v62 }
 0x175   :  { %v963_v42 = vadd.f32 %v962_v39, %v961_v34  ;;  %v984_v59 = vsel %vm839_vm1, %v945_v13, 0.0  ;;  %v948_v21 = vmul.f32 %v926_v35, %v926_v35 }
 0x176   :  { %v986_v23 = vsel %vm839_vm1, %v946_v4, 0.0  ;;  %v988_v15 = vsel %vm839_vm1, %v947_v19, 0.0  ;;  %v1001_v34 = vmul.f32 14.0, %v999_v37 }
 0x177   :  { %v965_v45 = vadd.f32 %v964_v44, %v963_v42  ;;  %v990_v26 = vsel %vm839_vm1, %v948_v21, 0.0 }
 0x179   :  { %v967_v51 = vadd.f32 %v966_v50, %v965_v45 }
 0x17b   :  { %v969_v54 = vadd.f32 %v968_v53, %v967_v51 }
 0x17d   :  { %v971_v61 = vadd.f32 %v970_v57, %v969_v54 }
 0x17f   :  { %v973_v2 = vadd.f32 %v972_v1, %v971_v61 }
 0x181   :  { %v975_v6 = vadd.f32 %v974_v5, %v973_v2 }
 0x183   :  { %v977_v10 = vadd.f32 %v976_v9, %v975_v6 }
 0x185   :  { %v979_v40 = vadd.f32 %v978_v20, %v977_v10 }
 0x187   :  { %v981_v16 = vadd.f32 %v980_v48, %v979_v40 }
 0x189   :  { %v983_v12 = vadd.f32 %v982_v18, %v981_v16 }
 0x18b   :  { %v985_v22 = vadd.f32 %v984_v59, %v983_v12 }
 0x18d   :  { %v987_v24 = vadd.f32 %v986_v23, %v985_v22 }
 0x18f   :  { %v989_v25 = vadd.f32 %v988_v15, %v987_v24 }
 0x191   :  { %v991_v29 = vadd.f32 %v990_v26, %v989_v25 }
 0x193   :  { %v992_v28 = vrot.slane %v991_v29, 4 }
 0x195   :  { %v993_v41 = vadd.f32 %v992_v28, %v991_v29 }
 0x197   :  { %v994_v30 = vrot.slane %v993_v41, 2 }
 0x199   :  { %v995_v31 = vadd.f32 %v994_v30, %v993_v41 }
 0x19b   :  { %v996_v32 = vrot.slane %v995_v31, 1 }
 0x19d   :  { %v997_v33 = vadd.f32 %v996_v32, %v995_v31 }
 0x19f   :  { %v1002_v46 = vsub.f32 %v997_v33, %v1001_v34 }
 0x1a1   :  { %v1004_v38 = vsel %vm1003_vm3, %v1999_v60, %v1002_v46 }
 0x1a2   :  { %1006 = vst.msk [vmem:[%s2079_s3] sm:$0x3] %vm1005_vm4, %v1004_v38 }

// kernel: atari_features_forward.6
= control target key start
LH: loop header
LB: loop body
LE: loop exit
PB: predicated region body
PF: predicated region fallthrough
CT: control target
= control target key end

     0   :  { %vm791_vm0 = vcmask 519168   ;;  %vm811_vm1 = vcmask 523264   ;;  %vm927_vm3 = vcmask 1040384   ;;  %vm929_vm4 = vcmask 517120   ;;  %s1891_s1 = inlined_call_operand.vmem [shape: bf16[640,64], index: 1, kind: input, shape index: {}]   ;;  %s1892_s0 = inlined_call_operand.vmem [shape: bf16[112,640], index: 0, kind: input, shape index: {}]   ;;  %s1893_s2 = inlined_call_operand.vmem [shape: bf16[112,64], index: 2, kind: output, shape index: {0}]   ;;  %s1894_s3 = inlined_call_operand.vmem [shape: f32[1,2,64], index: 3, kind: output, shape index: {1}]  }
   0x1   :  { %v1281_v0 = vld [vmem:[%s1891_s1 + $0x38] sm:$0xff]  ;;  %v1280_v1 = vld [vmem:[%s1891_s1 + $0x30] sm:$0xff]  ;;  %v1279_v2 = vld [vmem:[%s1891_s1 + $0x28] sm:$0xff] }
   0x2   :  { %1314 = vmatpush.bf16.msra.mxu1 %v1281_v0  ;;  %1315 = vmatpush.bf16.msra.mxu2 %v1281_v0  ;;  %v1278_v3 = vld [vmem:[%s1891_s1 + $0x20] sm:$0xff]  ;;  %v1277_v4 = vld [vmem:[%s1891_s1 + $0x18] sm:$0xff]  ;;  %v1276_v5 = vld [vmem:[%s1891_s1 + $0x10] sm:$0xff] }
   0x3   :  { %1316 = vmatpush.bf16.msra.mxu3 %v1281_v0  ;;  %557 = vmatpush.bf16.msra.mxu0 %v1281_v0  ;;  %v1275_v6 = vld [vmem:[%s1891_s1 + $0x8] sm:$0xff]  ;;  %v1274_v7 = vld [vmem:[%s1891_s1] sm:$0xff]  ;;  %v981_v8 = vld [vmem:[%s1892_s0 + $0x50] sm:$0xf] }
   0x4   :  { %v1251_v9 = vld [vmem:[%s1892_s0 + $0x60] sm:$0xf0]  ;;  %v1021_v10 = vld [vmem:[%s1892_s0 + $0xa0] sm:$0xf]  ;;  %v1261_v11 = vld [vmem:[%s1892_s0 + $0xb0] sm:$0xf0] }
   0x5   :  { %v1305_v12 = vld [vmem:[%s1891_s1 + $0xf8] sm:$0xff]  ;;  %v941_v13 = vld [vmem:[%s1892_s0] sm:$0xf]  ;;  %v1241_v14 = vld [vmem:[%s1892_s0 + $0x10] sm:$0xf0]  ;;  %v982_v18 = vor.u32 %v1251_v9, %v981_v8  ;;  %v1022_v19 = vor.u32 %v1261_v11, %v1021_v10 }
   0x6   :  { %1317 = vmatpush.bf16.msra.mxu1 %v1280_v1  ;;  %1318 = vmatpush.bf16.msra.mxu2 %v1280_v1  ;;  %v1297_v15 = vld [vmem:[%s1891_s1 + $0xb8] sm:$0xff]  ;;  %v1061_v16 = vld [vmem:[%s1892_s0 + $0xf0] sm:$0xf]  ;;  %v1271_v17 = vld [vmem:[%s1892_s0 + $0x100] sm:$0xf0]  ;;  %v942_v21 = vor.u32 %v1241_v14, %v941_v13 }
   0x7   :  { %1319 = vmatpush.bf16.msra.mxu3 %v1280_v1  ;;  %558 = vmatpush.bf16.msra.mxu0 %v1280_v1  ;;  %v1289_v20 = vld [vmem:[%s1891_s1 + $0x78] sm:$0xff]  ;;  %v1062_v23 = vor.u32 %v1271_v17, %v1061_v16  ;;  %v1304_v24 = vld [vmem:[%s1891_s1 + $0xf0] sm:$0xff]  ;;  %v1303_v28 = vld [vmem:[%s1891_s1 + $0xe8] sm:$0xff] }
   0x8   :  { %v1313_v22 = vld [vmem:[%s1891_s1 + $0x138] sm:$0xff]  ;;  %v1296_v25 = vld [vmem:[%s1891_s1 + $0xb0] sm:$0xff]  ;;  %v1295_v29 = vld [vmem:[%s1891_s1 + $0xa8] sm:$0xff] }
   0x9   :  { %v1288_v26 = vld [vmem:[%s1891_s1 + $0x70] sm:$0xff]  ;;  %v1287_v30 = vld [vmem:[%s1891_s1 + $0x68] sm:$0xff]  ;;  %v1302_v32 = vld [vmem:[%s1891_s1 + $0xe0] sm:$0xff] }
   0xa   :  { %1320 = vmatpush.bf16.msra.mxu1 %v1279_v2  ;;  %1321 = vmatpush.bf16.msra.mxu2 %v1279_v2  ;;  %v1312_v27 = vld [vmem:[%s1891_s1 + $0x130] sm:$0xff]  ;;  %v1311_v31 = vld [vmem:[%s1891_s1 + $0x128] sm:$0xff]  ;;  %v1294_v33 = vld [vmem:[%s1891_s1 + $0xa0] sm:$0xff] }
   0xb   :  { %1322 = vmatpush.bf16.msra.mxu3 %v1279_v2  ;;  %559 = vmatpush.bf16.msra.mxu0 %v1279_v2  ;;  %v1286_v34 = vld [vmem:[%s1891_s1 + $0x60] sm:$0xff]  ;;  %v1001_v35 = vld [vmem:[%s1892_s0 + $0x78] sm:$0xf]  ;;  %v1256_v36 = vld [vmem:[%s1892_s0 + $0x88] sm:$0xf0] }
   0xc   :  { %v1041_v37 = vld [vmem:[%s1892_s0 + $0xc8] sm:$0xf]  ;;  %v1266_v38 = vld [vmem:[%s1892_s0 + $0xd8] sm:$0xf0]  ;;  %v1310_v39 = vld [vmem:[%s1891_s1 + $0x120] sm:$0xff]  ;;  %v1002_v44 = vor.u32 %v1256_v36, %v1001_v35 }
   0xd   :  { %v961_v40 = vld [vmem:[%s1892_s0 + $0x28] sm:$0xf]  ;;  %v1246_v41 = vld [vmem:[%s1892_s0 + $0x38] sm:$0xf0]  ;;  %v1042_v45 = vor.u32 %v1266_v38, %v1041_v37  ;;  %v1300_v49 = vld [vmem:[%s1891_s1 + $0xd0] sm:$0xff] }
   0xe   :  { %1323 = vmatpush.bf16.msra.mxu1 %v1278_v3  ;;  %1324 = vmatpush.bf16.msra.mxu2 %v1278_v3  ;;  %v1301_v42 = vld [vmem:[%s1891_s1 + $0xd8] sm:$0xff]  ;;  %v962_v47 = vor.u32 %v1246_v41, %v961_v40  ;;  %v1292_v50 = vld [vmem:[%s1891_s1 + $0x90] sm:$0xff]  ;;  %v1299_v53 = vld [vmem:[%s1891_s1 + $0xc8] sm:$0xff] }
   0xf   :  { %1325 = vmatpush.bf16.msra.mxu3 %v1278_v3  ;;  %560 = vmatpush.bf16.msra.mxu0 %v1278_v3  ;;  %v1293_v43 = vld [vmem:[%s1891_s1 + $0x98] sm:$0xff]  ;;  %v1284_v51 = vld [vmem:[%s1891_s1 + $0x50] sm:$0xff]  ;;  %v1291_v54 = vld [vmem:[%s1891_s1 + $0x88] sm:$0xff] }
  0x10   :  { %v1285_v46 = vld [vmem:[%s1891_s1 + $0x58] sm:$0xff]  ;;  %v1308_v52 = vld [vmem:[%s1891_s1 + $0x110] sm:$0xff]  ;;  %v1283_v55 = vld [vmem:[%s1891_s1 + $0x48] sm:$0xff] }
  0x11   :  { %v1309_v48 = vld [vmem:[%s1891_s1 + $0x118] sm:$0xff]  ;;  %v1298_v56 = vld [vmem:[%s1891_s1 + $0xc0] sm:$0xff]  ;;  %v1307_v57 = vld [vmem:[%s1891_s1 + $0x108] sm:$0xff] }
  0x12   :  { %1326 = vmatpush.bf16.msra.mxu1 %v1277_v4  ;;  %1327 = vmatpush.bf16.msra.mxu2 %v1277_v4  ;;  %v1290_v58 = vld [vmem:[%s1891_s1 + $0x80] sm:$0xff]  ;;  %v1240_v59 = vld [vmem:[%s1892_s0 + $0xc] sm:$0xf]  ;;  %v943_v63 = vld [vmem:[%s1892_s0 + $0x14] sm:$0xf0] }
  0x13   :  { %1328 = vmatpush.bf16.msra.mxu3 %v1277_v4  ;;  %561 = vmatpush.bf16.msra.mxu0 %v1277_v4  ;;  %v951_v60 = vld [vmem:[%s1892_s0 + $0x1c] sm:$0xf0]  ;;  %v1239_v62 = vld [vmem:[%s1892_s0 + $0x4] sm:$0xf]  ;;  %v949_v0 = vld [vmem:[%s1892_s0 + $0x8] sm:$0xf] }
  0x14   :  { %v1282_v61 = vld [vmem:[%s1891_s1 + $0x40] sm:$0xff]  ;;  %v1242_v1 = vld [vmem:[%s1892_s0 + $0x18] sm:$0xf0]  ;;  %v954_v2 = vor.u32 %v1240_v59, %v951_v60  ;;  %v957_v4 = vld [vmem:[%s1892_s0 + $0x10] sm:$0xf] }
  0x15   :  { %v1306_v3 = vld [vmem:[%s1891_s1 + $0x100] sm:$0xff]  ;;  %v1245_v9 = vld [vmem:[%s1892_s0 + $0x34] sm:$0xf]  ;;  %v971_v10 = vld [vmem:[%s1892_s0 + $0x44] sm:$0xf0] }
  0x16   :  { %1329 = vmatpush.bf16.msra.mxu1 %v1276_v5  ;;  %1330 = vmatpush.bf16.msra.mxu2 %v1276_v5  ;;  %v1244_v11 = vld [vmem:[%s1892_s0 + $0x2c] sm:$0xf]  ;;  %v969_v13 = vld [vmem:[%s1892_s0 + $0x30] sm:$0xf]  ;;  %v1247_v14 = vld [vmem:[%s1892_s0 + $0x40] sm:$0xf0] }
  0x17   :  { %1331 = vmatpush.bf16.msra.mxu3 %v1276_v5  ;;  %562 = vmatpush.bf16.msra.mxu0 %v1276_v5  ;;  %v1243_v5 = vld [vmem:[%s1892_s0 + $0x20] sm:$0xf0]  ;;  %v977_v16 = vld [vmem:[%s1892_s0 + $0x38] sm:$0xf]  ;;  %v1248_v17 = vld [vmem:[%s1892_s0 + $0x48] sm:$0xf0] }
  0x18   :  { %v958_v8 = vor.u32 %v1243_v5, %v957_v4  ;;  %v1254_v35 = vld [vmem:[%s1892_s0 + $0x7c] sm:$0xf]  ;;  %v1003_v36 = vld [vmem:[%s1892_s0 + $0x8c] sm:$0xf0]  ;;  %v1009_v37 = vld [vmem:[%s1892_s0 + $0x80] sm:$0xf] }
  0x19   :  { %v1257_v38 = vld [vmem:[%s1892_s0 + $0x90] sm:$0xf0]  ;;  %v1017_v40 = vld [vmem:[%s1892_s0 + $0x88] sm:$0xf]  ;;  %v1258_v41 = vld [vmem:[%s1892_s0 + $0x98] sm:$0xf0] }
  0x1a   :  { %1332 = vmatpush.bf16.msra.mxu1 %v1275_v6  ;;  %1333 = vmatpush.bf16.msra.mxu2 %v1275_v6  ;;  %v1264_v59 = vld [vmem:[%s1892_s0 + $0xcc] sm:$0xf]  ;;  %v1043_v60 = vld [vmem:[%s1892_s0 + $0xdc] sm:$0xf0]  ;;  %v1270_v5 = vld [vmem:[%s1892_s0 + $0xfc] sm:$0xf] }
  0x1b   :  { %1334 = vmatpush.bf16.msra.mxu3 %v1275_v6  ;;  %563 = vmatpush.bf16.msra.mxu0 %v1275_v6  ;;  %v946_v6 = vor.u32 %v1239_v62, %v943_v63  ;;  %v1267_v62 = vld [vmem:[%s1892_s0 + $0xe0] sm:$0xf0] }
  0x1e   :  { %1335 = vmatpush.bf16.msra.mxu1 %v1274_v7  ;;  %1336 = vmatpush.bf16.msra.mxu2 %v1274_v7 }
  0x1f   :  { %1337 = vmatpush.bf16.msra.mxu3 %v1274_v7  ;;  %564 = vmatpush.bf16.msra.mxu0 %v1274_v7  ;;  %v950_v7 = vor.u32 %v1242_v1, %v949_v0  ;;  %v1057_v0 = vld [vmem:[%s1892_s0 + $0xd8] sm:$0xf]  ;;  %v1268_v1 = vld [vmem:[%s1892_s0 + $0xe8] sm:$0xf0] }
  0x20   :  { %v1058_v4 = vor.u32 %v1268_v1, %v1057_v0 }
  0x21   :  { %575 = vmatmul.bf16.vlgmr.msra.gmra.mxu1 %v982_v18  ;;  %585 = vmatmul.bf16.vlgmr.msra.gmra.mxu2 %v1022_v19  ;;  %v970_v19 = vor.u32 %v1247_v14, %v969_v13  ;;  %v1273_v13 = vld [vmem:[%s1892_s0 + $0x110] sm:$0xf0] }
  0x22   :  { %645 = vmatpush.bf16.msrb.mxu2 %v1297_v15  ;;  %601 = vmatpush.bf16.msrb.mxu1 %v1289_v20  ;;  %v974_v15 = vor.u32 %v1245_v9, %v971_v10  ;;  %v978_v20 = vor.u32 %v1248_v17, %v977_v16  ;;  %v1069_v9 = vld [vmem:[%s1892_s0 + $0xf8] sm:$0xf]  ;;  %v1272_v10 = vld [vmem:[%s1892_s0 + $0x108] sm:$0xf0] }
  0x23   :  { %689 = vmatpush.bf16.msrb.mxu3 %v1305_v12  ;;  %565 = vmatmul.bf16.vlgmr.msra.gmra.mxu0 %v942_v21  ;;  %v963_v12 = vld [vmem:[%s1892_s0 + $0x3c] sm:$0xf0]  ;;  %v1250_v21 = vld [vmem:[%s1892_s0 + $0x5c] sm:$0xf] }
  0x24   :  { %733 = vmatpush.bf16.msrb.mxu0 %v1313_v22  ;;  %595 = vmatmul.bf16.vlgmr.msra.gmra.mxu3 %v1062_v23  ;;  %v966_v18 = vor.u32 %v1244_v11, %v963_v12  ;;  %v991_v22 = vld [vmem:[%s1892_s0 + $0x6c] sm:$0xf0]  ;;  %v1249_v23 = vld [vmem:[%s1892_s0 + $0x54] sm:$0xf]  ;;  %v1077_v12 = vld [vmem:[%s1892_s0 + $0x100] sm:$0xf] }
  0x25   :  { %v1078_v17 = vor.u32 %v1273_v13, %v1077_v12 }
  0x26   :  { %646 = vmatpush.bf16.msrb.mxu2 %v1296_v25  ;;  %602 = vmatpush.bf16.msrb.mxu1 %v1288_v26  ;;  %v989_v25 = vld [vmem:[%s1892_s0 + $0x58] sm:$0xf]  ;;  %v1252_v26 = vld [vmem:[%s1892_s0 + $0x68] sm:$0xf0] }
  0x27   :  { %690 = vmatpush.bf16.msrb.mxu3 %v1304_v24  ;;  %v983_v24 = vld [vmem:[%s1892_s0 + $0x64] sm:$0xf0] }
  0x28   :  { %734 = vmatpush.bf16.msrb.mxu0 %v1312_v27  ;;  %v994_v27 = vor.u32 %v1250_v21, %v991_v22 }
  0x2a   :  { %647 = vmatpush.bf16.msrb.mxu2 %v1295_v29  ;;  %603 = vmatpush.bf16.msrb.mxu1 %v1287_v30  ;;  %v1253_v29 = vld [vmem:[%s1892_s0 + $0x70] sm:$0xf0]  ;;  %v986_v30 = vor.u32 %v1249_v23, %v983_v24 }
  0x2b   :  { %691 = vmatpush.bf16.msrb.mxu3 %v1303_v28  ;;  %v997_v28 = vld [vmem:[%s1892_s0 + $0x60] sm:$0xf] }
  0x2c   :  { %735 = vmatpush.bf16.msrb.mxu0 %v1311_v31  ;;  %v990_v31 = vor.u32 %v1252_v26, %v989_v25 }
  0x2e   :  { %648 = vmatpush.bf16.msrb.mxu2 %v1294_v33  ;;  %604 = vmatpush.bf16.msrb.mxu1 %v1286_v34  ;;  %v1255_v33 = vld [vmem:[%s1892_s0 + $0x84] sm:$0xf]  ;;  %v1011_v34 = vld [vmem:[%s1892_s0 + $0x94] sm:$0xf0] }
  0x2f   :  { %692 = vmatpush.bf16.msrb.mxu3 %v1302_v32  ;;  %v998_v32 = vor.u32 %v1253_v29, %v997_v28 }
  0x30   :  { %736 = vmatpush.bf16.msrb.mxu0 %v1310_v39  ;;  %v1014_v39 = vor.u32 %v1255_v33, %v1011_v34 }
  0x31   :  { %580 = vmatmul.bf16.gmra.mxu1 %v1002_v44  ;;  %590 = vmatmul.bf16.gmra.mxu2 %v1042_v45  ;;  %v1018_v44 = vor.u32 %v1258_v41, %v1017_v40  ;;  %v1260_v45 = vld [vmem:[%s1892_s0 + $0xac] sm:$0xf] }
  0x32   :  { %649 = vmatpush.bf16.msrb.mxu2 %v1293_v43  ;;  %605 = vmatpush.bf16.msrb.mxu1 %v1285_v46  ;;  %v1010_v43 = vor.u32 %v1257_v38, %v1009_v37  ;;  %v1031_v46 = vld [vmem:[%s1892_s0 + $0xbc] sm:$0xf0] }
  0x33   :  { %693 = vmatpush.bf16.msrb.mxu3 %v1301_v42  ;;  %570 = vmatmul.bf16.gmra.mxu0 %v962_v47  ;;  %v1006_v42 = vor.u32 %v1254_v35, %v1003_v36  ;;  %v1259_v47 = vld [vmem:[%s1892_s0 + $0xa4] sm:$0xf] }
  0x34   :  { %737 = vmatpush.bf16.msrb.mxu0 %v1309_v48  ;;  %v1023_v48 = vld [vmem:[%s1892_s0 + $0xb4] sm:$0xf0] }
  0x36   :  { %650 = vmatpush.bf16.msrb.mxu2 %v1292_v50  ;;  %606 = vmatpush.bf16.msrb.mxu1 %v1284_v51  ;;  %v1262_v50 = vld [vmem:[%s1892_s0 + $0xb8] sm:$0xf0]  ;;  %v1034_v51 = vor.u32 %v1260_v45, %v1031_v46 }
  0x37   :  { %694 = vmatpush.bf16.msrb.mxu3 %v1300_v49  ;;  %v1029_v49 = vld [vmem:[%s1892_s0 + $0xa8] sm:$0xf] }
  0x38   :  { %738 = vmatpush.bf16.msrb.mxu0 %v1308_v52  ;;  %v1037_v52 = vld [vmem:[%s1892_s0 + $0xb0] sm:$0xf] }
  0x3a   :  { %651 = vmatpush.bf16.msrb.mxu2 %v1291_v54  ;;  %607 = vmatpush.bf16.msrb.mxu1 %v1283_v55  ;;  %v1026_v54 = vor.u32 %v1259_v47, %v1023_v48  ;;  %v1030_v55 = vor.u32 %v1262_v50, %v1029_v49 }
  0x3b   :  { %695 = vmatpush.bf16.msrb.mxu3 %v1299_v53  ;;  %v1263_v53 = vld [vmem:[%s1892_s0 + $0xc0] sm:$0xf0] }
  0x3c   :  { %739 = vmatpush.bf16.msrb.mxu0 %v1307_v57  ;;  %v1265_v57 = vld [vmem:[%s1892_s0 + $0xd4] sm:$0xf] }
  0x3e   :  { %652 = vmatpush.bf16.msrb.mxu2 %v1290_v58  ;;  %608 = vmatpush.bf16.msrb.mxu1 %v1282_v61  ;;  %v1051_v58 = vld [vmem:[%s1892_s0 + $0xe4] sm:$0xf0]  ;;  %v1049_v61 = vld [vmem:[%s1892_s0 + $0xd0] sm:$0xf] }
  0x3f   :  { %696 = vmatpush.bf16.msrb.mxu3 %v1298_v56  ;;  %v1038_v56 = vor.u32 %v1263_v53, %v1037_v52  ;;  %v1054_v63 = vor.u32 %v1265_v57, %v1051_v58 }
  0x40   :  { %740 = vmatpush.bf16.msrb.mxu0 %v1306_v3  ;;  %v1050_v3 = vor.u32 %v1267_v62, %v1049_v61 }
  0x41   :  { %609 = vmatmul.bf16.vlgmr.msrb.gmra.mxu1 %v946_v6  ;;  %653 = vmatmul.bf16.vlgmr.msrb.gmra.mxu2 %v950_v7  ;;  %v1071_v6 = vld [vmem:[%s1892_s0 + $0x10c] sm:$0xf0]  ;;  %v1269_v7 = vld [vmem:[%s1892_s0 + $0xf4] sm:$0xf] }
  0x42   :  { %697 = vmatmul.bf16.vlgmr.msrb.gmra.mxu3 %v954_v2  ;;  %v1046_v2 = vor.u32 %v1264_v59, %v1043_v60  ;;  %v1074_v11 = vor.u32 %v1270_v5, %v1071_v6 }
  0x43   :  { %741 = vmatmul.bf16.vlgmr.msrb.gmra.mxu0 %v958_v8  ;;  %v1063_v8 = vld [vmem:[%s1892_s0 + $0x104] sm:$0xf0] }
  0x44   :  { %v1066_v14 = vor.u32 %v1269_v7, %v1063_v8 }
  0x51   :  { %614 = vmatmul.bf16.gmra.mxu1 %v966_v18  ;;  %658 = vmatmul.bf16.gmra.mxu2 %v970_v19 }
  0x52   :  { %702 = vmatmul.bf16.gmra.mxu3 %v974_v15  ;;  %v1070_v15 = vor.u32 %v1272_v10, %v1069_v9 }
  0x53   :  { %746 = vmatmul.bf16.gmra.mxu0 %v978_v20 }
  0x61   :  { %619 = vmatmul.bf16.gmra.mxu1 %v986_v30  ;;  %663 = vmatmul.bf16.gmra.mxu2 %v990_v31 }
  0x62   :  { %707 = vmatmul.bf16.gmra.mxu3 %v994_v27 }
  0x63   :  { %751 = vmatmul.bf16.gmra.mxu0 %v998_v32 }
  0x71   :  { %624 = vmatmul.bf16.gmra.mxu1 %v1006_v42  ;;  %668 = vmatmul.bf16.gmra.mxu2 %v1010_v43 }
  0x72   :  { %712 = vmatmul.bf16.gmra.mxu3 %v1014_v39 }
  0x73   :  { %756 = vmatmul.bf16.gmra.mxu0 %v1018_v44 }
  0x81   :  { %629 = vmatmul.bf16.gmra.mxu1 %v1026_v54  ;;  %673 = vmatmul.bf16.gmra.mxu2 %v1030_v55 }
  0x82   :  { %717 = vmatmul.bf16.gmra.mxu3 %v1034_v51 }
  0x83   :  { %761 = vmatmul.bf16.gmra.mxu0 %v1038_v56 }
  0x91   :  { %634 = vmatmul.bf16.gmra.mxu1 %v1046_v2  ;;  %678 = vmatmul.bf16.gmra.mxu2 %v1050_v3 }
  0x92   :  { %722 = vmatmul.bf16.gmra.mxu3 %v1054_v63 }
  0x93   :  { %766 = vmatmul.bf16.gmra.mxu0 %v1058_v4 }
  0x9e   :  { %v1692_v16 = vpop.f32.mrf.mxu1 }
  0xa0   :  { %v566_v18 = vpop.f32.mrf.mxu0 }
  0xa1   :  { %639 = vmatmul.bf16.gmra.mxu1 %v1066_v14  ;;  %683 = vmatmul.bf16.gmra.mxu2 %v1070_v15 }
  0xa2   :  { %727 = vmatmul.bf16.gmra.mxu3 %v1074_v11 }
  0xa3   :  { %771 = vmatmul.bf16.gmra.mxu0 %v1078_v17 }
  0xa4   :  { %v1694_v19 = vpop.f32.mrf.mxu2 }
  0xa6   :  { %v1696_v20 = vpop.f32.mrf.mxu1 }
  0xa7   :  { %v1702_v25 = vpop.f32.mrf.mxu3 }
  0xa8   :  { %v568_v21 = vpop.f32.mrf.mxu0 }
  0xac   :  { %v1698_v22 = vpop.f32.mrf.mxu2 }
  0xae   :  { %v1700_v23 = vpop.f32.mrf.mxu1 }
  0xaf   :  { %v1708_v29 = vpop.f32.mrf.mxu3 }
  0xb0   :  { %v571_v24 = vpop.f32.mrf.mxu0 }
  0xb4   :  { %v1704_v26 = vpop.f32.mrf.mxu2 }
  0xb6   :  { %v1706_v27 = vpop.f32.mrf.mxu1 }
  0xb8   :  { %v573_v28 = vpop.f32.mrf.mxu0 }
  0xbc   :  { %v1710_v30 = vpop.f32.mrf.mxu2 }
  0xbe   :  { %v610_v31 = vpop.f32.mrf.mxu1 }
  0xbf   :  { %v611_v34 = vadd.f32 %v610_v31, %v566_v18 }
  0xc0   :  { %v742_v32 = vpop.f32.mrf.mxu0 }
  0xc4   :  { %v654_v35 = vpop.f32.mrf.mxu2 }
  0xc5   :  { %v698_v33 = vpop.f32.mrf.mxu3  ;;  %v655_v36 = vadd.f32 %v654_v35, %v611_v34 }
  0xc6   :  { %v612_v37 = vpop.f32.mrf.mxu1 }
  0xc7   :  { %v699_v38 = vadd.f32 %v698_v33, %v655_v36  ;;  %v613_v43 = vadd.f32 %v612_v37, %v568_v21 }
  0xc8   :  { %v744_v39 = vpop.f32.mrf.mxu0 }
  0xc9   :  { %v1712_v40 = vadd.f32 %v742_v32, %v699_v38 }
  0xcb   :  { %v777_v42 = vpack.c.bf16 %v1712_v40, %v1712_v40 }
  0xcc   :  { %v656_v44 = vpop.f32.mrf.mxu2 }
  0xcd   :  { %v700_v41 = vpop.f32.mrf.mxu3  ;;  %792 = vst.msk [vmem:[%s1893_s2] sm:$0xf] %vm791_vm0, %v777_v42  ;;  %v657_v45 = vadd.f32 %v656_v44, %v613_v43 }
  0xce   :  { %v615_v46 = vpop.f32.mrf.mxu1 }
  0xcf   :  { %v701_v47 = vadd.f32 %v700_v41, %v657_v45  ;;  %v616_v52 = vadd.f32 %v615_v46, %v571_v24 }
  0xd0   :  { %v747_v48 = vpop.f32.mrf.mxu0 }
  0xd1   :  { %v1720_v49 = vadd.f32 %v744_v39, %v701_v47 }
  0xd3   :  { %v778_v51 = vpack.c.bf16 %v1720_v49, %v1720_v49 }
  0xd4   :  { %v659_v53 = vpop.f32.mrf.mxu2 }
  0xd5   :  { %v703_v50 = vpop.f32.mrf.mxu3  ;;  %793 = vst.msk [vmem:[%s1893_s2 + $0x4] sm:$0xf] %vm791_vm0, %v778_v51  ;;  %v660_v54 = vadd.f32 %v659_v53, %v616_v52 }
  0xd6   :  { %v617_v55 = vpop.f32.mrf.mxu1 }
  0xd7   :  { %v704_v56 = vadd.f32 %v703_v50, %v660_v54  ;;  %v618_v61 = vadd.f32 %v617_v55, %v573_v28 }
  0xd8   :  { %v749_v57 = vpop.f32.mrf.mxu0 }
  0xd9   :  { %v1728_v58 = vadd.f32 %v747_v48, %v704_v56 }
  0xdb   :  { %v779_v60 = vpack.c.bf16 %v1728_v58, %v1728_v58 }
  0xdc   :  { %v661_v62 = vpop.f32.mrf.mxu2 }
  0xdd   :  { %v705_v59 = vpop.f32.mrf.mxu3  ;;  %794 = vst.msk [vmem:[%s1893_s2 + $0x8] sm:$0xf] %vm791_vm0, %v779_v60  ;;  %v662_v63 = vadd.f32 %v661_v62, %v618_v61 }
  0xde   :  { %v620_v0 = vpop.f32.mrf.mxu1 }
  0xdf   :  { %v706_v1 = vadd.f32 %v705_v59, %v662_v63  ;;  %v621_v6 = vadd.f32 %v620_v0, %v1692_v16 }
  0xe0   :  { %v752_v2 = vpop.f32.mrf.mxu0 }
  0xe1   :  { %v1736_v3 = vadd.f32 %v749_v57, %v706_v1 }
  0xe3   :  { %v780_v5 = vpack.c.bf16 %v1736_v3, %v1736_v3 }
  0xe4   :  { %v664_v7 = vpop.f32.mrf.mxu2 }
  0xe5   :  { %v708_v4 = vpop.f32.mrf.mxu3  ;;  %795 = vst.msk [vmem:[%s1893_s2 + $0xc] sm:$0xf] %vm791_vm0, %v780_v5  ;;  %v665_v8 = vadd.f32 %v664_v7, %v621_v6 }
  0xe6   :  { %v622_v9 = vpop.f32.mrf.mxu1 }
  0xe7   :  { %v709_v10 = vadd.f32 %v708_v4, %v665_v8  ;;  %v623_v15 = vadd.f32 %v622_v9, %v1696_v20  ;;  %v813_v9 = vsel %vm811_vm1, %v1720_v49, 0.0 }
  0xe8   :  { %v754_v11 = vpop.f32.mrf.mxu0 }
  0xe9   :  { %v1745_v12 = vadd.f32 %v752_v2, %v709_v10 }
  0xeb   :  { %v781_v14 = vpack.c.bf16 %v1745_v12, %v1745_v12 }
  0xec   :  { %v666_v17 = vpop.f32.mrf.mxu2 }
  0xed   :  { %v710_v13 = vpop.f32.mrf.mxu3  ;;  %796 = vst.msk [vmem:[%s1893_s2 + $0x10] sm:$0xf] %vm791_vm0, %v781_v14  ;;  %v667_v16 = vadd.f32 %v666_v17, %v623_v15 }
  0xee   :  { %v625_v18 = vpop.f32.mrf.mxu1 }
  0xef   :  { %v711_v21 = vadd.f32 %v710_v13, %v667_v16  ;;  %v626_v33 = vadd.f32 %v625_v18, %v1700_v23  ;;  %v812_v13 = vsel %vm811_vm1, %v1712_v40, 0.0 }
  0xf0   :  { %v757_v24 = vpop.f32.mrf.mxu0  ;;  %v814_v17 = vadd.f32 %v813_v9, %v812_v13 }
  0xf1   :  { %v1754_v28 = vadd.f32 %v754_v11, %v711_v21  ;;  %v817_v21 = vsel %vm811_vm1, %v1736_v3, 0.0 }
  0xf3   :  { %v782_v32 = vpack.c.bf16 %v1754_v28, %v1754_v28 }
  0xf4   :  { %v669_v34 = vpop.f32.mrf.mxu2 }
  0xf5   :  { %v713_v31 = vpop.f32.mrf.mxu3  ;;  %797 = vst.msk [vmem:[%s1893_s2 + $0x14] sm:$0xf] %vm791_vm0, %v782_v32  ;;  %v670_v20 = vadd.f32 %v669_v34, %v626_v33  ;;  %v819_v33 = vsel %vm811_vm1, %v1745_v12, 0.0 }
  0xf6   :  { %v627_v35 = vpop.f32.mrf.mxu1 }
  0xf7   :  { %v714_v36 = vadd.f32 %v713_v31, %v670_v20  ;;  %v628_v42 = vadd.f32 %v627_v35, %v1706_v27 }
  0xf8   :  { %v759_v37 = vpop.f32.mrf.mxu0 }
  0xf9   :  { %v1763_v38 = vadd.f32 %v757_v24, %v714_v36 }
  0xfb   :  { %v783_v41 = vpack.c.bf16 %v1763_v38, %v1763_v38 }
  0xfc   :  { %v671_v43 = vpop.f32.mrf.mxu2 }
  0xfd   :  { %v715_v39 = vpop.f32.mrf.mxu3  ;;  %798 = vst.msk [vmem:[%s1893_s2 + $0x18] sm:$0xf] %vm791_vm0, %v783_v41  ;;  %v672_v23 = vadd.f32 %v671_v43, %v628_v42 }
  0xfe   :  { %v630_v44 = vpop.f32.mrf.mxu1 }
  0xff   :  { %v716_v45 = vadd.f32 %v715_v39, %v672_v23  ;;  %v631_v51 = vadd.f32 %v630_v44, %v1694_v19 }
 0x100   :  { %v762_v46 = vpop.f32.mrf.mxu0 }
 0x101   :  { %v1772_v47 = vadd.f32 %v759_v37, %v716_v45  ;;  %v823_v37 = vsel %vm811_vm1, %v1763_v38, 0.0 }
 0x103   :  { %v784_v50 = vpack.c.bf16 %v1772_v47, %v1772_v47  ;;  %v825_v44 = vsel %vm811_vm1, %v1772_v47, 0.0 }
 0x104   :  { %v674_v52 = vpop.f32.mrf.mxu2 }
 0x105   :  { %v718_v48 = vpop.f32.mrf.mxu3  ;;  %799 = vst.msk [vmem:[%s1893_s2 + $0x1c] sm:$0xf] %vm791_vm0, %v784_v50  ;;  %v675_v27 = vadd.f32 %v674_v52, %v631_v51  ;;  %v1341_v50 = vmov 98.0  }
 0x106   :  { %v632_v53 = vpop.f32.mrf.mxu1  ;;  %1339 = vrcp.f32 %v1341_v50 }
 0x107   :  { %v719_v54 = vadd.f32 %v718_v48, %v675_v27  ;;  %v633_v60 = vadd.f32 %v632_v53, %v1698_v22 }
 0x108   :  { %v764_v55 = vpop.f32.mrf.mxu0 }
 0x109   :  { %v1781_v56 = vadd.f32 %v762_v46, %v719_v54 }
 0x10b   :  { %v785_v59 = vpack.c.bf16 %v1781_v56, %v1781_v56  ;;  %v827_v51 = vsel %vm811_vm1, %v1781_v56, 0.0 }
 0x10c   :  { %v676_v61 = vpop.f32.mrf.mxu2 }
 0x10d   :  { %v720_v57 = vpop.f32.mrf.mxu3  ;;  %800 = vst.msk [vmem:[%s1893_s2 + $0x20] sm:$0xf] %vm791_vm0, %v785_v59  ;;  %v677_v19 = vadd.f32 %v676_v61, %v633_v60  ;;  %v1340_v61 = vpop.eup %1339 }
 0x10e   :  { %v635_v62 = vpop.f32.mrf.mxu1  ;;  %vm852_vm2 = vweird.f32 %v1340_v61 }
 0x10f   :  { %v721_v63 = vadd.f32 %v720_v57, %v677_v19  ;;  %v636_v5 = vadd.f32 %v635_v62, %v1704_v26  ;;  %v815_v26 = vsel %vm811_vm1, %v1728_v58, 0.0 }
 0x110   :  { %v767_v1 = vpop.f32.mrf.mxu0  ;;  %v816_v31 = vadd.f32 %v815_v26, %v814_v17 }
 0x111   :  { %v1790_v0 = vadd.f32 %v764_v55, %v721_v63 }
 0x112   :  { %v818_v20 = vadd.f32 %v817_v21, %v816_v31 }
 0x113   :  { %v786_v4 = vpack.c.bf16 %v1790_v0, %v1790_v0  ;;  %v829_v53 = vsel %vm811_vm1, %v1790_v0, 0.0 }
 0x114   :  { %v679_v6 = vpop.f32.mrf.mxu2  ;;  %v820_v36 = vadd.f32 %v819_v33, %v818_v20 }
 0x115   :  { %v723_v2 = vpop.f32.mrf.mxu3  ;;  %801 = vst.msk [vmem:[%s1893_s2 + $0x24] sm:$0xf] %vm791_vm0, %v786_v4  ;;  %v680_v22 = vadd.f32 %v679_v6, %v636_v5 }
 0x116   :  { %v637_v7 = vpop.f32.mrf.mxu1 }
 0x117   :  { %v724_v8 = vadd.f32 %v723_v2, %v680_v22  ;;  %v638_v15 = vadd.f32 %v637_v7, %v1710_v30  ;;  %v821_v30 = vsel %vm811_vm1, %v1754_v28, 0.0  ;;  %v847_v22 = vmul.f32 98.0, %v1340_v61 }
 0x118   :  { %v769_v16 = vpop.f32.mrf.mxu0  ;;  %v822_v42 = vadd.f32 %v821_v30, %v820_v36 }
 0x119   :  { %v1801_v10 = vadd.f32 %v767_v1, %v724_v8  ;;  %v848_v26 = vsub.f32 1.0, %v847_v22 }
 0x11a   :  { %v824_v46 = vadd.f32 %v823_v37, %v822_v42 }
 0x11b   :  { %v787_v14 = vpack.c.bf16 %v1801_v10, %v1801_v10  ;;  %v831_v57 = vsel %vm811_vm1, %v1801_v10, 0.0  ;;  %v849_v17 = vmul.f32 %v1340_v61, %v848_v26 }
 0x11c   :  { %v681_v18 = vpop.f32.mrf.mxu2  ;;  %v826_v52 = vadd.f32 %v825_v44, %v824_v46 }
 0x11d   :  { %v725_v11 = vpop.f32.mrf.mxu3  ;;  %802 = vst.msk [vmem:[%s1893_s2 + $0x28] sm:$0xf] %vm791_vm0, %v787_v14  ;;  %v682_v24 = vadd.f32 %v681_v18, %v638_v15  ;;  %v850_v21 = vadd.f32 %v1340_v61, %v849_v17 }
 0x11e   :  { %v640_v32 = vpop.f32.mrf.mxu1  ;;  %v828_v55 = vadd.f32 %v827_v51, %v826_v52 }
 0x11f   :  { %v726_v34 = vadd.f32 %v725_v11, %v682_v24  ;;  %v641_v41 = vadd.f32 %v640_v32, %v1702_v25  ;;  %v854_v32 = vsel %vm852_vm2, %v1340_v61, %v850_v21 }
 0x120   :  { %v772_v48 = vpop.f32.mrf.mxu0  ;;  %v830_v19 = vadd.f32 %v829_v53, %v828_v55 }
 0x121   :  { %v1820_v35 = vadd.f32 %v769_v16, %v726_v34 }
 0x122   :  { %v832_v2 = vadd.f32 %v831_v57, %v830_v19 }
 0x123   :  { %v788_v39 = vpack.c.bf16 %v1820_v35, %v1820_v35  ;;  %v833_v63 = vsel %vm811_vm1, %v1820_v35, 0.0 }
 0x124   :  { %v684_v23 = vpop.f32.mrf.mxu2 }
 0x125   :  { %v728_v43 = vpop.f32.mrf.mxu3  ;;  %803 = vst.msk [vmem:[%s1893_s2 + $0x2c] sm:$0xf] %vm791_vm0, %v788_v39  ;;  %v685_v45 = vadd.f32 %v684_v23, %v641_v41 }
 0x126   :  { %v642_v27 = vpop.f32.mrf.mxu1 }
 0x127   :  { %v729_v25 = vadd.f32 %v728_v43, %v685_v45  ;;  %v643_v60 = vadd.f32 %v642_v27, %v1708_v29  ;;  %v834_v29 = vadd.f32 %v833_v63, %v832_v2 }
 0x128   :  { %v774_v7 = vpop.f32.mrf.mxu0 }
 0x129   :  { %v1837_v54 = vadd.f32 %v772_v48, %v729_v25 }
 0x12b   :  { %v789_v59 = vpack.c.bf16 %v1837_v54, %v1837_v54  ;;  %v835_v5 = vsel %vm811_vm1, %v1837_v54, 0.0 }
 0x12c   :  { %v686_v62 = vpop.f32.mrf.mxu2  ;;  %v836_v9 = vadd.f32 %v835_v5, %v834_v29 }
 0x12d   :  { %804 = vst.msk [vmem:[%s1893_s2 + $0x30] sm:$0xf] %vm791_vm0, %v789_v59  ;;  %v687_v1 = vadd.f32 %v686_v62, %v643_v60  ;;  %v730_v4 = vpop.f32.mrf.mxu3 }
 0x12f   :  { %v731_v6 = vadd.f32 %v730_v4, %v687_v1 }
 0x131   :  { %v775_v8 = vadd.f32 %v774_v7, %v731_v6 }
 0x133   :  { %v790_v11 = vpack.c.bf16 %v775_v8, %v775_v8  ;;  %v837_v13 = vsel %vm811_vm1, %v775_v8, 0.0 }
 0x134   :  { %v838_v14 = vadd.f32 %v837_v13, %v836_v9 }
 0x135   :  { %805 = vst.msk [vmem:[%s1893_s2 + $0x34] sm:$0xf] %vm791_vm0, %v790_v11 }
 0x136   :  { %v839_v15 = vrot.slane %v838_v14, 4 }
 0x138   :  { %v840_v16 = vadd.f32 %v839_v15, %v838_v14 }
 0x13a   :  { %v841_v18 = vrot.slane %v840_v16, 2 }
 0x13c   :  { %v842_v24 = vadd.f32 %v841_v18, %v840_v16 }
 0x13e   :  { %v843_v31 = vrot.slane %v842_v24, 1 }
 0x140   :  { %v1857_v33 = vadd.f32 %v843_v31, %v842_v24 }
 0x142   :  { %v860_v34 = vmul.f32 %v854_v32, %v1857_v33 }
 0x144   :  { %v861_v20 = vsub.f32 %v1712_v40, %v860_v34  ;;  %v862_v30 = vsub.f32 %v1720_v49, %v860_v34  ;;  %v863_v36 = vsub.f32 %v1728_v58, %v860_v34  ;;  %v864_v37 = vsub.f32 %v1736_v3, %v860_v34 }
 0x145   :  { %v865_v42 = vsub.f32 %v1745_v12, %v860_v34  ;;  %v866_v23 = vsub.f32 %v1754_v28, %v860_v34  ;;  %v867_v40 = vsub.f32 %v1763_v38, %v860_v34  ;;  %v868_v3 = vsub.f32 %v1772_v47, %v860_v34 }
 0x146   :  { %v875_v39 = vmul.f32 %v861_v20, %v861_v20  ;;  %v876_v41 = vmul.f32 %v862_v30, %v862_v30  ;;  %v877_v43 = vmul.f32 %v863_v36, %v863_v36  ;;  %v878_v44 = vmul.f32 %v864_v37, %v864_v37 }
 0x147   :  { %v879_v49 = vmul.f32 %v865_v42, %v865_v42  ;;  %v880_v51 = vmul.f32 %v866_v23, %v866_v23  ;;  %v869_v28 = vsub.f32 %v1781_v56, %v860_v34  ;;  %v881_v52 = vmul.f32 %v867_v40, %v867_v40 }
 0x148   :  { %v889_v45 = vsel %vm811_vm1, %v875_v39, 0.0  ;;  %v890_v46 = vsel %vm811_vm1, %v876_v41, 0.0  ;;  %v892_v58 = vsel %vm811_vm1, %v877_v43, 0.0  ;;  %v894_v12 = vsel %vm811_vm1, %v878_v44, 0.0 }
 0x149   :  { %v891_v48 = vadd.f32 %v890_v46, %v889_v45  ;;  %v896_v27 = vsel %vm811_vm1, %v879_v49, 0.0  ;;  %v870_v55 = vsub.f32 %v1790_v0, %v860_v34  ;;  %v882_v57 = vmul.f32 %v868_v3, %v868_v3 }
 0x14a   :  { %v898_v38 = vsel %vm811_vm1, %v880_v51, 0.0  ;;  %v871_v60 = vsub.f32 %v1801_v10, %v860_v34  ;;  %v883_v61 = vmul.f32 %v869_v28, %v869_v28  ;;  %v900_v47 = vsel %vm811_vm1, %v881_v52, 0.0 }
 0x14b   :  { %v893_v50 = vadd.f32 %v892_v58, %v891_v48  ;;  %v872_v62 = vsub.f32 %v1820_v35, %v860_v34  ;;  %v884_v63 = vmul.f32 %v870_v55, %v870_v55  ;;  %v902_v56 = vsel %vm811_vm1, %v882_v57, 0.0 }
 0x14c   :  { %v873_v2 = vsub.f32 %v1837_v54, %v860_v34  ;;  %v885_v4 = vmul.f32 %v871_v60, %v871_v60  ;;  %v904_v0 = vsel %vm811_vm1, %v883_v61, 0.0  ;;  %v874_v6 = vsub.f32 %v775_v8, %v860_v34 }
 0x14d   :  { %v895_v25 = vadd.f32 %v894_v12, %v893_v50  ;;  %v886_v22 = vmul.f32 %v872_v62, %v872_v62  ;;  %v906_v10 = vsel %vm811_vm1, %v884_v63, 0.0  ;;  %v923_v24 = vmul.f32 %v860_v34, %v860_v34 }
 0x14e   :  { %v887_v7 = vmul.f32 %v873_v2, %v873_v2  ;;  %v908_v9 = vsel %vm811_vm1, %v885_v4, 0.0  ;;  %v888_v35 = vmul.f32 %v874_v6, %v874_v6 }
 0x14f   :  { %v897_v53 = vadd.f32 %v896_v27, %v895_v25  ;;  %v910_v13 = vsel %vm811_vm1, %v886_v22, 0.0  ;;  %v925_v20 = vmul.f32 14.0, %v923_v24 }
 0x150   :  { %v912_v14 = vsel %vm811_vm1, %v887_v7, 0.0  ;;  %v914_v15 = vsel %vm811_vm1, %v888_v35, 0.0 }
 0x151   :  { %v899_v59 = vadd.f32 %v898_v38, %v897_v53 }
 0x153   :  { %v901_v19 = vadd.f32 %v900_v47, %v899_v59 }
 0x155   :  { %v903_v1 = vadd.f32 %v902_v56, %v901_v19 }
 0x157   :  { %v905_v5 = vadd.f32 %v904_v0, %v903_v1 }
 0x159   :  { %v907_v29 = vadd.f32 %v906_v10, %v905_v5 }
 0x15b   :  { %v909_v11 = vadd.f32 %v908_v9, %v907_v29 }
 0x15d   :  { %v911_v26 = vadd.f32 %v910_v13, %v909_v11 }
 0x15f   :  { %v913_v54 = vadd.f32 %v912_v14, %v911_v26 }
 0x161   :  { %v915_v17 = vadd.f32 %v914_v15, %v913_v54 }
 0x163   :  { %v916_v16 = vrot.slane %v915_v17, 4 }
 0x165   :  { %v917_v8 = vadd.f32 %v916_v16, %v915_v17 }
 0x167   :  { %v918_v18 = vrot.slane %v917_v8, 2 }
 0x169   :  { %v919_v21 = vadd.f32 %v918_v18, %v917_v8 }
 0x16b   :  { %v920_v31 = vrot.slane %v919_v21, 1 }
 0x16d   :  { %v921_v32 = vadd.f32 %v920_v31, %v919_v21 }
 0x16f   :  { %v926_v30 = vsub.f32 %v921_v32, %v925_v20 }
 0x171   :  { %v928_v36 = vsel %vm927_vm3, %v1857_v33, %v926_v30 }
 0x172   :  { %930 = vst.msk [vmem:[%s1894_s3] sm:$0x3] %vm929_vm4, %v928_v36 }

// kernel: atari_features_forward.7
= control target key start
LH: loop header
LB: loop body
LE: loop exit
PB: predicated region body
PF: predicated region fallthrough
CT: control target
= control target key end

     0   :  { %vm2115_vm0 = vcmask 261120   ;;  %vm2166_vm2 = vcmask 1040384   ;;  %vm2168_vm3 = vcmask 254976   ;;  %s4092_s1 = inlined_call_operand.vmem [shape: bf16[3200,32], index: 1, kind: input, shape index: {}]   ;;  %s4093_s0 = inlined_call_operand.vmem [shape: bf16[16,3200], index: 0, kind: input, shape index: {}]   ;;  %s4094_s2 = inlined_call_operand.vmem [shape: f32[16,32], index: 2, kind: output, shape index: {0}]   ;;  %s4095_s3 = inlined_call_operand.vmem [shape: f32[1,2,32], index: 3, kind: output, shape index: {1}]  }
   0x1   :  { %v3110_v0 = vld [vmem:[%s4092_s1 + $0x38] sm:$0xff]  ;;  %v3109_v4 = vld [vmem:[%s4092_s1 + $0x30] sm:$0xff]  ;;  %v3108_v8 = vld [vmem:[%s4092_s1 + $0x28] sm:$0xff] }
   0x2   :  { %v3126_v1 = vld [vmem:[%s4092_s1 + $0xb8] sm:$0xff]  ;;  %1765 = vmatpush.bf16.msra.mxu0 %v3110_v0  ;;  %v3125_v5 = vld [vmem:[%s4092_s1 + $0xb0] sm:$0xff]  ;;  %v3124_v9 = vld [vmem:[%s4092_s1 + $0xa8] sm:$0xff] }
   0x3   :  { %v3118_v2 = vld [vmem:[%s4092_s1 + $0x78] sm:$0xff]  ;;  %1793 = vmatpush.bf16.msra.mxu2 %v3126_v1  ;;  %v3117_v6 = vld [vmem:[%s4092_s1 + $0x70] sm:$0xff]  ;;  %v3116_v10 = vld [vmem:[%s4092_s1 + $0x68] sm:$0xff] }
   0x4   :  { %v3134_v3 = vld [vmem:[%s4092_s1 + $0xf8] sm:$0xff]  ;;  %1779 = vmatpush.bf16.msra.mxu1 %v3118_v2  ;;  %v3133_v7 = vld [vmem:[%s4092_s1 + $0xf0] sm:$0xff]  ;;  %v3132_v11 = vld [vmem:[%s4092_s1 + $0xe8] sm:$0xff] }
   0x5   :  { %1807 = vmatpush.bf16.msra.mxu3 %v3134_v3  ;;  %v3107_v12 = vld [vmem:[%s4092_s1 + $0x20] sm:$0xff]  ;;  %v3106_v16 = vld [vmem:[%s4092_s1 + $0x18] sm:$0xff]  ;;  %v3105_v20 = vld [vmem:[%s4092_s1 + $0x10] sm:$0xff] }
   0x6   :  { %1766 = vmatpush.bf16.msra.mxu0 %v3109_v4  ;;  %v3123_v13 = vld [vmem:[%s4092_s1 + $0xa0] sm:$0xff]  ;;  %v3122_v17 = vld [vmem:[%s4092_s1 + $0x98] sm:$0xff]  ;;  %v3121_v21 = vld [vmem:[%s4092_s1 + $0x90] sm:$0xff] }
   0x7   :  { %1794 = vmatpush.bf16.msra.mxu2 %v3125_v5  ;;  %v3115_v14 = vld [vmem:[%s4092_s1 + $0x60] sm:$0xff]  ;;  %v3114_v18 = vld [vmem:[%s4092_s1 + $0x58] sm:$0xff]  ;;  %v3113_v22 = vld [vmem:[%s4092_s1 + $0x50] sm:$0xff] }
   0x8   :  { %1780 = vmatpush.bf16.msra.mxu1 %v3117_v6  ;;  %v3131_v15 = vld [vmem:[%s4092_s1 + $0xe0] sm:$0xff]  ;;  %v3130_v19 = vld [vmem:[%s4092_s1 + $0xd8] sm:$0xff]  ;;  %v3129_v23 = vld [vmem:[%s4092_s1 + $0xd0] sm:$0xff] }
   0x9   :  { %1808 = vmatpush.bf16.msra.mxu3 %v3133_v7  ;;  %v3104_v24 = vld [vmem:[%s4092_s1 + $0x8] sm:$0xff]  ;;  %v3103_v28 = vld [vmem:[%s4092_s1] sm:$0xff]  ;;  %v3142_v30 = vld [vmem:[%s4092_s1 + $0x138] sm:$0xff] }
   0xa   :  { %1767 = vmatpush.bf16.msra.mxu0 %v3108_v8  ;;  %v3120_v25 = vld [vmem:[%s4092_s1 + $0x88] sm:$0xff]  ;;  %v3119_v29 = vld [vmem:[%s4092_s1 + $0x80] sm:$0xff]  ;;  %v3158_v31 = vld [vmem:[%s4092_s1 + $0x1b8] sm:$0xff] }
   0xb   :  { %1795 = vmatpush.bf16.msra.mxu2 %v3124_v9  ;;  %v3112_v26 = vld [vmem:[%s4092_s1 + $0x48] sm:$0xff]  ;;  %v3111_v32 = vld [vmem:[%s4092_s1 + $0x40] sm:$0xff]  ;;  %v3150_v38 = vld [vmem:[%s4092_s1 + $0x178] sm:$0xff] }
   0xc   :  { %1781 = vmatpush.bf16.msra.mxu1 %v3116_v10  ;;  %v3128_v27 = vld [vmem:[%s4092_s1 + $0xc8] sm:$0xff]  ;;  %v3127_v33 = vld [vmem:[%s4092_s1 + $0xc0] sm:$0xff]  ;;  %v3166_v39 = vld [vmem:[%s4092_s1 + $0x1f8] sm:$0xff] }
   0xd   :  { %1809 = vmatpush.bf16.msra.mxu3 %v3132_v11  ;;  %v2180_v34 = vld [vmem:[%s4093_s0] sm:$0xf]  ;;  %v3090_v35 = vld [vmem:[%s4093_s0 + $0x60] sm:$0xf0]  ;;  %v2188_v36 = vld [vmem:[%s4093_s0 + $0x8] sm:$0xf] }
   0xe   :  { %1768 = vmatpush.bf16.msra.mxu0 %v3107_v12  ;;  %v3091_v37 = vld [vmem:[%s4093_s0 + $0x68] sm:$0xf0]  ;;  %v3078_v40 = vld [vmem:[%s4093_s0 + $0x4] sm:$0xf]  ;;  %v2182_v41 = vld [vmem:[%s4093_s0 + $0x64] sm:$0xf0]  ;;  %v2181_v44 = vor.u32 %v3090_v35, %v2180_v34 }
   0xf   :  { %1796 = vmatpush.bf16.msra.mxu2 %v3123_v13  ;;  %v3079_v42 = vld [vmem:[%s4093_s0 + $0xc] sm:$0xf]  ;;  %v2190_v43 = vld [vmem:[%s4093_s0 + $0x6c] sm:$0xf0]  ;;  %v2189_v45 = vor.u32 %v3091_v37, %v2188_v36  ;;  %v2185_v48 = vor.u32 %v3078_v40, %v2182_v41  ;;  %v3139_v56 = vld [vmem:[%s4092_s1 + $0x120] sm:$0xff] }
  0x10   :  { %1782 = vmatpush.bf16.msra.mxu1 %v3115_v14  ;;  %v3141_v46 = vld [vmem:[%s4092_s1 + $0x130] sm:$0xff]  ;;  %v2193_v49 = vor.u32 %v3079_v42, %v2190_v43  ;;  %v3140_v52 = vld [vmem:[%s4092_s1 + $0x128] sm:$0xff]  ;;  %v3155_v57 = vld [vmem:[%s4092_s1 + $0x1a0] sm:$0xff] }
  0x11   :  { %1810 = vmatpush.bf16.msra.mxu3 %v3131_v15  ;;  %v3157_v47 = vld [vmem:[%s4092_s1 + $0x1b0] sm:$0xff]  ;;  %v3156_v53 = vld [vmem:[%s4092_s1 + $0x1a8] sm:$0xff]  ;;  %v3147_v58 = vld [vmem:[%s4092_s1 + $0x160] sm:$0xff] }
  0x12   :  { %1769 = vmatpush.bf16.msra.mxu0 %v3106_v16  ;;  %v3149_v50 = vld [vmem:[%s4092_s1 + $0x170] sm:$0xff]  ;;  %v3148_v54 = vld [vmem:[%s4092_s1 + $0x168] sm:$0xff]  ;;  %v3163_v59 = vld [vmem:[%s4092_s1 + $0x1e0] sm:$0xff] }
  0x13   :  { %1797 = vmatpush.bf16.msra.mxu2 %v3122_v17  ;;  %v3165_v51 = vld [vmem:[%s4092_s1 + $0x1f0] sm:$0xff]  ;;  %v3164_v55 = vld [vmem:[%s4092_s1 + $0x1e8] sm:$0xff]  ;;  %v3138_v60 = vld [vmem:[%s4092_s1 + $0x118] sm:$0xff] }
  0x14   :  { %1783 = vmatpush.bf16.msra.mxu1 %v3114_v18  ;;  %v3154_v61 = vld [vmem:[%s4092_s1 + $0x198] sm:$0xff]  ;;  %v3137_v0 = vld [vmem:[%s4092_s1 + $0x110] sm:$0xff]  ;;  %v3136_v4 = vld [vmem:[%s4092_s1 + $0x108] sm:$0xff] }
  0x15   :  { %1811 = vmatpush.bf16.msra.mxu3 %v3130_v19  ;;  %v3146_v62 = vld [vmem:[%s4092_s1 + $0x158] sm:$0xff]  ;;  %v3153_v1 = vld [vmem:[%s4092_s1 + $0x190] sm:$0xff]  ;;  %v3152_v5 = vld [vmem:[%s4092_s1 + $0x188] sm:$0xff] }
  0x16   :  { %1770 = vmatpush.bf16.msra.mxu0 %v3105_v20  ;;  %v3162_v63 = vld [vmem:[%s4092_s1 + $0x1d8] sm:$0xff]  ;;  %v3145_v2 = vld [vmem:[%s4092_s1 + $0x150] sm:$0xff]  ;;  %v3144_v6 = vld [vmem:[%s4092_s1 + $0x148] sm:$0xff] }
  0x17   :  { %1798 = vmatpush.bf16.msra.mxu2 %v3121_v21  ;;  %v3161_v3 = vld [vmem:[%s4092_s1 + $0x1d0] sm:$0xff]  ;;  %v3160_v7 = vld [vmem:[%s4092_s1 + $0x1c8] sm:$0xff]  ;;  %v3135_v8 = vld [vmem:[%s4092_s1 + $0x100] sm:$0xff] }
  0x18   :  { %1784 = vmatpush.bf16.msra.mxu1 %v3113_v22  ;;  %v3151_v9 = vld [vmem:[%s4092_s1 + $0x180] sm:$0xff]  ;;  %v3174_v10 = vld [vmem:[%s4092_s1 + $0x238] sm:$0xff]  ;;  %v2196_v12 = vld [vmem:[%s4093_s0 + $0x10] sm:$0xf] }
  0x19   :  { %1812 = vmatpush.bf16.msra.mxu3 %v3129_v23  ;;  %v3190_v11 = vld [vmem:[%s4092_s1 + $0x2b8] sm:$0xff]  ;;  %v3092_v13 = vld [vmem:[%s4093_s0 + $0x70] sm:$0xf0]  ;;  %v3143_v16 = vld [vmem:[%s4092_s1 + $0x140] sm:$0xff] }
  0x1a   :  { %1771 = vmatpush.bf16.msra.mxu0 %v3104_v24  ;;  %v2204_v14 = vld [vmem:[%s4093_s0 + $0x18] sm:$0xf]  ;;  %v3093_v15 = vld [vmem:[%s4093_s0 + $0x78] sm:$0xf0]  ;;  %v3159_v17 = vld [vmem:[%s4092_s1 + $0x1c0] sm:$0xff]  ;;  %v2197_v22 = vor.u32 %v3092_v13, %v2196_v12 }
  0x1b   :  { %1799 = vmatpush.bf16.msra.mxu2 %v3120_v25  ;;  %v3080_v18 = vld [vmem:[%s4093_s0 + $0x14] sm:$0xf]  ;;  %v2198_v19 = vld [vmem:[%s4093_s0 + $0x74] sm:$0xf0]  ;;  %v3081_v20 = vld [vmem:[%s4093_s0 + $0x1c] sm:$0xf]  ;;  %v2205_v23 = vor.u32 %v3093_v15, %v2204_v14 }
  0x1c   :  { %1785 = vmatpush.bf16.msra.mxu1 %v3112_v26  ;;  %v2206_v21 = vld [vmem:[%s4093_s0 + $0x7c] sm:$0xf0]  ;;  %v3182_v24 = vld [vmem:[%s4092_s1 + $0x278] sm:$0xff]  ;;  %v2201_v26 = vor.u32 %v3080_v18, %v2198_v19  ;;  %v3180_v34 = vld [vmem:[%s4092_s1 + $0x268] sm:$0xff] }
  0x1d   :  { %1813 = vmatpush.bf16.msra.mxu3 %v3128_v27  ;;  %v3198_v25 = vld [vmem:[%s4092_s1 + $0x2f8] sm:$0xff]  ;;  %v2209_v27 = vor.u32 %v3081_v20, %v2206_v21  ;;  %v3196_v35 = vld [vmem:[%s4092_s1 + $0x2e8] sm:$0xff]  ;;  %v3171_v36 = vld [vmem:[%s4092_s1 + $0x220] sm:$0xff] }
  0x1e   :  { %1772 = vmatpush.bf16.msra.mxu0 %v3103_v28  ;;  %v3173_v28 = vld [vmem:[%s4092_s1 + $0x230] sm:$0xff]  ;;  %v3187_v37 = vld [vmem:[%s4092_s1 + $0x2a0] sm:$0xff]  ;;  %v3170_v40 = vld [vmem:[%s4092_s1 + $0x218] sm:$0xff] }
  0x1f   :  { %1800 = vmatpush.bf16.msra.mxu2 %v3119_v29  ;;  %v3189_v29 = vld [vmem:[%s4092_s1 + $0x2b0] sm:$0xff]  ;;  %v3186_v41 = vld [vmem:[%s4092_s1 + $0x298] sm:$0xff]  ;;  %v3204_v12 = vld [vmem:[%s4092_s1 + $0x328] sm:$0xff] }
  0x20   :  { %1786 = vmatpush.bf16.msra.mxu1 %v3111_v32  ;;  %v3172_v32 = vld [vmem:[%s4092_s1 + $0x228] sm:$0xff]  ;;  %v3178_v42 = vld [vmem:[%s4092_s1 + $0x258] sm:$0xff]  ;;  %v3211_v18 = vld [vmem:[%s4092_s1 + $0x360] sm:$0xff] }
  0x21   :  { %1814 = vmatpush.bf16.msra.mxu3 %v3127_v33  ;;  %1773 = vmatmul.bf16.vlgmr.msra.gmra.mxu0 %v2181_v44  ;;  %v3188_v33 = vld [vmem:[%s4092_s1 + $0x2a8] sm:$0xff]  ;;  %v3194_v43 = vld [vmem:[%s4092_s1 + $0x2d8] sm:$0xff]  ;;  %v3169_v44 = vld [vmem:[%s4092_s1 + $0x210] sm:$0xff] }
  0x22   :  { %1821 = vmatpush.bf16.msrb.mxu0 %v3142_v30  ;;  %1801 = vmatmul.bf16.vlgmr.msra.gmra.mxu2 %v2189_v45  ;;  %v3181_v30 = vld [vmem:[%s4092_s1 + $0x270] sm:$0xff]  ;;  %v3220_v13 = vld [vmem:[%s4092_s1 + $0x3a8] sm:$0xff]  ;;  %v3227_v19 = vld [vmem:[%s4092_s1 + $0x3e0] sm:$0xff] }
  0x23   :  { %1849 = vmatpush.bf16.msrb.mxu2 %v3158_v31  ;;  %1787 = vmatmul.bf16.vlgmr.msra.gmra.mxu1 %v2185_v48  ;;  %v3197_v31 = vld [vmem:[%s4092_s1 + $0x2f0] sm:$0xff]  ;;  %v3168_v48 = vld [vmem:[%s4092_s1 + $0x208] sm:$0xff]  ;;  %v3202_v20 = vld [vmem:[%s4092_s1 + $0x318] sm:$0xff] }
  0x24   :  { %1835 = vmatpush.bf16.msrb.mxu1 %v3150_v38  ;;  %1815 = vmatmul.bf16.vlgmr.msra.gmra.mxu3 %v2193_v49  ;;  %v3179_v38 = vld [vmem:[%s4092_s1 + $0x260] sm:$0xff]  ;;  %v3185_v45 = vld [vmem:[%s4092_s1 + $0x290] sm:$0xff]  ;;  %v3184_v49 = vld [vmem:[%s4092_s1 + $0x288] sm:$0xff] }
  0x25   :  { %1863 = vmatpush.bf16.msrb.mxu3 %v3166_v39  ;;  %v3195_v39 = vld [vmem:[%s4092_s1 + $0x2e0] sm:$0xff]  ;;  %v3212_v14 = vld [vmem:[%s4092_s1 + $0x368] sm:$0xff]  ;;  %v3218_v21 = vld [vmem:[%s4092_s1 + $0x398] sm:$0xff] }
  0x26   :  { %1822 = vmatpush.bf16.msrb.mxu0 %v3141_v46  ;;  %v3177_v46 = vld [vmem:[%s4092_s1 + $0x250] sm:$0xff]  ;;  %v3228_v15 = vld [vmem:[%s4092_s1 + $0x3e8] sm:$0xff] }
  0x27   :  { %1850 = vmatpush.bf16.msrb.mxu2 %v3157_v47  ;;  %v3193_v47 = vld [vmem:[%s4092_s1 + $0x2d0] sm:$0xff] }
  0x28   :  { %1836 = vmatpush.bf16.msrb.mxu1 %v3149_v50  ;;  %v3176_v50 = vld [vmem:[%s4092_s1 + $0x248] sm:$0xff] }
  0x29   :  { %1864 = vmatpush.bf16.msrb.mxu3 %v3165_v51  ;;  %v3192_v51 = vld [vmem:[%s4092_s1 + $0x2c8] sm:$0xff] }
  0x2a   :  { %1823 = vmatpush.bf16.msrb.mxu0 %v3140_v52  ;;  %v3167_v52 = vld [vmem:[%s4092_s1 + $0x200] sm:$0xff] }
  0x2b   :  { %1851 = vmatpush.bf16.msrb.mxu2 %v3156_v53  ;;  %v3183_v53 = vld [vmem:[%s4092_s1 + $0x280] sm:$0xff] }
  0x2c   :  { %1837 = vmatpush.bf16.msrb.mxu1 %v3148_v54  ;;  %v3206_v54 = vld [vmem:[%s4092_s1 + $0x338] sm:$0xff] }
  0x2d   :  { %1865 = vmatpush.bf16.msrb.mxu3 %v3164_v55  ;;  %v3222_v55 = vld [vmem:[%s4092_s1 + $0x3b8] sm:$0xff] }
  0x2e   :  { %1824 = vmatpush.bf16.msrb.mxu0 %v3139_v56  ;;  %v2212_v56 = vld [vmem:[%s4093_s0 + $0x20] sm:$0xf] }
  0x2f   :  { %1852 = vmatpush.bf16.msrb.mxu2 %v3155_v57  ;;  %v3094_v57 = vld [vmem:[%s4093_s0 + $0x80] sm:$0xf0] }
  0x30   :  { %1838 = vmatpush.bf16.msrb.mxu1 %v3147_v58  ;;  %v2220_v58 = vld [vmem:[%s4093_s0 + $0x28] sm:$0xf] }
  0x31   :  { %1866 = vmatpush.bf16.msrb.mxu3 %v3163_v59  ;;  %v3095_v59 = vld [vmem:[%s4093_s0 + $0x88] sm:$0xf0] }
  0x32   :  { %1825 = vmatpush.bf16.msrb.mxu0 %v3138_v60  ;;  %v3175_v60 = vld [vmem:[%s4092_s1 + $0x240] sm:$0xff] }
  0x33   :  { %1853 = vmatpush.bf16.msrb.mxu2 %v3154_v61  ;;  %v3191_v61 = vld [vmem:[%s4092_s1 + $0x2c0] sm:$0xff] }
  0x34   :  { %1839 = vmatpush.bf16.msrb.mxu1 %v3146_v62  ;;  %v3082_v62 = vld [vmem:[%s4093_s0 + $0x24] sm:$0xf] }
  0x35   :  { %1867 = vmatpush.bf16.msrb.mxu3 %v3162_v63  ;;  %v2214_v63 = vld [vmem:[%s4093_s0 + $0x84] sm:$0xf0] }
  0x36   :  { %1826 = vmatpush.bf16.msrb.mxu0 %v3137_v0  ;;  %v3083_v0 = vld [vmem:[%s4093_s0 + $0x2c] sm:$0xf] }
  0x37   :  { %1854 = vmatpush.bf16.msrb.mxu2 %v3153_v1  ;;  %v2222_v1 = vld [vmem:[%s4093_s0 + $0x8c] sm:$0xf0] }
  0x38   :  { %1840 = vmatpush.bf16.msrb.mxu1 %v3145_v2  ;;  %v2213_v2 = vor.u32 %v3094_v57, %v2212_v56  ;;  %v3236_v56 = vld [vmem:[%s4092_s1 + $0x428] sm:$0xff] }
  0x39   :  { %1868 = vmatpush.bf16.msrb.mxu3 %v3161_v3  ;;  %v2221_v3 = vor.u32 %v3095_v59, %v2220_v58  ;;  %v3252_v57 = vld [vmem:[%s4092_s1 + $0x4a8] sm:$0xff] }
  0x3a   :  { %1827 = vmatpush.bf16.msrb.mxu0 %v3136_v4  ;;  %v3214_v4 = vld [vmem:[%s4092_s1 + $0x378] sm:$0xff]  ;;  %v3244_v58 = vld [vmem:[%s4092_s1 + $0x468] sm:$0xff] }
  0x3b   :  { %1855 = vmatpush.bf16.msrb.mxu2 %v3152_v5  ;;  %v3230_v5 = vld [vmem:[%s4092_s1 + $0x3f8] sm:$0xff]  ;;  %v3260_v59 = vld [vmem:[%s4092_s1 + $0x4e8] sm:$0xff] }
  0x3c   :  { %1841 = vmatpush.bf16.msrb.mxu1 %v3144_v6  ;;  %v2217_v6 = vor.u32 %v3082_v62, %v2214_v63  ;;  %v3243_v62 = vld [vmem:[%s4092_s1 + $0x460] sm:$0xff] }
  0x3d   :  { %1869 = vmatpush.bf16.msrb.mxu3 %v3160_v7  ;;  %v2225_v7 = vor.u32 %v3083_v0, %v2222_v1  ;;  %v3259_v63 = vld [vmem:[%s4092_s1 + $0x4e0] sm:$0xff]  ;;  %v3234_v0 = vld [vmem:[%s4092_s1 + $0x418] sm:$0xff] }
  0x3e   :  { %1828 = vmatpush.bf16.msrb.mxu0 %v3135_v8  ;;  %v3205_v8 = vld [vmem:[%s4092_s1 + $0x330] sm:$0xff]  ;;  %v3250_v1 = vld [vmem:[%s4092_s1 + $0x498] sm:$0xff] }
  0x3f   :  { %1856 = vmatpush.bf16.msrb.mxu2 %v3151_v9  ;;  %v3221_v9 = vld [vmem:[%s4092_s1 + $0x3b0] sm:$0xff] }
  0x40   :  { %1842 = vmatpush.bf16.msrb.mxu1 %v3143_v16  ;;  %v3203_v16 = vld [vmem:[%s4092_s1 + $0x320] sm:$0xff] }
  0x41   :  { %1870 = vmatpush.bf16.msrb.mxu3 %v3159_v17  ;;  %1829 = vmatmul.bf16.vlgmr.msrb.gmra.mxu0 %v2197_v22  ;;  %v3219_v17 = vld [vmem:[%s4092_s1 + $0x3a0] sm:$0xff]  ;;  %v3210_v22 = vld [vmem:[%s4092_s1 + $0x358] sm:$0xff] }
  0x42   :  { %1877 = vmatpush.bf16.msra.mxu0 %v3174_v10  ;;  %1857 = vmatmul.bf16.vlgmr.msrb.gmra.mxu2 %v2205_v23  ;;  %v3213_v10 = vld [vmem:[%s4092_s1 + $0x370] sm:$0xff]  ;;  %v3226_v23 = vld [vmem:[%s4092_s1 + $0x3d8] sm:$0xff] }
  0x43   :  { %1905 = vmatpush.bf16.msra.mxu2 %v3190_v11  ;;  %1843 = vmatmul.bf16.vlgmr.msrb.gmra.mxu1 %v2201_v26  ;;  %v3229_v11 = vld [vmem:[%s4092_s1 + $0x3f0] sm:$0xff] }
  0x44   :  { %1891 = vmatpush.bf16.msra.mxu1 %v3182_v24  ;;  %1871 = vmatmul.bf16.vlgmr.msrb.gmra.mxu3 %v2209_v27  ;;  %v3201_v24 = vld [vmem:[%s4092_s1 + $0x310] sm:$0xff] }
  0x45   :  { %1919 = vmatpush.bf16.msra.mxu3 %v3198_v25  ;;  %v3217_v25 = vld [vmem:[%s4092_s1 + $0x390] sm:$0xff] }
  0x46   :  { %1878 = vmatpush.bf16.msra.mxu0 %v3173_v28  ;;  %v3209_v26 = vld [vmem:[%s4092_s1 + $0x350] sm:$0xff]  ;;  %v3200_v28 = vld [vmem:[%s4092_s1 + $0x308] sm:$0xff] }
  0x47   :  { %1906 = vmatpush.bf16.msra.mxu2 %v3189_v29  ;;  %v3225_v27 = vld [vmem:[%s4092_s1 + $0x3d0] sm:$0xff]  ;;  %v3216_v29 = vld [vmem:[%s4092_s1 + $0x388] sm:$0xff] }
  0x48   :  { %1892 = vmatpush.bf16.msra.mxu1 %v3181_v30  ;;  %v3208_v30 = vld [vmem:[%s4092_s1 + $0x348] sm:$0xff] }
  0x49   :  { %1920 = vmatpush.bf16.msra.mxu3 %v3197_v31  ;;  %v3224_v31 = vld [vmem:[%s4092_s1 + $0x3c8] sm:$0xff] }
  0x4a   :  { %1879 = vmatpush.bf16.msra.mxu0 %v3172_v32  ;;  %v3199_v32 = vld [vmem:[%s4092_s1 + $0x300] sm:$0xff] }
  0x4b   :  { %1907 = vmatpush.bf16.msra.mxu2 %v3188_v33  ;;  %v3215_v33 = vld [vmem:[%s4092_s1 + $0x380] sm:$0xff] }
  0x4c   :  { %1893 = vmatpush.bf16.msra.mxu1 %v3180_v34  ;;  %v3238_v34 = vld [vmem:[%s4092_s1 + $0x438] sm:$0xff] }
  0x4d   :  { %1921 = vmatpush.bf16.msra.mxu3 %v3196_v35  ;;  %v3254_v35 = vld [vmem:[%s4092_s1 + $0x4b8] sm:$0xff] }
  0x4e   :  { %1880 = vmatpush.bf16.msra.mxu0 %v3171_v36  ;;  %v2228_v36 = vld [vmem:[%s4093_s0 + $0x30] sm:$0xf] }
  0x4f   :  { %1908 = vmatpush.bf16.msra.mxu2 %v3187_v37  ;;  %v3096_v37 = vld [vmem:[%s4093_s0 + $0x90] sm:$0xf0] }
  0x50   :  { %1894 = vmatpush.bf16.msra.mxu1 %v3179_v38  ;;  %v2236_v38 = vld [vmem:[%s4093_s0 + $0x38] sm:$0xf] }
  0x51   :  { %1922 = vmatpush.bf16.msra.mxu3 %v3195_v39  ;;  %v3097_v39 = vld [vmem:[%s4093_s0 + $0x98] sm:$0xf0] }
  0x52   :  { %1881 = vmatpush.bf16.msra.mxu0 %v3170_v40  ;;  %v3207_v40 = vld [vmem:[%s4092_s1 + $0x340] sm:$0xff] }
  0x53   :  { %1909 = vmatpush.bf16.msra.mxu2 %v3186_v41  ;;  %v3223_v41 = vld [vmem:[%s4092_s1 + $0x3c0] sm:$0xff] }
  0x54   :  { %1895 = vmatpush.bf16.msra.mxu1 %v3178_v42  ;;  %v3084_v42 = vld [vmem:[%s4093_s0 + $0x34] sm:$0xf] }
  0x55   :  { %1923 = vmatpush.bf16.msra.mxu3 %v3194_v43  ;;  %v2230_v43 = vld [vmem:[%s4093_s0 + $0x94] sm:$0xf0] }
  0x56   :  { %1882 = vmatpush.bf16.msra.mxu0 %v3169_v44  ;;  %v3085_v44 = vld [vmem:[%s4093_s0 + $0x3c] sm:$0xf] }
  0x57   :  { %1910 = vmatpush.bf16.msra.mxu2 %v3185_v45  ;;  %v2238_v45 = vld [vmem:[%s4093_s0 + $0x9c] sm:$0xf0] }
  0x58   :  { %1896 = vmatpush.bf16.msra.mxu1 %v3177_v46  ;;  %v2229_v46 = vor.u32 %v3096_v37, %v2228_v36  ;;  %v3268_v36 = vld [vmem:[%s4092_s1 + $0x528] sm:$0xff] }
  0x59   :  { %1924 = vmatpush.bf16.msra.mxu3 %v3193_v47  ;;  %v2237_v47 = vor.u32 %v3097_v39, %v2236_v38  ;;  %v3284_v37 = vld [vmem:[%s4092_s1 + $0x5a8] sm:$0xff] }
  0x5a   :  { %1883 = vmatpush.bf16.msra.mxu0 %v3168_v48  ;;  %v3246_v48 = vld [vmem:[%s4092_s1 + $0x478] sm:$0xff]  ;;  %v3276_v38 = vld [vmem:[%s4092_s1 + $0x568] sm:$0xff] }
  0x5b   :  { %1911 = vmatpush.bf16.msra.mxu2 %v3184_v49  ;;  %v3262_v49 = vld [vmem:[%s4092_s1 + $0x4f8] sm:$0xff]  ;;  %v3292_v39 = vld [vmem:[%s4092_s1 + $0x5e8] sm:$0xff] }
  0x5c   :  { %1897 = vmatpush.bf16.msra.mxu1 %v3176_v50  ;;  %v2233_v50 = vor.u32 %v3084_v42, %v2230_v43  ;;  %v3275_v42 = vld [vmem:[%s4092_s1 + $0x560] sm:$0xff] }
  0x5d   :  { %1925 = vmatpush.bf16.msra.mxu3 %v3192_v51  ;;  %v2241_v51 = vor.u32 %v3085_v44, %v2238_v45  ;;  %v3291_v43 = vld [vmem:[%s4092_s1 + $0x5e0] sm:$0xff]  ;;  %v3266_v44 = vld [vmem:[%s4092_s1 + $0x518] sm:$0xff] }
  0x5e   :  { %1884 = vmatpush.bf16.msra.mxu0 %v3167_v52  ;;  %v3237_v52 = vld [vmem:[%s4092_s1 + $0x430] sm:$0xff]  ;;  %v3282_v45 = vld [vmem:[%s4092_s1 + $0x598] sm:$0xff] }
  0x5f   :  { %1912 = vmatpush.bf16.msra.mxu2 %v3183_v53  ;;  %v3253_v53 = vld [vmem:[%s4092_s1 + $0x4b0] sm:$0xff] }
  0x60   :  { %1898 = vmatpush.bf16.msra.mxu1 %v3175_v60  ;;  %v3235_v60 = vld [vmem:[%s4092_s1 + $0x420] sm:$0xff] }
  0x61   :  { %1926 = vmatpush.bf16.msra.mxu3 %v3191_v61  ;;  %1885 = vmatmul.bf16.vlgmr.msra.gmra.mxu0 %v2213_v2  ;;  %v3251_v61 = vld [vmem:[%s4092_s1 + $0x4a0] sm:$0xff]  ;;  %v3242_v2 = vld [vmem:[%s4092_s1 + $0x458] sm:$0xff] }
  0x62   :  { %1933 = vmatpush.bf16.msrb.mxu0 %v3206_v54  ;;  %1913 = vmatmul.bf16.vlgmr.msra.gmra.mxu2 %v2221_v3  ;;  %v3245_v54 = vld [vmem:[%s4092_s1 + $0x470] sm:$0xff]  ;;  %v3258_v3 = vld [vmem:[%s4092_s1 + $0x4d8] sm:$0xff] }
  0x63   :  { %1961 = vmatpush.bf16.msrb.mxu2 %v3222_v55  ;;  %1899 = vmatmul.bf16.vlgmr.msra.gmra.mxu1 %v2217_v6  ;;  %v3261_v55 = vld [vmem:[%s4092_s1 + $0x4f0] sm:$0xff] }
  0x64   :  { %1947 = vmatpush.bf16.msrb.mxu1 %v3214_v4  ;;  %1927 = vmatmul.bf16.vlgmr.msra.gmra.mxu3 %v2225_v7  ;;  %v3233_v4 = vld [vmem:[%s4092_s1 + $0x410] sm:$0xff] }
  0x65   :  { %1975 = vmatpush.bf16.msrb.mxu3 %v3230_v5  ;;  %v3249_v5 = vld [vmem:[%s4092_s1 + $0x490] sm:$0xff] }
  0x66   :  { %1934 = vmatpush.bf16.msrb.mxu0 %v3205_v8  ;;  %v3241_v6 = vld [vmem:[%s4092_s1 + $0x450] sm:$0xff]  ;;  %v3232_v8 = vld [vmem:[%s4092_s1 + $0x408] sm:$0xff] }
  0x67   :  { %1962 = vmatpush.bf16.msrb.mxu2 %v3221_v9  ;;  %v3257_v7 = vld [vmem:[%s4092_s1 + $0x4d0] sm:$0xff]  ;;  %v3248_v9 = vld [vmem:[%s4092_s1 + $0x488] sm:$0xff] }
  0x68   :  { %1948 = vmatpush.bf16.msrb.mxu1 %v3213_v10  ;;  %v3240_v10 = vld [vmem:[%s4092_s1 + $0x448] sm:$0xff] }
  0x69   :  { %1976 = vmatpush.bf16.msrb.mxu3 %v3229_v11  ;;  %v3256_v11 = vld [vmem:[%s4092_s1 + $0x4c8] sm:$0xff] }
  0x6a   :  { %1935 = vmatpush.bf16.msrb.mxu0 %v3204_v12  ;;  %v3231_v12 = vld [vmem:[%s4092_s1 + $0x400] sm:$0xff] }
  0x6b   :  { %1963 = vmatpush.bf16.msrb.mxu2 %v3220_v13  ;;  %v3247_v13 = vld [vmem:[%s4092_s1 + $0x480] sm:$0xff] }
  0x6c   :  { %1949 = vmatpush.bf16.msrb.mxu1 %v3212_v14  ;;  %v3270_v14 = vld [vmem:[%s4092_s1 + $0x538] sm:$0xff] }
  0x6d   :  { %1977 = vmatpush.bf16.msrb.mxu3 %v3228_v15  ;;  %v3286_v15 = vld [vmem:[%s4092_s1 + $0x5b8] sm:$0xff] }
  0x6e   :  { %1936 = vmatpush.bf16.msrb.mxu0 %v3203_v16  ;;  %v2244_v16 = vld [vmem:[%s4093_s0 + $0x40] sm:$0xf] }
  0x6f   :  { %1964 = vmatpush.bf16.msrb.mxu2 %v3219_v17  ;;  %v3098_v17 = vld [vmem:[%s4093_s0 + $0xa0] sm:$0xf0] }
  0x70   :  { %1950 = vmatpush.bf16.msrb.mxu1 %v3211_v18  ;;  %v2252_v18 = vld [vmem:[%s4093_s0 + $0x48] sm:$0xf] }
  0x71   :  { %1978 = vmatpush.bf16.msrb.mxu3 %v3227_v19  ;;  %v3099_v19 = vld [vmem:[%s4093_s0 + $0xa8] sm:$0xf0] }
  0x72   :  { %1937 = vmatpush.bf16.msrb.mxu0 %v3202_v20  ;;  %v3239_v20 = vld [vmem:[%s4092_s1 + $0x440] sm:$0xff] }
  0x73   :  { %1965 = vmatpush.bf16.msrb.mxu2 %v3218_v21  ;;  %v3255_v21 = vld [vmem:[%s4092_s1 + $0x4c0] sm:$0xff] }
  0x74   :  { %1951 = vmatpush.bf16.msrb.mxu1 %v3210_v22  ;;  %v3086_v22 = vld [vmem:[%s4093_s0 + $0x44] sm:$0xf] }
  0x75   :  { %1979 = vmatpush.bf16.msrb.mxu3 %v3226_v23  ;;  %v2246_v23 = vld [vmem:[%s4093_s0 + $0xa4] sm:$0xf0] }
  0x76   :  { %1938 = vmatpush.bf16.msrb.mxu0 %v3201_v24  ;;  %v3087_v24 = vld [vmem:[%s4093_s0 + $0x4c] sm:$0xf] }
  0x77   :  { %1966 = vmatpush.bf16.msrb.mxu2 %v3217_v25  ;;  %v2254_v25 = vld [vmem:[%s4093_s0 + $0xac] sm:$0xf0] }
  0x78   :  { %1952 = vmatpush.bf16.msrb.mxu1 %v3209_v26  ;;  %v2245_v26 = vor.u32 %v3098_v17, %v2244_v16  ;;  %v2276_v16 = vld [vmem:[%s4093_s0 + $0x60] sm:$0xf]  ;;  %v3102_v17 = vld [vmem:[%s4093_s0 + $0xc0] sm:$0xf0] }
  0x79   :  { %1980 = vmatpush.bf16.msrb.mxu3 %v3225_v27  ;;  %v2253_v27 = vor.u32 %v3099_v19, %v2252_v18  ;;  %v2277_v18 = vor.u32 %v3102_v17, %v2276_v16 }
  0x7a   :  { %1939 = vmatpush.bf16.msrb.mxu0 %v3200_v28  ;;  %v3278_v28 = vld [vmem:[%s4092_s1 + $0x578] sm:$0xff] }
  0x7b   :  { %1967 = vmatpush.bf16.msrb.mxu2 %v3216_v29  ;;  %v3294_v29 = vld [vmem:[%s4092_s1 + $0x5f8] sm:$0xff] }
  0x7c   :  { %1953 = vmatpush.bf16.msrb.mxu1 %v3208_v30  ;;  %v2249_v30 = vor.u32 %v3086_v22, %v2246_v23 }
  0x7d   :  { %1981 = vmatpush.bf16.msrb.mxu3 %v3224_v31  ;;  %v2257_v31 = vor.u32 %v3087_v24, %v2254_v25 }
  0x7e   :  { %1940 = vmatpush.bf16.msrb.mxu0 %v3199_v32  ;;  %v3269_v32 = vld [vmem:[%s4092_s1 + $0x530] sm:$0xff] }
  0x7f   :  { %1968 = vmatpush.bf16.msrb.mxu2 %v3215_v33  ;;  %v3285_v33 = vld [vmem:[%s4092_s1 + $0x5b0] sm:$0xff] }
  0x80   :  { %1954 = vmatpush.bf16.msrb.mxu1 %v3207_v40  ;;  %v3267_v40 = vld [vmem:[%s4092_s1 + $0x520] sm:$0xff] }
  0x81   :  { %1982 = vmatpush.bf16.msrb.mxu3 %v3223_v41  ;;  %1941 = vmatmul.bf16.vlgmr.msrb.gmra.mxu0 %v2229_v46  ;;  %v3283_v41 = vld [vmem:[%s4092_s1 + $0x5a0] sm:$0xff]  ;;  %v3274_v46 = vld [vmem:[%s4092_s1 + $0x558] sm:$0xff] }
  0x82   :  { %1989 = vmatpush.bf16.msra.mxu0 %v3238_v34  ;;  %1969 = vmatmul.bf16.vlgmr.msrb.gmra.mxu2 %v2237_v47  ;;  %v3277_v34 = vld [vmem:[%s4092_s1 + $0x570] sm:$0xff]  ;;  %v3290_v47 = vld [vmem:[%s4092_s1 + $0x5d8] sm:$0xff] }
  0x83   :  { %2017 = vmatpush.bf16.msra.mxu2 %v3254_v35  ;;  %1955 = vmatmul.bf16.vlgmr.msrb.gmra.mxu1 %v2233_v50  ;;  %v3293_v35 = vld [vmem:[%s4092_s1 + $0x5f0] sm:$0xff] }
  0x84   :  { %2003 = vmatpush.bf16.msra.mxu1 %v3246_v48  ;;  %1983 = vmatmul.bf16.vlgmr.msrb.gmra.mxu3 %v2241_v51  ;;  %v3265_v48 = vld [vmem:[%s4092_s1 + $0x510] sm:$0xff] }
  0x85   :  { %2031 = vmatpush.bf16.msra.mxu3 %v3262_v49  ;;  %v3281_v49 = vld [vmem:[%s4092_s1 + $0x590] sm:$0xff] }
  0x86   :  { %1990 = vmatpush.bf16.msra.mxu0 %v3237_v52  ;;  %v3273_v50 = vld [vmem:[%s4092_s1 + $0x550] sm:$0xff]  ;;  %v3264_v52 = vld [vmem:[%s4092_s1 + $0x508] sm:$0xff] }
  0x87   :  { %2018 = vmatpush.bf16.msra.mxu2 %v3253_v53  ;;  %v3289_v51 = vld [vmem:[%s4092_s1 + $0x5d0] sm:$0xff]  ;;  %v3280_v53 = vld [vmem:[%s4092_s1 + $0x588] sm:$0xff] }
  0x88   :  { %2004 = vmatpush.bf16.msra.mxu1 %v3245_v54  ;;  %v3272_v54 = vld [vmem:[%s4092_s1 + $0x548] sm:$0xff] }
  0x89   :  { %2032 = vmatpush.bf16.msra.mxu3 %v3261_v55  ;;  %v3288_v55 = vld [vmem:[%s4092_s1 + $0x5c8] sm:$0xff] }
  0x8a   :  { %1991 = vmatpush.bf16.msra.mxu0 %v3236_v56  ;;  %v3263_v56 = vld [vmem:[%s4092_s1 + $0x500] sm:$0xff] }
  0x8b   :  { %2019 = vmatpush.bf16.msra.mxu2 %v3252_v57  ;;  %v3279_v57 = vld [vmem:[%s4092_s1 + $0x580] sm:$0xff] }
  0x8c   :  { %2005 = vmatpush.bf16.msra.mxu1 %v3244_v58  ;;  %v3302_v58 = vld [vmem:[%s4092_s1 + $0x638] sm:$0xff] }
  0x8d   :  { %2033 = vmatpush.bf16.msra.mxu3 %v3260_v59  ;;  %v2260_v59 = vld [vmem:[%s4093_s0 + $0x50] sm:$0xf] }
  0x8e   :  { %1992 = vmatpush.bf16.msra.mxu0 %v3235_v60  ;;  %v3100_v60 = vld [vmem:[%s4093_s0 + $0xb0] sm:$0xf0] }
  0x8f   :  { %2020 = vmatpush.bf16.msra.mxu2 %v3251_v61  ;;  %v2268_v61 = vld [vmem:[%s4093_s0 + $0x58] sm:$0xf] }
  0x90   :  { %2006 = vmatpush.bf16.msra.mxu1 %v3243_v62  ;;  %v3101_v62 = vld [vmem:[%s4093_s0 + $0xb8] sm:$0xf0] }
  0x91   :  { %2034 = vmatpush.bf16.msra.mxu3 %v3259_v63  ;;  %v3271_v63 = vld [vmem:[%s4092_s1 + $0x540] sm:$0xff] }
  0x92   :  { %1993 = vmatpush.bf16.msra.mxu0 %v3234_v0  ;;  %v3287_v0 = vld [vmem:[%s4092_s1 + $0x5c0] sm:$0xff] }
  0x93   :  { %2021 = vmatpush.bf16.msra.mxu2 %v3250_v1  ;;  %v3088_v1 = vld [vmem:[%s4093_s0 + $0x54] sm:$0xf] }
  0x94   :  { %2007 = vmatpush.bf16.msra.mxu1 %v3242_v2  ;;  %v2262_v2 = vld [vmem:[%s4093_s0 + $0xb4] sm:$0xf0] }
  0x95   :  { %2035 = vmatpush.bf16.msra.mxu3 %v3258_v3  ;;  %v3089_v3 = vld [vmem:[%s4093_s0 + $0x5c] sm:$0xf] }
  0x96   :  { %1994 = vmatpush.bf16.msra.mxu0 %v3233_v4  ;;  %v2270_v4 = vld [vmem:[%s4093_s0 + $0xbc] sm:$0xf0] }
  0x97   :  { %2022 = vmatpush.bf16.msra.mxu2 %v3249_v5  ;;  %v2261_v5 = vor.u32 %v3100_v60, %v2260_v59 }
  0x98   :  { %2008 = vmatpush.bf16.msra.mxu1 %v3241_v6  ;;  %v2269_v6 = vor.u32 %v3101_v62, %v2268_v61 }
  0x99   :  { %2036 = vmatpush.bf16.msra.mxu3 %v3257_v7  ;;  %v2265_v7 = vor.u32 %v3088_v1, %v2262_v2 }
  0x9a   :  { %1995 = vmatpush.bf16.msra.mxu0 %v3232_v8  ;;  %v2273_v8 = vor.u32 %v3089_v3, %v2270_v4 }
  0x9b   :  { %2023 = vmatpush.bf16.msra.mxu2 %v3248_v9  ;;  %v3301_v9 = vld [vmem:[%s4092_s1 + $0x630] sm:$0xff] }
  0x9c   :  { %2009 = vmatpush.bf16.msra.mxu1 %v3240_v10  ;;  %v3300_v10 = vld [vmem:[%s4092_s1 + $0x628] sm:$0xff] }
  0x9d   :  { %2037 = vmatpush.bf16.msra.mxu3 %v3256_v11  ;;  %v3299_v11 = vld [vmem:[%s4092_s1 + $0x620] sm:$0xff] }
  0x9e   :  { %1996 = vmatpush.bf16.msra.mxu0 %v3231_v12  ;;  %v3298_v12 = vld [vmem:[%s4092_s1 + $0x618] sm:$0xff]  ;;  %v1774_v19 = vpop.f32.mrf.mxu0 }
  0x9f   :  { %2024 = vmatpush.bf16.msra.mxu2 %v3247_v13  ;;  %v3297_v13 = vld [vmem:[%s4092_s1 + $0x610] sm:$0xff] }
  0xa0   :  { %2010 = vmatpush.bf16.msra.mxu1 %v3239_v20  ;;  %v1788_v20 = vpop.f32.mrf.mxu1 }
  0xa1   :  { %2038 = vmatpush.bf16.msra.mxu3 %v3255_v21  ;;  %1997 = vmatmul.bf16.vlgmr.msra.gmra.mxu0 %v2245_v26 }
  0xa2   :  { %2045 = vmatpush.bf16.msrb.mxu0 %v3270_v14  ;;  %2025 = vmatmul.bf16.vlgmr.msra.gmra.mxu2 %v2253_v27  ;;  %v3296_v14 = vld [vmem:[%s4092_s1 + $0x608] sm:$0xff] }
  0xa3   :  { %2073 = vmatpush.bf16.msrb.mxu2 %v3286_v15  ;;  %2011 = vmatmul.bf16.vlgmr.msra.gmra.mxu1 %v2249_v30  ;;  %v3295_v15 = vld [vmem:[%s4092_s1 + $0x600] sm:$0xff] }
  0xa4   :  { %2059 = vmatpush.bf16.msrb.mxu1 %v3278_v28  ;;  %2039 = vmatmul.bf16.vlgmr.msra.gmra.mxu3 %v2257_v31 }
  0xa5   :  { %2087 = vmatpush.bf16.msrb.mxu3 %v3294_v29  ;;  %v1802_v21 = vpop.f32.mrf.mxu2 }
  0xa6   :  { %2046 = vmatpush.bf16.msrb.mxu0 %v3269_v32  ;;  %v1776_v22 = vpop.f32.mrf.mxu0 }
  0xa7   :  { %2074 = vmatpush.bf16.msrb.mxu2 %v3285_v33  ;;  %v1816_v23 = vpop.f32.mrf.mxu3  ;;  %v1789_v33 = vadd.f32 %v1788_v20, %v1774_v19 }
  0xa8   :  { %2060 = vmatpush.bf16.msrb.mxu1 %v3277_v34  ;;  %v1790_v24 = vpop.f32.mrf.mxu1 }
  0xa9   :  { %2088 = vmatpush.bf16.msrb.mxu3 %v3293_v35 }
  0xaa   :  { %2047 = vmatpush.bf16.msrb.mxu0 %v3268_v36  ;;  %v1803_v36 = vadd.f32 %v1802_v21, %v1789_v33 }
  0xab   :  { %2075 = vmatpush.bf16.msrb.mxu2 %v3284_v37 }
  0xac   :  { %2061 = vmatpush.bf16.msrb.mxu1 %v3276_v38 }
  0xad   :  { %2089 = vmatpush.bf16.msrb.mxu3 %v3292_v39  ;;  %v1804_v25 = vpop.f32.mrf.mxu2  ;;  %v1817_v39 = vadd.f32 %v1816_v23, %v1803_v36 }
  0xae   :  { %2048 = vmatpush.bf16.msrb.mxu0 %v3267_v40 }
  0xaf   :  { %2076 = vmatpush.bf16.msrb.mxu2 %v3283_v41  ;;  %v1818_v27 = vpop.f32.mrf.mxu3 }
  0xb0   :  { %2062 = vmatpush.bf16.msrb.mxu1 %v3275_v42  ;;  %v1791_v42 = vadd.f32 %v1790_v24, %v1776_v22 }
  0xb1   :  { %2090 = vmatpush.bf16.msrb.mxu3 %v3291_v43 }
  0xb2   :  { %2049 = vmatpush.bf16.msrb.mxu0 %v3266_v44 }
  0xb3   :  { %2077 = vmatpush.bf16.msrb.mxu2 %v3282_v45  ;;  %v1805_v45 = vadd.f32 %v1804_v25, %v1791_v42 }
  0xb4   :  { %2063 = vmatpush.bf16.msrb.mxu1 %v3274_v46 }
  0xb5   :  { %2091 = vmatpush.bf16.msrb.mxu3 %v3290_v47 }
  0xb6   :  { %2050 = vmatpush.bf16.msrb.mxu0 %v3265_v48 }
  0xb7   :  { %2078 = vmatpush.bf16.msrb.mxu2 %v3281_v49 }
  0xb8   :  { %2064 = vmatpush.bf16.msrb.mxu1 %v3273_v50  ;;  %v1819_v50 = vadd.f32 %v1818_v27, %v1805_v45 }
  0xb9   :  { %2092 = vmatpush.bf16.msrb.mxu3 %v3289_v51 }
  0xba   :  { %2051 = vmatpush.bf16.msrb.mxu0 %v3264_v52 }
  0xbb   :  { %2079 = vmatpush.bf16.msrb.mxu2 %v3280_v53 }
  0xbc   :  { %2065 = vmatpush.bf16.msrb.mxu1 %v3272_v54 }
  0xbd   :  { %2093 = vmatpush.bf16.msrb.mxu3 %v3288_v55 }
  0xbe   :  { %2052 = vmatpush.bf16.msrb.mxu0 %v3263_v56  ;;  %v1830_v26 = vpop.f32.mrf.mxu0 }
  0xbf   :  { %2080 = vmatpush.bf16.msrb.mxu2 %v3279_v57  ;;  %v1831_v43 = vadd.f32 %v1830_v26, %v1817_v39 }
  0xc0   :  { %2066 = vmatpush.bf16.msrb.mxu1 %v3271_v63  ;;  %v1844_v28 = vpop.f32.mrf.mxu1 }
  0xc1   :  { %2094 = vmatpush.bf16.msrb.mxu3 %v3287_v0  ;;  %2053 = vmatmul.bf16.vlgmr.msrb.gmra.mxu0 %v2261_v5  ;;  %v1845_v46 = vadd.f32 %v1844_v28, %v1831_v43  ;;  %v3306_v43 = vmov 2.0  }
  0xc2   :  { %2101 = vmatpush.bf16.msra.mxu0 %v3302_v58  ;;  %2081 = vmatmul.bf16.vlgmr.msrb.gmra.mxu2 %v2269_v6  ;;  %3304 = vrcp.f32 %v3306_v43 }
  0xc3   :  { %2067 = vmatmul.bf16.vlgmr.msrb.gmra.mxu1 %v2265_v7 }
  0xc4   :  { %2095 = vmatmul.bf16.vlgmr.msrb.gmra.mxu3 %v2273_v8 }
  0xc5   :  { %v1858_v29 = vpop.f32.mrf.mxu2 }
  0xc6   :  { %2102 = vmatpush.bf16.msra.mxu0 %v3301_v9  ;;  %v1832_v30 = vpop.f32.mrf.mxu0  ;;  %v1859_v51 = vadd.f32 %v1858_v29, %v1845_v46 }
  0xc7   :  { %v1872_v31 = vpop.f32.mrf.mxu3  ;;  %v1833_v52 = vadd.f32 %v1832_v30, %v1819_v50 }
  0xc8   :  { %v1846_v32 = vpop.f32.mrf.mxu1  ;;  %v1873_v54 = vadd.f32 %v1872_v31, %v1859_v51  ;;  %v3305_v50 = vpop.eup %3304 }
  0xc9   :  { %v1847_v56 = vadd.f32 %v1846_v32, %v1833_v52  ;;  %vm2139_vm1 = vweird.f32 %v3305_v50 }
  0xca   :  { %2103 = vmatpush.bf16.msra.mxu0 %v3300_v10 }
  0xcd   :  { %v1860_v34 = vpop.f32.mrf.mxu2 }
  0xce   :  { %2104 = vmatpush.bf16.msra.mxu0 %v3299_v11  ;;  %v1861_v59 = vadd.f32 %v1860_v34, %v1847_v56 }
  0xcf   :  { %v1874_v37 = vpop.f32.mrf.mxu3 }
  0xd0   :  { %v1875_v63 = vadd.f32 %v1874_v37, %v1861_v59 }
  0xd2   :  { %2105 = vmatpush.bf16.msra.mxu0 %v3298_v12 }
  0xd6   :  { %2106 = vmatpush.bf16.msra.mxu0 %v3297_v13 }
  0xda   :  { %2107 = vmatpush.bf16.msra.mxu0 %v3296_v14 }
  0xde   :  { %2108 = vmatpush.bf16.msra.mxu0 %v3295_v15  ;;  %v1886_v35 = vpop.f32.mrf.mxu0 }
  0xdf   :  { %v1887_v57 = vadd.f32 %v1886_v35, %v1873_v54 }
  0xe0   :  { %v1900_v38 = vpop.f32.mrf.mxu1 }
  0xe1   :  { %2109 = vmatmul.bf16.vlgmr.msra.gmra.mxu0 %v2277_v18  ;;  %v1901_v61 = vadd.f32 %v1900_v38, %v1887_v57 }
  0xe5   :  { %v1914_v40 = vpop.f32.mrf.mxu2 }
  0xe6   :  { %v1888_v41 = vpop.f32.mrf.mxu0  ;;  %v1915_v0 = vadd.f32 %v1914_v40, %v1901_v61 }
  0xe7   :  { %v1928_v44 = vpop.f32.mrf.mxu3  ;;  %v1889_v1 = vadd.f32 %v1888_v41, %v1875_v63 }
  0xe8   :  { %v1902_v47 = vpop.f32.mrf.mxu1  ;;  %v1929_v3 = vadd.f32 %v1928_v44, %v1915_v0 }
  0xe9   :  { %v1903_v6 = vadd.f32 %v1902_v47, %v1889_v1 }
  0xed   :  { %v1916_v48 = vpop.f32.mrf.mxu2 }
  0xee   :  { %v1917_v8 = vadd.f32 %v1916_v48, %v1903_v6 }
  0xef   :  { %v1930_v53 = vpop.f32.mrf.mxu3 }
  0xf0   :  { %v1931_v12 = vadd.f32 %v1930_v53, %v1917_v8  ;;  %v2134_v53 = vmul.f32 2.0, %v3305_v50 }
  0xfe   :  { %v1942_v49 = vpop.f32.mrf.mxu0 }
  0xff   :  { %v1943_v7 = vadd.f32 %v1942_v49, %v1929_v3 }
 0x100   :  { %v1956_v55 = vpop.f32.mrf.mxu1 }
 0x101   :  { %v1957_v10 = vadd.f32 %v1956_v55, %v1943_v7 }
 0x105   :  { %v1970_v58 = vpop.f32.mrf.mxu2 }
 0x106   :  { %v1944_v60 = vpop.f32.mrf.mxu0  ;;  %v1971_v13 = vadd.f32 %v1970_v58, %v1957_v10  ;;  %v2135_v58 = vsub.f32 1.0, %v2134_v53 }
 0x107   :  { %v1984_v62 = vpop.f32.mrf.mxu3  ;;  %v1945_v15 = vadd.f32 %v1944_v60, %v1931_v12 }
 0x108   :  { %v1958_v2 = vpop.f32.mrf.mxu1  ;;  %v1985_v17 = vadd.f32 %v1984_v62, %v1971_v13  ;;  %v2136_v61 = vmul.f32 %v3305_v50, %v2135_v58 }
 0x109   :  { %v1959_v19 = vadd.f32 %v1958_v2, %v1945_v15 }
 0x10a   :  { %v2137_v0 = vadd.f32 %v3305_v50, %v2136_v61 }
 0x10c   :  { %v2141_v3 = vsel %vm2139_vm1, %v3305_v50, %v2137_v0 }
 0x10d   :  { %v1972_v4 = vpop.f32.mrf.mxu2 }
 0x10e   :  { %v1973_v21 = vadd.f32 %v1972_v4, %v1959_v19 }
 0x10f   :  { %v1986_v9 = vpop.f32.mrf.mxu3 }
 0x110   :  { %v1987_v26 = vadd.f32 %v1986_v9, %v1973_v21 }
 0x11e   :  { %v1998_v5 = vpop.f32.mrf.mxu0 }
 0x11f   :  { %v1999_v20 = vadd.f32 %v1998_v5, %v1985_v17 }
 0x120   :  { %v2012_v11 = vpop.f32.mrf.mxu1 }
 0x121   :  { %v2013_v23 = vadd.f32 %v2012_v11, %v1999_v20 }
 0x125   :  { %v2026_v14 = vpop.f32.mrf.mxu2 }
 0x126   :  { %v2000_v16 = vpop.f32.mrf.mxu0  ;;  %v2027_v27 = vadd.f32 %v2026_v14, %v2013_v23 }
 0x127   :  { %v2040_v18 = vpop.f32.mrf.mxu3  ;;  %v2001_v28 = vadd.f32 %v2000_v16, %v1987_v26 }
 0x128   :  { %v2014_v22 = vpop.f32.mrf.mxu1  ;;  %v2041_v30 = vadd.f32 %v2040_v18, %v2027_v27 }
 0x129   :  { %v2015_v32 = vadd.f32 %v2014_v22, %v2001_v28 }
 0x12d   :  { %v2028_v24 = vpop.f32.mrf.mxu2 }
 0x12e   :  { %v2029_v35 = vadd.f32 %v2028_v24, %v2015_v32 }
 0x12f   :  { %v2042_v29 = vpop.f32.mrf.mxu3 }
 0x130   :  { %v2043_v39 = vadd.f32 %v2042_v29, %v2029_v35 }
 0x13e   :  { %v2054_v25 = vpop.f32.mrf.mxu0 }
 0x13f   :  { %v2055_v33 = vadd.f32 %v2054_v25, %v2041_v30 }
 0x140   :  { %v2068_v31 = vpop.f32.mrf.mxu1 }
 0x141   :  { %v2069_v37 = vadd.f32 %v2068_v31, %v2055_v33 }
 0x145   :  { %v2082_v34 = vpop.f32.mrf.mxu2 }
 0x146   :  { %v2056_v36 = vpop.f32.mrf.mxu0  ;;  %v2083_v40 = vadd.f32 %v2082_v34, %v2069_v37 }
 0x147   :  { %v2096_v38 = vpop.f32.mrf.mxu3  ;;  %v2057_v41 = vadd.f32 %v2056_v36, %v2043_v39 }
 0x148   :  { %v2070_v42 = vpop.f32.mrf.mxu1  ;;  %v2097_v44 = vadd.f32 %v2096_v38, %v2083_v40 }
 0x149   :  { %v2071_v47 = vadd.f32 %v2070_v42, %v2057_v41 }
 0x14d   :  { %v2084_v45 = vpop.f32.mrf.mxu2 }
 0x14e   :  { %v2085_v49 = vadd.f32 %v2084_v45, %v2071_v47 }
 0x14f   :  { %v2098_v51 = vpop.f32.mrf.mxu3 }
 0x150   :  { %v2099_v52 = vadd.f32 %v2098_v51, %v2085_v49 }
 0x15e   :  { %v2110_v46 = vpop.f32.mrf.mxu0 }
 0x15f   :  { %v2111_v48 = vadd.f32 %v2110_v46, %v2097_v44 }
 0x161   :  { %2116 = vst.msk [vmem:[%s4094_s2] sm:$0xff] %vm2115_vm0, %v2111_v48  ;;  %v2123_v56 = vsel %vm2115_vm0, %v2111_v48, 0.0 }
 0x166   :  { %v2112_v54 = vpop.f32.mrf.mxu0 }
 0x167   :  { %v2113_v55 = vadd.f32 %v2112_v54, %v2099_v52 }
 0x169   :  { %2117 = vst.msk [vmem:[%s4094_s2 + $0x8] sm:$0xff] %vm2115_vm0, %v2113_v55  ;;  %v2124_v57 = vsel %vm2115_vm0, %v2113_v55, 0.0 }
 0x16a   :  { %v2125_v59 = vadd.f32 %v2124_v57, %v2123_v56 }
 0x16c   :  { %v2126_v60 = vrot.slane %v2125_v59, 4 }
 0x16e   :  { %v2127_v62 = vadd.f32 %v2126_v60, %v2125_v59 }
 0x170   :  { %v2128_v63 = vrot.slane %v2127_v62, 2 }
 0x172   :  { %v2129_v1 = vadd.f32 %v2128_v63, %v2127_v62 }
 0x174   :  { %v2130_v2 = vrot.slane %v2129_v1, 1 }
 0x176   :  { %v2131_v4 = vadd.f32 %v2130_v2, %v2129_v1 }
 0x178   :  { %v2147_v5 = vmul.f32 %v2141_v3, %v2131_v4 }
 0x17a   :  { %v2148_v6 = vsub.f32 %v2111_v48, %v2147_v5  ;;  %v2149_v7 = vsub.f32 %v2113_v55, %v2147_v5  ;;  %v2162_v17 = vmul.f32 %v2147_v5, %v2147_v5 }
 0x17c   :  { %v2150_v8 = vmul.f32 %v2148_v6, %v2148_v6  ;;  %v2151_v9 = vmul.f32 %v2149_v7, %v2149_v7  ;;  %v2164_v20 = vmul.f32 14.0, %v2162_v17 }
 0x17e   :  { %v2152_v10 = vsel %vm2115_vm0, %v2150_v8, 0.0  ;;  %v2153_v11 = vsel %vm2115_vm0, %v2151_v9, 0.0 }
 0x17f   :  { %v2154_v12 = vadd.f32 %v2153_v11, %v2152_v10 }
 0x181   :  { %v2155_v13 = vrot.slane %v2154_v12, 4 }
 0x183   :  { %v2156_v14 = vadd.f32 %v2155_v13, %v2154_v12 }
 0x185   :  { %v2157_v15 = vrot.slane %v2156_v14, 2 }
 0x187   :  { %v2158_v16 = vadd.f32 %v2157_v15, %v2156_v14 }
 0x189   :  { %v2159_v18 = vrot.slane %v2158_v16, 1 }
 0x18b   :  { %v2160_v19 = vadd.f32 %v2159_v18, %v2158_v16 }
 0x18d   :  { %v2165_v21 = vsub.f32 %v2160_v19, %v2164_v20 }
 0x18f   :  { %v2167_v22 = vsel %vm2166_vm2, %v2131_v4, %v2165_v21 }
 0x190   :  { %2169 = vst.msk [vmem:[%s4095_s3] sm:$0x3] %vm2168_vm3, %v2167_v22 }

</bundles_post_ra>
